<compile_context>
chip_gen: v5e
topology: v5e:2x2
jax: 0.10.0
libtpu: 0.0.40
codegen_flags: <defaults>
</compile_context>

<pallas_src>
import jax
import jax.numpy as jnp
from jax import lax
from jax.experimental import pallas as pl
from jax.experimental.pallas import tpu as pltpu

BN_EPS = 1e-5
_LANES = 128
_PHASES = ((0, 0), (0, 1), (1, 0), (1, 1))
# ConvTranspose2d(4,2,1): output phase r, neighbour offset d -> kernel tap.
_KTAP = ((3, 1), (2, 0))


def _round_up(n, m):
    return (n + m - 1) // m * m


# ------------------------------ Pallas kernel --------------------------------

def _final_stage_kernel(x_ref, wd_ref, bd_ref, wf_ref, bf_ref, out_ref):
    """One strip of `th` input rows -> all 4 deconv phases, BN folded, ReLU,
    1x1 final conv, packed lane-dense.

    x_ref : (th+2, W+2, Cin) bf16   padded input strip (1px halo)
    wd_ref: (4, 4*Cin, Cp)   bf16   per-phase deconv weight, BN scale folded
    bd_ref: (1, Cp)          f32    folded BN bias
    wf_ref: (4, Cp, OUTW)    bf16   final 1x1 weight; phase p -> cols [p*J, p*J+J)
    bf_ref: (1, OUTW)        f32    final bias, tiled per phase
    out   : (th*W, OUTW)     bf16
    """
    th = x_ref.shape[0] - 2
    w = x_ref.shape[1] - 2
    cin = x_ref.shape[2]
    rows = th * w

    y = None
    for p, (rh, rw) in enumerate(_PHASES):
        # Gather the 4 taps of this phase's 2x2 conv directly from VMEM
        # (static slices of the strip; no HBM im2col).
        taps = [x_ref[rh + dh: rh + dh + th, rw + dw: rw + dw + w, :]
                for dh in (0, 1) for dw in (0, 1)]
        pat = jnp.concatenate(taps, axis=-1).reshape(rows, 4 * cin)       # bf16
        h = jnp.dot(pat, wd_ref[p], preferred_element_type=jnp.float32)   # (rows, Cp)
        h = jnp.maximum(h + bd_ref[...], 0.0)                             # BN + ReLU
        yp = jnp.dot(h.astype(wf_ref.dtype), wf_ref[p],
                     preferred_element_type=jnp.float32)                  # (rows, OUTW)
        y = yp if y is None else y + yp
    out_ref[...] = (y + bf_ref[...]).astype(out_ref.dtype)


# ------------------------- VMEM budget / tile choice --------------------------

def _vmem_budget_bytes():
    phys = 64 * 1024 * 1024                       # safest floor (v7x per-core VMEM)
    try:
        info = pltpu.get_tpu_info()
        phys = int(getattr(info, "vmem_capacity_bytes", phys)) or phys
    except Exception:
        pass
    # ~52 MiB on v7x (64 MiB physical), ~105 MiB on v5e/v6e (128 MiB physical);
    # never hand Mosaic the full physical VMEM.
    return max(24 * 1024 * 1024, int(phys * 0.82))


def _strip_bytes(th, w, cin, cp, outw):
    rows = th * w
    x_blk = (th + 2) * (w + 2) * cin * 2          # bf16 input strip
    o_blk = rows * outw * 2                       # bf16 output slab
    wts = 4 * (4 * cin) * cp * 2 + 4 * cp * outw * 2 + cp * 4 + outw * 4
    # in-kernel temporaries: patches (+relayout), h f32 + bf16 recast, f32 acc
    tmp = rows * 4 * cin * 2 * 2 + rows * cp * (4 + 2) + rows * outw * 4
    return 2 * (x_blk + o_blk) + 2 * wts + tmp    # double-buffered blocks/weights


def _pick_strip_height(batch, h, w, cin, cp, outw, budget):
    """Largest divisor of H whose working set fits the per-generation budget,
    keeping >=2 grid steps when possible (v7x has 2 TensorCores)."""
    for th in [d for d in range(h, 0, -1) if h % d == 0]:
        if _strip_bytes(th, w, cin, cp, outw) > int(0.75 * budget):
            continue
        if batch * (h // th) >= 2 or th == 1:
            return th
    # TODO(synk): for very wide images / huge Cin a W-tiling grid axis would be
    # the next step; a 1-row strip is the conservative fallback here.
    return 1


# ------------------------------- forward pass --------------------------------

def posenet_forward(x, w_deconv, gamma, beta, mean, var, w_final, b_final):
    """final_stage forward: ConvTranspose2d(4,2,1, no bias) -> BatchNorm2d ->
    ReLU -> Conv2d(1x1).  x: (B, Cin, H, W) NCHW -> (B, J, 2H, 2W) f32."""
    B, Cin, H, W = x.shape
    Cmid = w_deconv.shape[1]
    J = w_final.shape[0]
    Cp = _round_up(Cmid, _LANES)
    OUTW = _round_up(4 * J, _LANES)               # 4 phases packed along lanes

    budget = _vmem_budget_bytes()
    th = _pick_strip_height(B, H, W, Cin, Cp, OUTW, budget)
    n_h = H // th
    S = B * n_h
    rows = th * W

    # --- activations: bf16 NHWC, 1px halo, per-strip row slabs (tiny dup) ----
    xh = jnp.transpose(x, (0, 2, 3, 1)).astype(jnp.bfloat16)        # (B,H,W,Cin)
    xp = jnp.pad(xh, ((0, 0), (1, 1), (1, 1), (0, 0)))              # (B,H+2,W+2,Cin)
    strips = [xp[:, i * th: i * th + th + 2] for i in range(n_h)]
    x_strips = jnp.stack(strips, axis=1).reshape(S, th + 2, W + 2, Cin)

    # --- fold BatchNorm (inference form) into the deconv weight / bias -------
    scale = gamma * lax.rsqrt(var + BN_EPS)                          # (Cmid,)
    bd = (beta - mean * scale).astype(jnp.float32)
    wd = []
    for rh, rw in _PHASES:
        taps = [w_deconv[:, :, _KTAP[rh][dh], _KTAP[rw][dw]]         # (Cin, Cmid)
                for dh in (0, 1) for dw in (0, 1)]
        wd.append(jnp.concatenate(taps, axis=0))                     # (4*Cin, Cmid)
    wd = jnp.stack(wd, axis=0) * scale[None, None, :]                # (4,4Cin,Cmid)
    wd = jnp.pad(wd, ((0, 0), (0, 0), (0, Cp - Cmid))).astype(jnp.bfloat16)
    bd = jnp.pad(bd, (0, Cp - Cmid)).reshape(1, Cp)

    # --- final 1x1 conv: phase p writes output columns [p*J, (p+1)*J) --------
    wf0 = jnp.pad(jnp.transpose(w_final.reshape(J, Cmid), (1, 0)),
                  ((0, Cp - Cmid), (0, 0)))                          # (Cp, J)
    wf = jnp.zeros((4, Cp, OUTW), jnp.float32)
    bf = jnp.zeros((OUTW,), jnp.float32)
    for p in range(4):
        wf = wf.at[p, :, p * J:(p + 1) * J].set(wf0)
        bf = bf.at[p * J:(p + 1) * J].set(b_final)
    wf = wf.astype(jnp.bfloat16)
    bf = bf.reshape(1, OUTW)

    out = pl.pallas_call(
        _final_stage_kernel,
        out_shape=jax.ShapeDtypeStruct((S, rows, OUTW), jnp.bfloat16),
        grid_spec=pltpu.PrefetchScalarGridSpec(
            num_scalar_prefetch=0,
            grid=(S,),                                               # row strips
            in_specs=[
                pl.BlockSpec((None, th + 2, W + 2, Cin), lambda s: (s, 0, 0, 0)),
                # Grid-invariant operands: constant index maps, DMA'd once and
                # kept resident (re-copies are elided across steps).
                # TODO(synk): pipeline_mode=pl.Buffered(1) would drop their
                # second VMEM buffer; only matters for very large Cin/Cmid.
                pl.BlockSpec((4, 4 * Cin, Cp), lambda s: (0, 0, 0)),
                pl.BlockSpec((1, Cp), lambda s: (0, 0)),
                pl.BlockSpec((4, Cp, OUTW), lambda s: (0, 0, 0)),
                pl.BlockSpec((1, OUTW), lambda s: (0, 0)),
            ],
            out_specs=pl.BlockSpec((None, rows, OUTW), lambda s: (s, 0, 0)),
        ),
        compiler_params=pltpu.CompilerParams(
            dimension_semantics=("parallel",),
            vmem_limit_bytes=int(budget)),
    )(x_strips, wd, bd, wf, bf)                                      # (S, rows, OUTW)

    # --- unpack: (S, th*W, 4*J) lane-packed phases -> (B, J, 2H, 2W) ---------
    o = out[:, :, :4 * J].astype(jnp.float32)
    o = o.reshape(B, n_h, th, W, 2, 2, J)          # (b, hb, qh, qw, rh, rw, j)
    o = jnp.transpose(o, (0, 6, 1, 2, 4, 3, 5))    # (b, j, hb, qh, rh, qw, rw)
    return o.reshape(B, J, 2 * H, 2 * W)


# ----------------------- plain-JAX f32 reference -----------------------------

def reference_forward(x, w_deconv, gamma, beta, mean, var, w_final, b_final):
    """ConvTranspose2d(4,2,1) via lhs-dilated conv, then BN -> ReLU -> 1x1."""
    k = w_deconv.shape[2]
    w = jnp.flip(jnp.transpose(w_deconv, (1, 0, 2, 3)), (2, 3))      # OIHW, flipped
    h = lax.conv_general_dilated(
        x, w, window_strides=(1, 1), padding=[(k - 2, k - 2)] * 2,
        lhs_dilation=(2, 2), dimension_numbers=("NCHW", "OIHW", "NCHW"),
        precision=lax.Precision.HIGHEST)
    scale = (gamma * lax.rsqrt(var + BN_EPS))[None, :, None, None]
    h = (h - mean[None, :, None, None]) * scale + beta[None, :, None, None]
    h = jnp.maximum(h, 0.0)
    y = jnp.einsum("bchw,jc->bjhw", h, w_final.reshape(w_final.shape[0], -1),
                   precision=lax.Precision.HIGHEST)
    return y + b_final[None, :, None, None]


if __name__ == "__main__":
    key = jax.random.PRNGKey(0)
    B, Cin, H, W = 2, 32, 16, 16          # NCHW input, like PyTorch
    Cmid, J, KD = 128, 17, 4              # deconv channels, joints, deconv kernel

    k_x, k_wd, k_wf = jax.random.split(key, 3)
    x = jax.random.normal(k_x, (B, Cin, H, W), jnp.float32)

    # Deterministic init per PoseNet.init_weights (deconv_with_bias=False):
    w_deconv = 0.001 * jax.random.normal(k_wd, (Cin, Cmid, KD, KD), jnp.float32)
    gamma = jnp.ones((Cmid,), jnp.float32)             # BN weight = 1
    beta = jnp.zeros((Cmid,), jnp.float32)             # BN bias = 0
    running_mean = jnp.zeros((Cmid,), jnp.float32)
    running_var = jnp.ones((Cmid,), jnp.float32)
    w_final = 0.001 * jax.random.normal(k_wf, (J, Cmid, 1, 1), jnp.float32)
    b_final = jnp.zeros((J,), jnp.float32)             # final conv bias = 0

    fwd = jax.jit(posenet_forward)
    out = fwd(x, w_deconv, gamma, beta, running_mean, running_var,
              w_final, b_final)
    jax.block_until_ready(out)

    assert out.shape == (B, J, 2 * H, 2 * W), out.shape
    assert bool(jnp.all(jnp.isfinite(out)))

    # Correctness check vs an f32 XLA reference (loose tol: bf16 operands/out).
    ref = reference_forward(x, w_deconv, gamma, beta, running_mean, running_var,
                            w_final, b_final)
    tol = 0.05 * float(jnp.max(jnp.abs(ref))) + 1e-6
    max_err = float(jnp.max(jnp.abs(out - ref)))
    assert max_err <= tol, (max_err, tol)

    print("KERNEL_OK")
</pallas_src>

<mosaic_0001>
module attributes {stable_mosaic.version = 11 : i64} {
  func.func @_final_stage_kernel(%arg0: i32, %arg1: memref<1x18x18x32xbf16, #tpu.memory_space<vmem>>, %arg2: memref<4x128x128xbf16, #tpu.memory_space<vmem>>, %arg3: memref<1x128xf32, #tpu.memory_space<vmem>>, %arg4: memref<4x128x128xbf16, #tpu.memory_space<vmem>>, %arg5: memref<1x128xf32, #tpu.memory_space<vmem>>, %arg6: memref<1x256x128xbf16, #tpu.memory_space<vmem>>) attributes {dimension_semantics = [#tpu.dimension_semantics<parallel>], iteration_bounds = array<i64: 2>, scalar_prefetch = 0 : i64, scratch_operands = 0 : i64, tpu.core_type = #tpu.core_type<tc>, window_params = [{transform_indices = @transform_0, window_bounds = array<i64: 1, 18, 18, 32>}, {pipeline_mode = #tpu.pipeline_mode<synchronous>, transform_indices = @transform_1, window_bounds = array<i64: 4, 128, 128>}, {pipeline_mode = #tpu.pipeline_mode<synchronous>, transform_indices = @transform_2, window_bounds = array<i64: 1, 128>}, {pipeline_mode = #tpu.pipeline_mode<synchronous>, transform_indices = @transform_3, window_bounds = array<i64: 4, 128, 128>}, {pipeline_mode = #tpu.pipeline_mode<synchronous>, transform_indices = @transform_4, window_bounds = array<i64: 1, 128>}, {transform_indices = @transform_5, window_bounds = array<i64: 1, 256, 128>}]} {
    %c0 = arith.constant 0 : index
    %c0_0 = arith.constant 0 : index
    %c0_1 = arith.constant 0 : index
    %c0_2 = arith.constant 0 : index
    %0 = vector.load %arg1[%c0, %c0_0, %c0_1, %c0_2] : memref<1x18x18x32xbf16, #tpu.memory_space<vmem>>, vector<1x16x16x32xbf16>
    %1 = vector.shape_cast %0 : vector<1x16x16x32xbf16> to vector<16x16x32xbf16>
    %c0_3 = arith.constant 0 : index
    %c0_4 = arith.constant 0 : index
    %c1 = arith.constant 1 : index
    %c0_5 = arith.constant 0 : index
    %2 = vector.load %arg1[%c0_3, %c0_4, %c1, %c0_5] : memref<1x18x18x32xbf16, #tpu.memory_space<vmem>>, vector<1x16x16x32xbf16>
    %3 = vector.shape_cast %2 : vector<1x16x16x32xbf16> to vector<16x16x32xbf16>
    %c0_6 = arith.constant 0 : index
    %c1_7 = arith.constant 1 : index
    %c0_8 = arith.constant 0 : index
    %c0_9 = arith.constant 0 : index
    %4 = vector.load %arg1[%c0_6, %c1_7, %c0_8, %c0_9] : memref<1x18x18x32xbf16, #tpu.memory_space<vmem>>, vector<1x16x16x32xbf16>
    %5 = vector.shape_cast %4 : vector<1x16x16x32xbf16> to vector<16x16x32xbf16>
    %c0_10 = arith.constant 0 : index
    %c1_11 = arith.constant 1 : index
    %c1_12 = arith.constant 1 : index
    %c0_13 = arith.constant 0 : index
    %6 = vector.load %arg1[%c0_10, %c1_11, %c1_12, %c0_13] : memref<1x18x18x32xbf16, #tpu.memory_space<vmem>>, vector<1x16x16x32xbf16>
    %7 = vector.shape_cast %6 : vector<1x16x16x32xbf16> to vector<16x16x32xbf16>
    %8 = tpu.concatenate %1, %3, %5, %7 in 2 : vector<16x16x32xbf16>, vector<16x16x32xbf16>, vector<16x16x32xbf16>, vector<16x16x32xbf16> -> vector<16x16x128xbf16>
    %9 = vector.shape_cast %8 : vector<16x16x128xbf16> to vector<256x128xbf16>
    %c0_14 = arith.constant 0 : index
    %c0_15 = arith.constant 0 : index
    %c0_16 = arith.constant 0 : index
    %10 = vector.load %arg2[%c0_14, %c0_15, %c0_16] : memref<4x128x128xbf16, #tpu.memory_space<vmem>>, vector<1x128x128xbf16>
    %11 = vector.shape_cast %10 : vector<1x128x128xbf16> to vector<128x128xbf16>
    %cst = arith.constant dense<0.000000e+00> : vector<256x128xf32>
    %12 = tpu.matmul %9, %11, %cst {dimension_numbers = #tpu.dot_dimension_numbers<[1], [0], [0], [1], [0, 0, 1, 1], [], []>} : vector<256x128xbf16>, vector<128x128xbf16>, vector<256x128xf32> -> vector<256x128xf32>
    %c0_17 = arith.constant 0 : index
    %c0_18 = arith.constant 0 : index
    %13 = vector.load %arg3[%c0_17, %c0_18] : memref<1x128xf32, #tpu.memory_space<vmem>>, vector<1x128xf32>
    %14 = vector.broadcast %13 : vector<1x128xf32> to vector<256x128xf32>
    %15 = arith.addf %12, %14 : vector<256x128xf32>
    %cst_19 = arith.constant 0.000000e+00 : f32
    %16 = vector.broadcast %cst_19 : f32 to vector<256x128xf32>
    %17 = arith.maximumf %15, %16 : vector<256x128xf32>
    %18 = arith.truncf %17 : vector<256x128xf32> to vector<256x128xbf16>
    %c0_20 = arith.constant 0 : index
    %c0_21 = arith.constant 0 : index
    %c0_22 = arith.constant 0 : index
    %19 = vector.load %arg4[%c0_20, %c0_21, %c0_22] : memref<4x128x128xbf16, #tpu.memory_space<vmem>>, vector<1x128x128xbf16>
    %20 = vector.shape_cast %19 : vector<1x128x128xbf16> to vector<128x128xbf16>
    %cst_23 = arith.constant dense<0.000000e+00> : vector<256x128xf32>
    %21 = tpu.matmul %18, %20, %cst_23 {dimension_numbers = #tpu.dot_dimension_numbers<[1], [0], [0], [1], [0, 0, 1, 1], [], []>} : vector<256x128xbf16>, vector<128x128xbf16>, vector<256x128xf32> -> vector<256x128xf32>
    %c0_24 = arith.constant 0 : index
    %c0_25 = arith.constant 0 : index
    %c1_26 = arith.constant 1 : index
    %c0_27 = arith.constant 0 : index
    %22 = vector.load %arg1[%c0_24, %c0_25, %c1_26, %c0_27] : memref<1x18x18x32xbf16, #tpu.memory_space<vmem>>, vector<1x16x16x32xbf16>
    %23 = vector.shape_cast %22 : vector<1x16x16x32xbf16> to vector<16x16x32xbf16>
    %c0_28 = arith.constant 0 : index
    %c0_29 = arith.constant 0 : index
    %c2 = arith.constant 2 : index
    %c0_30 = arith.constant 0 : index
    %24 = vector.load %arg1[%c0_28, %c0_29, %c2, %c0_30] : memref<1x18x18x32xbf16, #tpu.memory_space<vmem>>, vector<1x16x16x32xbf16>
    %25 = vector.shape_cast %24 : vector<1x16x16x32xbf16> to vector<16x16x32xbf16>
    %c0_31 = arith.constant 0 : index
    %c1_32 = arith.constant 1 : index
    %c1_33 = arith.constant 1 : index
    %c0_34 = arith.constant 0 : index
    %26 = vector.load %arg1[%c0_31, %c1_32, %c1_33, %c0_34] : memref<1x18x18x32xbf16, #tpu.memory_space<vmem>>, vector<1x16x16x32xbf16>
    %27 = vector.shape_cast %26 : vector<1x16x16x32xbf16> to vector<16x16x32xbf16>
    %c0_35 = arith.constant 0 : index
    %c1_36 = arith.constant 1 : index
    %c2_37 = arith.constant 2 : index
    %c0_38 = arith.constant 0 : index
    %28 = vector.load %arg1[%c0_35, %c1_36, %c2_37, %c0_38] : memref<1x18x18x32xbf16, #tpu.memory_space<vmem>>, vector<1x16x16x32xbf16>
    %29 = vector.shape_cast %28 : vector<1x16x16x32xbf16> to vector<16x16x32xbf16>
    %30 = tpu.concatenate %23, %25, %27, %29 in 2 : vector<16x16x32xbf16>, vector<16x16x32xbf16>, vector<16x16x32xbf16>, vector<16x16x32xbf16> -> vector<16x16x128xbf16>
    %31 = vector.shape_cast %30 : vector<16x16x128xbf16> to vector<256x128xbf16>
    %c1_39 = arith.constant 1 : index
    %c0_40 = arith.constant 0 : index
    %c0_41 = arith.constant 0 : index
    %32 = vector.load %arg2[%c1_39, %c0_40, %c0_41] : memref<4x128x128xbf16, #tpu.memory_space<vmem>>, vector<1x128x128xbf16>
    %33 = vector.shape_cast %32 : vector<1x128x128xbf16> to vector<128x128xbf16>
    %cst_42 = arith.constant dense<0.000000e+00> : vector<256x128xf32>
    %34 = tpu.matmul %31, %33, %cst_42 {dimension_numbers = #tpu.dot_dimension_numbers<[1], [0], [0], [1], [0, 0, 1, 1], [], []>} : vector<256x128xbf16>, vector<128x128xbf16>, vector<256x128xf32> -> vector<256x128xf32>
    %c0_43 = arith.constant 0 : index
    %c0_44 = arith.constant 0 : index
    %35 = vector.load %arg3[%c0_43, %c0_44] : memref<1x128xf32, #tpu.memory_space<vmem>>, vector<1x128xf32>
    %36 = vector.broadcast %35 : vector<1x128xf32> to vector<256x128xf32>
    %37 = arith.addf %34, %36 : vector<256x128xf32>
    %cst_45 = arith.constant 0.000000e+00 : f32
    %38 = vector.broadcast %cst_45 : f32 to vector<256x128xf32>
    %39 = arith.maximumf %37, %38 : vector<256x128xf32>
    %40 = arith.truncf %39 : vector<256x128xf32> to vector<256x128xbf16>
    %c1_46 = arith.constant 1 : index
    %c0_47 = arith.constant 0 : index
    %c0_48 = arith.constant 0 : index
    %41 = vector.load %arg4[%c1_46, %c0_47, %c0_48] : memref<4x128x128xbf16, #tpu.memory_space<vmem>>, vector<1x128x128xbf16>
    %42 = vector.shape_cast %41 : vector<1x128x128xbf16> to vector<128x128xbf16>
    %cst_49 = arith.constant dense<0.000000e+00> : vector<256x128xf32>
    %43 = tpu.matmul %40, %42, %cst_49 {dimension_numbers = #tpu.dot_dimension_numbers<[1], [0], [0], [1], [0, 0, 1, 1], [], []>} : vector<256x128xbf16>, vector<128x128xbf16>, vector<256x128xf32> -> vector<256x128xf32>
    %44 = arith.addf %21, %43 : vector<256x128xf32>
    %c0_50 = arith.constant 0 : index
    %c1_51 = arith.constant 1 : index
    %c0_52 = arith.constant 0 : index
    %c0_53 = arith.constant 0 : index
    %45 = vector.load %arg1[%c0_50, %c1_51, %c0_52, %c0_53] : memref<1x18x18x32xbf16, #tpu.memory_space<vmem>>, vector<1x16x16x32xbf16>
    %46 = vector.shape_cast %45 : vector<1x16x16x32xbf16> to vector<16x16x32xbf16>
    %c0_54 = arith.constant 0 : index
    %c1_55 = arith.constant 1 : index
    %c1_56 = arith.constant 1 : index
    %c0_57 = arith.constant 0 : index
    %47 = vector.load %arg1[%c0_54, %c1_55, %c1_56, %c0_57] : memref<1x18x18x32xbf16, #tpu.memory_space<vmem>>, vector<1x16x16x32xbf16>
    %48 = vector.shape_cast %47 : vector<1x16x16x32xbf16> to vector<16x16x32xbf16>
    %c0_58 = arith.constant 0 : index
    %c2_59 = arith.constant 2 : index
    %c0_60 = arith.constant 0 : index
    %c0_61 = arith.constant 0 : index
    %49 = vector.load %arg1[%c0_58, %c2_59, %c0_60, %c0_61] : memref<1x18x18x32xbf16, #tpu.memory_space<vmem>>, vector<1x16x16x32xbf16>
    %50 = vector.shape_cast %49 : vector<1x16x16x32xbf16> to vector<16x16x32xbf16>
    %c0_62 = arith.constant 0 : index
    %c2_63 = arith.constant 2 : index
    %c1_64 = arith.constant 1 : index
    %c0_65 = arith.constant 0 : index
    %51 = vector.load %arg1[%c0_62, %c2_63, %c1_64, %c0_65] : memref<1x18x18x32xbf16, #tpu.memory_space<vmem>>, vector<1x16x16x32xbf16>
    %52 = vector.shape_cast %51 : vector<1x16x16x32xbf16> to vector<16x16x32xbf16>
    %53 = tpu.concatenate %46, %48, %50, %52 in 2 : vector<16x16x32xbf16>, vector<16x16x32xbf16>, vector<16x16x32xbf16>, vector<16x16x32xbf16> -> vector<16x16x128xbf16>
    %54 = vector.shape_cast %53 : vector<16x16x128xbf16> to vector<256x128xbf16>
    %c2_66 = arith.constant 2 : index
    %c0_67 = arith.constant 0 : index
    %c0_68 = arith.constant 0 : index
    %55 = vector.load %arg2[%c2_66, %c0_67, %c0_68] : memref<4x128x128xbf16, #tpu.memory_space<vmem>>, vector<1x128x128xbf16>
    %56 = vector.shape_cast %55 : vector<1x128x128xbf16> to vector<128x128xbf16>
    %cst_69 = arith.constant dense<0.000000e+00> : vector<256x128xf32>
    %57 = tpu.matmul %54, %56, %cst_69 {dimension_numbers = #tpu.dot_dimension_numbers<[1], [0], [0], [1], [0, 0, 1, 1], [], []>} : vector<256x128xbf16>, vector<128x128xbf16>, vector<256x128xf32> -> vector<256x128xf32>
    %c0_70 = arith.constant 0 : index
    %c0_71 = arith.constant 0 : index
    %58 = vector.load %arg3[%c0_70, %c0_71] : memref<1x128xf32, #tpu.memory_space<vmem>>, vector<1x128xf32>
    %59 = vector.broadcast %58 : vector<1x128xf32> to vector<256x128xf32>
    %60 = arith.addf %57, %59 : vector<256x128xf32>
    %cst_72 = arith.constant 0.000000e+00 : f32
    %61 = vector.broadcast %cst_72 : f32 to vector<256x128xf32>
    %62 = arith.maximumf %60, %61 : vector<256x128xf32>
    %63 = arith.truncf %62 : vector<256x128xf32> to vector<256x128xbf16>
    %c2_73 = arith.constant 2 : index
    %c0_74 = arith.constant 0 : index
    %c0_75 = arith.constant 0 : index
    %64 = vector.load %arg4[%c2_73, %c0_74, %c0_75] : memref<4x128x128xbf16, #tpu.memory_space<vmem>>, vector<1x128x128xbf16>
    %65 = vector.shape_cast %64 : vector<1x128x128xbf16> to vector<128x128xbf16>
    %cst_76 = arith.constant dense<0.000000e+00> : vector<256x128xf32>
    %66 = tpu.matmul %63, %65, %cst_76 {dimension_numbers = #tpu.dot_dimension_numbers<[1], [0], [0], [1], [0, 0, 1, 1], [], []>} : vector<256x128xbf16>, vector<128x128xbf16>, vector<256x128xf32> -> vector<256x128xf32>
    %67 = arith.addf %44, %66 : vector<256x128xf32>
    %c0_77 = arith.constant 0 : index
    %c1_78 = arith.constant 1 : index
    %c1_79 = arith.constant 1 : index
    %c0_80 = arith.constant 0 : index
    %68 = vector.load %arg1[%c0_77, %c1_78, %c1_79, %c0_80] : memref<1x18x18x32xbf16, #tpu.memory_space<vmem>>, vector<1x16x16x32xbf16>
    %69 = vector.shape_cast %68 : vector<1x16x16x32xbf16> to vector<16x16x32xbf16>
    %c0_81 = arith.constant 0 : index
    %c1_82 = arith.constant 1 : index
    %c2_83 = arith.constant 2 : index
    %c0_84 = arith.constant 0 : index
    %70 = vector.load %arg1[%c0_81, %c1_82, %c2_83, %c0_84] : memref<1x18x18x32xbf16, #tpu.memory_space<vmem>>, vector<1x16x16x32xbf16>
    %71 = vector.shape_cast %70 : vector<1x16x16x32xbf16> to vector<16x16x32xbf16>
    %c0_85 = arith.constant 0 : index
    %c2_86 = arith.constant 2 : index
    %c1_87 = arith.constant 1 : index
    %c0_88 = arith.constant 0 : index
    %72 = vector.load %arg1[%c0_85, %c2_86, %c1_87, %c0_88] : memref<1x18x18x32xbf16, #tpu.memory_space<vmem>>, vector<1x16x16x32xbf16>
    %73 = vector.shape_cast %72 : vector<1x16x16x32xbf16> to vector<16x16x32xbf16>
    %c0_89 = arith.constant 0 : index
    %c2_90 = arith.constant 2 : index
    %c2_91 = arith.constant 2 : index
    %c0_92 = arith.constant 0 : index
    %74 = vector.load %arg1[%c0_89, %c2_90, %c2_91, %c0_92] : memref<1x18x18x32xbf16, #tpu.memory_space<vmem>>, vector<1x16x16x32xbf16>
    %75 = vector.shape_cast %74 : vector<1x16x16x32xbf16> to vector<16x16x32xbf16>
    %76 = tpu.concatenate %69, %71, %73, %75 in 2 : vector<16x16x32xbf16>, vector<16x16x32xbf16>, vector<16x16x32xbf16>, vector<16x16x32xbf16> -> vector<16x16x128xbf16>
    %77 = vector.shape_cast %76 : vector<16x16x128xbf16> to vector<256x128xbf16>
    %c3 = arith.constant 3 : index
    %c0_93 = arith.constant 0 : index
    %c0_94 = arith.constant 0 : index
    %78 = vector.load %arg2[%c3, %c0_93, %c0_94] : memref<4x128x128xbf16, #tpu.memory_space<vmem>>, vector<1x128x128xbf16>
    %79 = vector.shape_cast %78 : vector<1x128x128xbf16> to vector<128x128xbf16>
    %cst_95 = arith.constant dense<0.000000e+00> : vector<256x128xf32>
    %80 = tpu.matmul %77, %79, %cst_95 {dimension_numbers = #tpu.dot_dimension_numbers<[1], [0], [0], [1], [0, 0, 1, 1], [], []>} : vector<256x128xbf16>, vector<128x128xbf16>, vector<256x128xf32> -> vector<256x128xf32>
    %c0_96 = arith.constant 0 : index
    %c0_97 = arith.constant 0 : index
    %81 = vector.load %arg3[%c0_96, %c0_97] : memref<1x128xf32, #tpu.memory_space<vmem>>, vector<1x128xf32>
    %82 = vector.broadcast %81 : vector<1x128xf32> to vector<256x128xf32>
    %83 = arith.addf %80, %82 : vector<256x128xf32>
    %cst_98 = arith.constant 0.000000e+00 : f32
    %84 = vector.broadcast %cst_98 : f32 to vector<256x128xf32>
    %85 = arith.maximumf %83, %84 : vector<256x128xf32>
    %86 = arith.truncf %85 : vector<256x128xf32> to vector<256x128xbf16>
    %c3_99 = arith.constant 3 : index
    %c0_100 = arith.constant 0 : index
    %c0_101 = arith.constant 0 : index
    %87 = vector.load %arg4[%c3_99, %c0_100, %c0_101] : memref<4x128x128xbf16, #tpu.memory_space<vmem>>, vector<1x128x128xbf16>
    %88 = vector.shape_cast %87 : vector<1x128x128xbf16> to vector<128x128xbf16>
    %cst_102 = arith.constant dense<0.000000e+00> : vector<256x128xf32>
    %89 = tpu.matmul %86, %88, %cst_102 {dimension_numbers = #tpu.dot_dimension_numbers<[1], [0], [0], [1], [0, 0, 1, 1], [], []>} : vector<256x128xbf16>, vector<128x128xbf16>, vector<256x128xf32> -> vector<256x128xf32>
    %90 = arith.addf %67, %89 : vector<256x128xf32>
    %c0_103 = arith.constant 0 : index
    %c0_104 = arith.constant 0 : index
    %91 = vector.load %arg5[%c0_103, %c0_104] : memref<1x128xf32, #tpu.memory_space<vmem>>, vector<1x128xf32>
    %92 = vector.broadcast %91 : vector<1x128xf32> to vector<256x128xf32>
    %93 = arith.addf %90, %92 : vector<256x128xf32>
    %94 = arith.truncf %93 : vector<256x128xf32> to vector<256x128xbf16>
    %c0_105 = arith.constant 0 : index
    %c0_106 = arith.constant 0 : index
    %c0_107 = arith.constant 0 : index
    %95 = vector.load %arg6[%c0_105, %c0_106, %c0_107] : memref<1x256x128xbf16, #tpu.memory_space<vmem>>, vector<1x256x128xbf16>
    %96 = vector.shape_cast %95 : vector<1x256x128xbf16> to vector<256x128xbf16>
    %97 = vector.shape_cast %94 : vector<256x128xbf16> to vector<1x256x128xbf16>
    tpu.vector_store %arg6[%c0_105, %c0_106, %c0_107], %97 {strides = array<i32>} : memref<1x256x128xbf16, #tpu.memory_space<vmem>>, vector<1x256x128xbf16>,
    return
  }
  func.func @transform_0(%arg0: i32) -> (i32, i32, i32, i32) {
    %c0_i32 = arith.constant 0 : i32
    %c0_i32_0 = arith.constant 0 : i32
    %c0_i32_1 = arith.constant 0 : i32
    %c0_i32_2 = arith.constant 0 : i32
    return %arg0, %c0_i32, %c0_i32_0, %c0_i32_1 : i32, i32, i32, i32
  }
  func.func @transform_1(%arg0: i32) -> (i32, i32, i32) {
    %c0_i32 = arith.constant 0 : i32
    %c0_i32_0 = arith.constant 0 : i32
    %c0_i32_1 = arith.constant 0 : i32
    %c0_i32_2 = arith.constant 0 : i32
    return %c0_i32, %c0_i32_0, %c0_i32_1 : i32, i32, i32
  }
  func.func @transform_2(%arg0: i32) -> (i32, i32) {
    %c0_i32 = arith.constant 0 : i32
    %c0_i32_0 = arith.constant 0 : i32
    %c0_i32_1 = arith.constant 0 : i32
    return %c0_i32, %c0_i32_0 : i32, i32
  }
  func.func @transform_3(%arg0: i32) -> (i32, i32, i32) {
    %c0_i32 = arith.constant 0 : i32
    %c0_i32_0 = arith.constant 0 : i32
    %c0_i32_1 = arith.constant 0 : i32
    %c0_i32_2 = arith.constant 0 : i32
    return %c0_i32, %c0_i32_0, %c0_i32_1 : i32, i32, i32
  }
  func.func @transform_4(%arg0: i32) -> (i32, i32) {
    %c0_i32 = arith.constant 0 : i32
    %c0_i32_0 = arith.constant 0 : i32
    %c0_i32_1 = arith.constant 0 : i32
    return %c0_i32, %c0_i32_0 : i32, i32
  }
  func.func @transform_5(%arg0: i32) -> (i32, i32, i32) {
    %c0_i32 = arith.constant 0 : i32
    %c0_i32_0 = arith.constant 0 : i32
    %c0_i32_1 = arith.constant 0 : i32
    return %arg0, %c0_i32, %c0_i32_0 : i32, i32, i32
  }
}

</mosaic_0001>

<bundles_post_ra>
// kernel: posenet_forward.1
= control target key start
LH: loop header
LB: loop body
LE: loop exit
PB: predicated region body
PF: predicated region fallthrough
CT: control target
= control target key end

     0   :  { %s6063_s18 = smov 0   ;;  %s8970_s0 = inlined_call_operand.vmem [shape: bf16[2,18,18,32], index: 0, kind: input, shape index: {}]   ;;  %s8971_s1 = inlined_call_operand.vmem [shape: bf16[4,128,128], index: 1, kind: input, shape index: {}]   ;;  %s8972_s2 = inlined_call_operand.vmem [shape: f32[1,128], index: 2, kind: input, shape index: {}]   ;;  %s8973_s3 = inlined_call_operand.vmem [shape: bf16[4,128,128], index: 3, kind: input, shape index: {}]   ;;  %s8974_s4 = inlined_call_operand.vmem [shape: f32[1,128], index: 4, kind: input, shape index: {}]   ;;  %s8975_s5 = inlined_call_operand.vmem [shape: bf16[2,256,128], index: 5, kind: output, shape index: {}]  }
   0x1 LB: > { %s5092_s19 = sadd.s32 4294967295, %s6028_s18   ;;  %p5096_p0 = scmp.ge.s32.totalorder %s6028_s18, 1  ;;  %s6028_s18 = sphi %s6063_s18, %s15_s18  }
   0x2   : > { %p187_p1 = scmp.lt.s32.totalorder %s6028_s18, 3 }
   0x4   : > { %p188_p2 = pnand %p5096_p0, %p187_p1 }
   0x6   : > { %191 = sbr.rel (%p188_p2) target bundleno = 1114 (0x45a), region = 40 }
   0xb   : > { %p215_p3 = scmp.lt.s32.totalorder %s5092_s19, 1  ;;  %s6030_s24 = smov 64   ;;  %vm450_vm0 = vsmask.f32 7424  ;;  %vm1059_vm1 = vcmask 261120   ;;  %vm1092_vm2 = vcmask 523264  }
   0xc   : > { %s6031_s25 = smov 32   ;;  %s6032_s26 = smov 96   ;;  %vm1125_vm3 = vcmask 785408  }
   0xd   : > { %s9314_s19 = smov (!%p215_p3, %s5092_s19), 1 }
   0xe   : > { %s5933_s20 = smul.u32 216, %s9314_s19  ;;  %s5582_s28 = sshll.u32 %s9314_s19, 7 }
   0xf   : > { %s8835_s6 = scalar_lea.vmem %s8975_s5, %s5582_s28 }
  0x10   : > { %s6077_s23 = scalar_lea.vmem %s8970_s0, %s5933_s20 }
  0x11   : > { %v6080_v0 = vld [vmem:[%s6077_s23 + $0x18] sm:$0xff]   ;;  %v5132_v1 = vld [vmem:[%s6077_s23 + $0x14] sm:$0x1]  ;;  %v6084_v2 = vld [vmem:[%s6077_s23 + $0xc] sm:$0xff]  }
  0x12   : > { %9082 = vst [vmem:[#allocation2_spill] sm:$0xff] %v6084_v2  ;;  %v5971_v3 = vld [vmem:[%s6077_s23 + $0xc] sm:$0xf0]  ;;  %757 = vrot.lane.b32.xlu1 %v6080_v0, %s6030_s24  ;;  %v803_v4 = vunpack.c.l.b16 %v5132_v1  ;;  %v257_v5 = vld [vmem:[%s6077_s23 + $0x8] sm:$0x1]  ;;  %755 = vrot.lane.b32.xlu0 %v6084_v2, %s6030_s24 }
  0x13   : > { %v5838_v6 = vld [vmem:[%s6077_s23] sm:$0xf0]  ;;  %v5839_v7 = vld [vmem:[%s6077_s23] sm:$0xe]  ;;  %v418_v8 = vunpack.c.l.b16 %v257_v5  ;;  %v5972_v10 = vld [vmem:[%s6077_s23 + $0xc] sm:$0xe] }
  0x14   : > { %v5840_v9 = vor.u32 %v5839_v7, %v5838_v6  ;;  %v258_v11 = vld [vmem:[%s6077_s23 + $0x14] sm:$0x1]  ;;  %v6095_v12 = vld [vmem:[%s6077_s23 + $0x10] sm:$0xf]  ;;  %v6097_v13 = vpack.c.b16 %v803_v4, %v803_v4  ;;  %v1396_v15 = vld [vmem:[%s6077_s23 + $0xc] sm:$0xe]  ;;  %v5973_v21 = vor.u32 %v5972_v10, %v5971_v3 }
  0x15   : > { %v419_v14 = vunpack.c.l.b16 %v258_v11  ;;  %v6100_v16 = vpack.c.b16 %v418_v8, %v418_v8  ;;  %v8985_v19 = vunpack.c.l.b16 %v6095_v12  ;;  %v1444_v26 = vunpack.c.l.b16 %v1396_v15  ;;  %v5133_v27 = vld [vmem:[%s6077_s23 + $0x20] sm:$0x1]  ;;  %v5862_v30 = vld [vmem:[%s6077_s23 + $0x18] sm:$0xf0]  ;;  %v5863_v31 = vld [vmem:[%s6077_s23 + $0x18] sm:$0xe] }
  0x16   : > { %9083 = vst [vmem:[#allocation3_spill] sm:$0xff] %v6097_v13  ;;  %v1476_v17 = vshrl.u32 %v5840_v9, 16  ;;  %v1478_v18 = vshll.u32 %v5840_v9, 16  ;;  %1699 = vrot.lane.b32.xlu2 %v6097_v13, %s6030_s24  ;;  %v843_v20 = vshll.u32 %v6097_v13, 16  ;;  %v1780_v28 = vshrl.u32 %v5973_v21, 16  ;;  %v6151_v62 = vld [vmem:[%s6077_s23 + $0x24] sm:$0xff]  }
  0x17   : > { %v6108_v22 = vpack.c.b16 %v419_v14, %v419_v14  ;;  %v1483_v23 = vshrl.u32 %v6100_v16, 16  ;;  %v459_v24 = vshll.u32 %v6100_v16, 16  ;;  %v1782_v29 = vshll.u32 %v5973_v21, 16  ;;  %v259_v51 = vld [vmem:[%s6077_s23 + $0x20] sm:$0x1]  ;;  %9086 = vst [vmem:[#allocation6_spill] sm:$0xff] %v6151_v62 }
  0x18   : > { %v1480_v25 = vrot.slane %v1478_v18, 1  ;;  %v8981_v32 = vshrl.u32 %v6097_v13, 16  ;;  %v1460_v35 = vpack.c.b16 %v8985_v19, %v1444_v26  ;;  %v6121_v36 = vrot.slane %v843_v20, 1  ;;  %v5841_v52 = vld [vmem:[%s6077_s23 + $0x18] sm:$0xf0] }
  0x19   : > { %v6116_v33 = vrot.slane %v459_v24, 1  ;;  %v1784_v37 = vrot.slane %v1782_v29, 1  ;;  %v471_v38 = vshll.u32 %v6108_v22, 16  ;;  %v804_v39 = vunpack.c.l.b16 %v5133_v27  ;;  %v5842_v53 = vld [vmem:[%s6077_s23 + $0x18] sm:$0xe] }
  0x1a   : > { %v1481_v34 = vor.u32 %v1480_v25, %v1476_v17  ;;  %1637 = vrot.lane.b32.xlu1 %v1483_v23, %s6031_s25  ;;  %v1486_v41 = vshrl.u32 %v1460_v35, 16  ;;  %v1488_v42 = vshll.u32 %v1460_v35, 16  ;;  %v5864_v43 = vor.u32 %v5863_v31, %v5862_v30  ;;  %v5982_v61 = vld [vmem:[%s6077_s23 + $0x24] sm:$0xe]  ;;  %v5981_v63 = vld [vmem:[%s6077_s23 + $0x24] sm:$0xf0] }
  0x1b   : > { %v1785_v44 = vor.u32 %v1784_v37, %v1780_v28  ;;  %v6130_v46 = vrot.slane %v471_v38, 1  ;;  %v6136_v49 = vpack.c.b16 %v804_v39, %v804_v39  ;;  %v1493_v54 = vshrl.u32 %v6108_v22, 16  ;;  %v5134_v6 = vld [vmem:[%s6077_s23 + $0x2c] sm:$0x1]  ;;  %v6168_v17 = vld [vmem:[%s6077_s23 + $0x28] sm:$0xf] }
  0x1c   : > { %v1482_v40 = vsel %vm450_vm0, %v1481_v34, %v6116_v33  ;;  %v1490_v45 = vrot.slane %v1488_v42, 1  ;;  %v1792_v50 = vshll.u32 %v5864_v43, 16  ;;  %v1790_v55 = vshrl.u32 %v5864_v43, 16  ;;  %v1398_v18 = vld [vmem:[%s6077_s23 + $0x24] sm:$0xe] }
  0x1d   : > { %1635 = vrot.lane.b32.xlu0 %v1482_v40, %s6031_s25  ;;  %v6134_v47 = vsel %vm450_vm0, %v1785_v44, %v6121_v36  ;;  %9085 = vst [vmem:[#allocation5_spill] sm:$0xff] %v6136_v49  ;;  %v420_v56 = vunpack.c.l.b16 %v259_v51  ;;  %v855_v58 = vshll.u32 %v6136_v49, 16  ;;  %v5843_v60 = vor.u32 %v5842_v53, %v5841_v52  ;;  %v260_v25 = vld [vmem:[%s6077_s23 + $0x2c] sm:$0x1]  ;;  %v5865_v42 = vld [vmem:[%s6077_s23 + $0x30] sm:$0xf0] }
  0x1e   : > { %1941 = vrot.lane.b32.xlu2 %v8981_v32, %s6032_s26  ;;  %9084 = vst [vmem:[#allocation4_spill] sm:$0xff] %v6134_v47  ;;  %v1491_v48 = vor.u32 %v1490_v45, %v1486_v41  ;;  %v1794_v59 = vrot.slane %v1792_v50, 1  ;;  %v8980_v7 = vshrl.u32 %v6136_v49, 16  ;;  %v805_v9 = vunpack.c.l.b16 %v5134_v6  ;;  %v5866_v43 = vld [vmem:[%s6077_s23 + $0x30] sm:$0xe] }
  0x1f   : > { %v6154_v1 = vpack.c.b16 %v420_v56, %v420_v56  ;;  %v6156_v3 = vrot.slane %v855_v58, 1  ;;  %v1498_v5 = vshll.u32 %v5843_v60, 16  ;;  %v1496_v11 = vshrl.u32 %v5843_v60, 16  ;;  %v5135_v44 = vld [vmem:[%s6077_s23 + $0x38] sm:$0x1] }
  0x20   : > { %v1492_v57 = vsel %vm450_vm0, %v1491_v48, %v6130_v46  ;;  %v1795_v4 = vor.u32 %v1794_v59, %v1790_v55  ;;  %v5983_v15 = vor.u32 %v5982_v61, %v5981_v63  ;;  %v6178_v21 = vpack.c.b16 %v805_v9, %v805_v9  ;;  %v6213_v55 = vld [vmem:[%s6077_s23 + $0x30] sm:$0xff]   ;;  %v261_v60 = vld [vmem:[%s6077_s23 + $0x38] sm:$0x1] }
  0x21   : > { %v483_v8 = vshll.u32 %v6154_v1, 16  ;;  %v1500_v14 = vrot.slane %v1498_v5, 1  ;;  %v8984_v26 = vunpack.c.l.b16 %v6168_v17  ;;  %v1446_v27 = vunpack.c.l.b16 %v1398_v18  ;;  %v5844_v61 = vld [vmem:[%s6077_s23 + $0x30] sm:$0xf0]  ;;  %v5845_v63 = vld [vmem:[%s6077_s23 + $0x30] sm:$0xe] }
  0x22   : > { %1939 = vrot.lane.b32.xlu1 %v6134_v47, %s6032_s26  ;;  %v6165_v10 = vsel %vm450_vm0, %v1795_v4, %v6156_v3  ;;  %9088 = vst [vmem:[#allocation8_spill] sm:$0xff] %v6178_v21  ;;  %v1802_v24 = vshll.u32 %v5983_v15, 16  ;;  %v1503_v28 = vshrl.u32 %v6154_v1, 16  ;;  %v867_v29 = vshll.u32 %v6178_v21, 16  ;;  %v6232_v18 = vld [vmem:[%s6077_s23 + $0x3c] sm:$0xff]  }
  0x23   : > { %9087 = vst [vmem:[#allocation7_spill] sm:$0xff] %v6165_v10  ;;  %v6176_v20 = vrot.slane %v483_v8, 1  ;;  %v1501_v23 = vor.u32 %v1500_v14, %v1496_v11  ;;  %v421_v30 = vunpack.c.l.b16 %v260_v25  ;;  %v1800_v34 = vshrl.u32 %v5983_v15, 16  ;;  %v5985_v15 = vld [vmem:[%s6077_s23 + $0x3c] sm:$0xe] }
  0x24   : > { %v1804_v35 = vrot.slane %v1802_v24, 1  ;;  %v1462_v37 = vpack.c.b16 %v8984_v26, %v1446_v27  ;;  %v6194_v39 = vrot.slane %v867_v29, 1  ;;  %v8979_v45 = vshrl.u32 %v6178_v21, 16  ;;  %9091 = vst [vmem:[#allocation11_spill] sm:$0xff] %v6232_v18  ;;  %v5136_v29 = vld [vmem:[%s6077_s23 + $0x44] sm:$0x1] }
  0x25   : > { %1639 = vrot.lane.b32.xlu0 %v1492_v57, %s6031_s25  ;;  %v1502_v31 = vsel %vm450_vm0, %v1501_v23, %v6176_v20  ;;  %v6192_v38 = vpack.c.b16 %v421_v30, %v421_v30  ;;  %v5867_v50 = vor.u32 %v5866_v43, %v5865_v42  ;;  %v422_v5 = vunpack.c.l.b16 %v261_v60  ;;  %v5984_v23 = vld [vmem:[%s6077_s23 + $0x3c] sm:$0xf0]  ;;  %v1400_v43 = vld [vmem:[%s6077_s23 + $0x3c] sm:$0xe] }
  0x26   : > { %1641 = vrot.lane.b32.xlu2 %v1493_v54, %s6031_s25  ;;  %v1805_v40 = vor.u32 %v1804_v35, %v1800_v34  ;;  %v1508_v41 = vshll.u32 %v1462_v37, 16  ;;  %v1506_v52 = vshrl.u32 %v1462_v37, 16  ;;  %v806_v54 = vunpack.c.l.b16 %v5135_v44  ;;  %v6249_v42 = vld [vmem:[%s6077_s23 + $0x40] sm:$0xf] }
  0x27   : > { %v495_v48 = vshll.u32 %v6192_v38, 16  ;;  %v1812_v57 = vshll.u32 %v5867_v50, 16  ;;  %v1513_v4 = vshrl.u32 %v6192_v38, 16  ;;  %v5846_v6 = vor.u32 %v5845_v63, %v5844_v61  ;;  %v5833_v26 = vld [vmem:[%s6077_s23 + $0x60] sm:$0xff]  }
  0x28   : > { %v6205_v51 = vsel %vm450_vm0, %v1805_v40, %v6194_v39  ;;  %v1510_v53 = vrot.slane %v1508_v41, 1  ;;  %v6217_v59 = vpack.c.b16 %v806_v54, %v806_v54  ;;  %v1810_v11 = vshrl.u32 %v5867_v50, 16 }
  0x29   : > { %9089 = vst [vmem:[#allocation9_spill] sm:$0xff] %v6205_v51  ;;  %v6215_v56 = vrot.slane %v495_v48, 1  ;;  %v1814_v14 = vrot.slane %v1812_v57, 1  ;;  %v6235_v24 = vpack.c.b16 %v422_v5, %v422_v5  ;;  %v1518_v25 = vshll.u32 %v5846_v6, 16 }
  0x2a   : > { %1701 = vrot.lane.b32.xlu1 %v6136_v49, %s6030_s24  ;;  %v1511_v58 = vor.u32 %v1510_v53, %v1506_v52  ;;  %9090 = vst [vmem:[#allocation10_spill] sm:$0xff] %v6217_v59  ;;  %v879_v9 = vshll.u32 %v6217_v59, 16  ;;  %v8977_v30 = vshrl.u32 %v6217_v59, 16  ;;  %v1516_v34 = vshrl.u32 %v5846_v6, 16  ;;  %v262_v53 = vld [vmem:[%s6077_s23 + $0x44] sm:$0x1] }
  0x2b   : > { %v1520_v35 = vrot.slane %v1518_v25, 1  ;;  %v807_v40 = vunpack.c.l.b16 %v5136_v29  ;;  %v5986_v41 = vor.u32 %v5985_v15, %v5984_v23  ;;  %v8982_v54 = vunpack.c.l.b16 %v6249_v42  ;;  %v5868_v15 = vld [vmem:[%s6077_s23 + $0x48] sm:$0xf0]  ;;  %v5869_v23 = vld [vmem:[%s6077_s23 + $0x48] sm:$0xe] }
  0x2c   : > { %v1512_v8 = vsel %vm450_vm0, %v1511_v58, %v6215_v56  ;;  %v6237_v27 = vrot.slane %v879_v9, 1  ;;  %v1448_v57 = vunpack.c.l.b16 %v1400_v43  ;;  %v1523_v58 = vshrl.u32 %v6235_v24, 16  ;;  %v5137_v25 = vld [vmem:[%s6077_s23 + $0x50] sm:$0x1] }
  0x2d   : > { %1943 = vrot.lane.b32.xlu0 %v6165_v10, %s6032_s26  ;;  %v1521_v48 = vor.u32 %v1520_v35, %v1516_v34  ;;  %v6259_v50 = vpack.c.b16 %v807_v40, %v807_v40  ;;  %v1822_v52 = vshll.u32 %v5986_v41, 16  ;;  %v423_v61 = vunpack.c.l.b16 %v262_v53  ;;  %v5606_v34 = vld [vmem:[%s8971_s1 + $0x78] sm:$0xff] }
  0x2e   : > { %1945 = vrot.lane.b32.xlu2 %v8980_v7, %s6032_s26  ;;  %v1464_v6 = vpack.c.b16 %v8982_v54, %v1448_v57  ;;  %v808_v43 = vunpack.c.l.b16 %v5137_v25  ;;  %2420 = vmatpush.bf16.msra.mxu1 %v5606_v34  ;;  %v5604_v34 = vld [vmem:[%s8971_s1 + $0x68] sm:$0xff] }
  0x2f   : > { %9093 = vst [vmem:[#allocation13_spill] sm:$0xff] %v6259_v50  ;;  %v891_v63 = vshll.u32 %v6259_v50, 16  ;;  %v1824_v5 = vrot.slane %v1822_v52, 1  ;;  %v5600_v7 = vld [vmem:[%s8971_s1 + $0x48] sm:$0xff] }
  0x30   : > { %v1526_v40 = vshrl.u32 %v1464_v6, 16 }
  0x31   : > { %v6275_v9 = vrot.slane %v891_v63, 1  ;;  %v5848_v63 = vld [vmem:[%s6077_s23 + $0x48] sm:$0xe] }
  0x32   : > { %759 = vrot.lane.b32.xlu1 %v6151_v62, %s6030_s24 }
  0x35   : > { %1643 = vrot.lane.b32.xlu0 %v1502_v31, %s6031_s25  ;;  %v507_v31 = vshll.u32 %v6235_v24, 16 }
  0x36   : > { %1645 = vrot.lane.b32.xlu2 %v1503_v28, %s6031_s25  ;;  %v1815_v28 = vor.u32 %v1814_v14, %v1810_v11  ;;  %v1528_v14 = vshll.u32 %v1464_v6, 16 }
  0x37   : > { %v6257_v44 = vrot.slane %v507_v31, 1  ;;  %v5870_v31 = vor.u32 %v5869_v23, %v5868_v15 }
  0x38   : > { %v6246_v37 = vsel %vm450_vm0, %v1815_v28, %v6237_v27  ;;  %v8976_v28 = vshrl.u32 %v6259_v50, 16 }
  0x39   : > { %9092 = vst [vmem:[#allocation12_spill] sm:$0xff] %v6246_v37  ;;  %v1522_v60 = vsel %vm450_vm0, %v1521_v48, %v6257_v44  ;;  %v6297_v48 = vld [vmem:[%s6077_s23 + $0x48] sm:$0xff]   ;;  %v1832_v53 = vshll.u32 %v5870_v31, 16  ;;  %v1830_v23 = vshrl.u32 %v5870_v31, 16 }
  0x3a   : > { %1703 = vrot.lane.b32.xlu1 %v6178_v21, %s6030_s24  ;;  %v6444_v21 = vld [vmem:[%s6077_s23 + $0x70] sm:$0xf] }
  0x3b   : > { %v1834_v25 = vrot.slane %v1832_v53, 1  ;;  %v5138_v53 = vld [vmem:[%s6077_s23 + $0x5c] sm:$0x1] }
  0x3d   : > { %1947 = vrot.lane.b32.xlu0 %v6205_v51, %s6032_s26  ;;  %v1835_v31 = vor.u32 %v1834_v25, %v1830_v23  ;;  %v6342_v25 = vld [vmem:[%s6077_s23 + $0x58] sm:$0xf]  ;;  %v1404_v51 = vld [vmem:[%s6077_s23 + $0x6c] sm:$0xe] }
  0x3e   : > { %1949 = vrot.lane.b32.xlu2 %v8979_v45, %s6032_s26  ;;  %v1452_v10 = vunpack.c.l.b16 %v1404_v51  ;;  %v227_v51 = vld [vmem:[%s6077_s23 + $0xc] sm:$0xf] }
  0x42   : > { %761 = vrot.lane.b32.xlu1 %v6213_v55, %s6030_s24 }
  0x45   : > { %1647 = vrot.lane.b32.xlu0 %v1512_v8, %s6031_s25  ;;  %v6273_v8 = vpack.c.b16 %v423_v61, %v423_v61  ;;  %v5847_v61 = vld [vmem:[%s6077_s23 + $0x48] sm:$0xf0] }
  0x46   : > { %1649 = vrot.lane.b32.xlu2 %v1513_v4, %s6031_s25  ;;  %v1820_v4 = vshrl.u32 %v5986_v41, 16  ;;  %v1530_v41 = vrot.slane %v1528_v14, 1 }
  0x47   : > { %v519_v29 = vshll.u32 %v6273_v8, 16 }
  0x48   : > { %v1825_v11 = vor.u32 %v1824_v5, %v1820_v4  ;;  %v1531_v57 = vor.u32 %v1530_v41, %v1526_v40  ;;  %v5605_v4 = vld [vmem:[%s8971_s1 + $0x70] sm:$0xff]  ;;  %v1533_v5 = vshrl.u32 %v6273_v8, 16  ;;  %v5987_v41 = vld [vmem:[%s6077_s23 + $0x54] sm:$0xf0] }
  0x49   : > { %v6299_v52 = vrot.slane %v519_v29, 1  ;;  %2421 = vmatpush.bf16.msra.mxu1 %v5605_v4  ;;  %v5988_v29 = vld [vmem:[%s6077_s23 + $0x54] sm:$0xe] }
  0x4a   : > { %1705 = vrot.lane.b32.xlu1 %v6217_v59, %s6030_s24  ;;  %v6289_v35 = vsel %vm450_vm0, %v1825_v11, %v6275_v9  ;;  %v5849_v11 = vor.u32 %v5848_v63, %v5847_v61  ;;  %v6322_v40 = vld [vmem:[%s6077_s23 + $0x54] sm:$0xff]   ;;  %v5603_v61 = vld [vmem:[%s8971_s1 + $0x60] sm:$0xff]  ;;  %v5989_v23 = vor.u32 %v5988_v29, %v5987_v41  ;;  %v264_v41 = vld [vmem:[%s6077_s23 + $0x5c] sm:$0x1] }
  0x4b   : > { %9094 = vst [vmem:[#allocation14_spill] sm:$0xff] %v6289_v35  ;;  %v1532_v14 = vsel %vm450_vm0, %v1531_v57, %v6299_v52 }
  0x4c   : > { %9096 = vst [vmem:[#allocation16_spill] sm:$0xff] %v6322_v40  ;;  %v1538_v57 = vshll.u32 %v5849_v11, 16  ;;  %v1842_v29 = vshll.u32 %v5989_v23, 16 }
  0x4d   : > { %1951 = vrot.lane.b32.xlu0 %v6246_v37, %s6032_s26  ;;  %2422 = vmatpush.bf16.msra.mxu1 %v5604_v34  ;;  %v1402_v34 = vld [vmem:[%s6077_s23 + $0x54] sm:$0xe] }
  0x4e   : > { %1953 = vrot.lane.b32.xlu2 %v8977_v30, %s6032_s26 }
  0x51   : > { %2423 = vmatpush.bf16.msra.mxu1 %v5603_v61  ;;  %v1450_v61 = vunpack.c.l.b16 %v1402_v34  ;;  %v1844_v34 = vrot.slane %v1842_v29, 1  ;;  %v5872_v29 = vld [vmem:[%s6077_s23 + $0x60] sm:$0xe] }
  0x52   : > { %763 = vrot.lane.b32.xlu1 %v6232_v18, %s6030_s24 }
  0x55   : > { %1651 = vrot.lane.b32.xlu0 %v1522_v60, %s6031_s25  ;;  %v263_v60 = vld [vmem:[%s6077_s23 + $0x50] sm:$0x1] }
  0x56   : > { %1653 = vrot.lane.b32.xlu2 %v1523_v58, %s6031_s25  ;;  %v6301_v58 = vpack.c.b16 %v808_v43, %v808_v43  ;;  %v424_v6 = vunpack.c.l.b16 %v263_v60 }
  0x58   : > { %9095 = vst [vmem:[#allocation15_spill] sm:$0xff] %v6301_v58  ;;  %v903_v15 = vshll.u32 %v6301_v58, 16  ;;  %v6325_v43 = vpack.c.b16 %v424_v6, %v424_v6  ;;  %v8978_v63 = vshrl.u32 %v6301_v58, 16  ;;  %v1540_v6 = vrot.slane %v1538_v57, 1 }
  0x5a   : > { %1707 = vrot.lane.b32.xlu1 %v6259_v50, %s6030_s24  ;;  %v6327_v60 = vrot.slane %v903_v15, 1  ;;  %v531_v4 = vshll.u32 %v6325_v43, 16  ;;  %v809_v15 = vunpack.c.l.b16 %v5138_v53  ;;  %v8983_v53 = vunpack.c.l.b16 %v6342_v25  ;;  %v5990_v50 = vld [vmem:[%s6077_s23 + $0x6c] sm:$0xf0] }
  0x5c   : > { %v1466_v45 = vpack.c.b16 %v8983_v53, %v1450_v61  ;;  %v5599_v53 = vld [vmem:[%s8971_s1 + $0x40] sm:$0xff] }
  0x5d   : > { %1955 = vrot.lane.b32.xlu0 %v6289_v35, %s6032_s26 }
  0x5e   : > { %1957 = vrot.lane.b32.xlu2 %v8976_v28, %s6032_s26  ;;  %v5602_v28 = vld [vmem:[%s8971_s1 + $0x58] sm:$0xff]  ;;  %v1548_v54 = vshll.u32 %v1466_v45, 16 }
  0x5f   : > { %2424 = vmatpush.bf16.msra.mxu1 %v5602_v28  ;;  %v1840_v28 = vshrl.u32 %v5989_v23, 16  ;;  %v5871_v23 = vld [vmem:[%s6077_s23 + $0x60] sm:$0xf0] }
  0x62   : > { %765 = vrot.lane.b32.xlu1 %v6297_v48, %s6030_s24 }
  0x65   : > { %1655 = vrot.lane.b32.xlu0 %v1532_v14, %s6031_s25  ;;  %v6339_v14 = vsel %vm450_vm0, %v1835_v31, %v6327_v60  ;;  %v6355_v31 = vpack.c.b16 %v809_v15, %v809_v15 }
  0x66   : > { %1657 = vrot.lane.b32.xlu2 %v1533_v5, %s6031_s25  ;;  %v1536_v5 = vshrl.u32 %v5849_v11, 16  ;;  %9097 = vst [vmem:[#allocation17_spill] sm:$0xff] %v6339_v14  ;;  %v6353_v11 = vrot.slane %v531_v4, 1  ;;  %v1543_v4 = vshrl.u32 %v6325_v43, 16 }
  0x67   : > { %9099 = vst [vmem:[#allocation19_spill] sm:$0xff] %v6355_v31  ;;  %v915_v15 = vshll.u32 %v6355_v31, 16 }
  0x68   : > { %9098 = vst [vmem:[#allocation18_spill] sm:$0xff] %v6353_v11  ;;  %v1541_v57 = vor.u32 %v1540_v6, %v1536_v5  ;;  %v425_v6 = vunpack.c.l.b16 %v264_v41  ;;  %v1845_v41 = vor.u32 %v1844_v34, %v1840_v28  ;;  %v1550_v28 = vrot.slane %v1548_v54, 1  ;;  %v5851_v54 = vld [vmem:[%s6077_s23 + $0x60] sm:$0xe] }
  0x6a   : > { %1709 = vrot.lane.b32.xlu1 %v6301_v58, %s6030_s24  ;;  %v1542_v5 = vsel %vm450_vm0, %v1541_v57, %v6353_v11  ;;  %v6377_v32 = vpack.c.b16 %v425_v6, %v425_v6  ;;  %v6379_v57 = vrot.slane %v915_v15, 1  ;;  %v5873_v6 = vor.u32 %v5872_v29, %v5871_v23  ;;  %v5875_v11 = vld [vmem:[%s6077_s23 + $0x78] sm:$0xe] }
  0x6b   : > { %v1546_v15 = vshrl.u32 %v1466_v45, 16  ;;  %v5850_v45 = vld [vmem:[%s6077_s23 + $0x60] sm:$0xf0] }
  0x6c   : > { %9100 = vst [vmem:[#allocation20_spill] sm:$0xff] %v6379_v57  ;;  %v1852_v58 = vshll.u32 %v5873_v6, 16 }
  0x6d   : > { %1959 = vrot.lane.b32.xlu0 %v6339_v14, %s6032_s26  ;;  %v1551_v23 = vor.u32 %v1550_v28, %v1546_v15  ;;  %v1850_v28 = vshrl.u32 %v5873_v6, 16  ;;  %v5991_v14 = vld [vmem:[%s6077_s23 + $0x6c] sm:$0xe]  ;;  %v5140_v6 = vld [vmem:[%s6077_s23 + $0x74] sm:$0x1] }
  0x6e   : > { %1961 = vrot.lane.b32.xlu2 %v8978_v63, %s6032_s26  ;;  %v5601_v63 = vld [vmem:[%s8971_s1 + $0x50] sm:$0xff] }
  0x6f   : > { %2425 = vmatpush.bf16.msra.mxu1 %v5601_v63  ;;  %v5139_v63 = vld [vmem:[%s6077_s23 + $0x68] sm:$0x1] }
  0x70   : > { %v6359_v30 = vpop.permute.xlu2 %1699  ;;  %v810_v34 = vunpack.c.l.b16 %v5139_v63  ;;  %v1553_v63 = vshrl.u32 %v6377_v32, 16 }
  0x72   : > { %767 = vrot.lane.b32.xlu1 %v6322_v40, %s6030_s24  ;;  %v6405_v29 = vpack.c.b16 %v810_v34, %v810_v34  ;;  %v1854_v34 = vrot.slane %v1852_v58, 1 }
  0x73   : > { %2426 = vmatpush.bf16.msra.mxu1 %v5600_v7  ;;  %v6395_v7 = vsel %vm450_vm0, %v1845_v41, %v6379_v57  ;;  %v265_v41 = vld [vmem:[%s6077_s23 + $0x68] sm:$0x1] }
  0x74   : > { %9101 = vst [vmem:[#allocation21_spill] sm:$0xff] %v6395_v7  ;;  %v927_v15 = vshll.u32 %v6405_v29, 16  ;;  %v9109_v49 = vshrl.u32 %v6405_v29, 16 }
  0x75   : > { %1659 = vrot.lane.b32.xlu0 %v1542_v5, %s6031_s25  ;;  %v543_v5 = vshll.u32 %v6377_v32, 16  ;;  %9103 = vst [vmem:[#allocation23_spill] sm:$0xff] %v6405_v29 }
  0x76   : > { %1661 = vrot.lane.b32.xlu2 %v1543_v4, %s6031_s25  ;;  %v8988_v4 = vshrl.u32 %v6355_v31, 16 }
  0x77   : > { %2427 = vmatpush.bf16.msra.mxu1 %v5599_v53  ;;  %v6403_v19 = vrot.slane %v543_v5, 1  ;;  %v5852_v5 = vor.u32 %v5851_v54, %v5850_v45  ;;  %v6428_v54 = vrot.slane %v927_v15, 1  ;;  %v811_v15 = vunpack.c.l.b16 %v5140_v6 }
  0x78   : > { %v6383_v61 = vpop.permute.xlu2 %1941 }
  0x79   : > { %9102 = vst [vmem:[#allocation22_spill] sm:$0xff] %v6403_v19  ;;  %v1558_v45 = vshll.u32 %v5852_v5, 16 }
  0x7a   : > { %1711 = vrot.lane.b32.xlu1 %v6355_v31, %s6030_s24  ;;  %v1552_v31 = vsel %vm450_vm0, %v1551_v23, %v6403_v19  ;;  %9106 = vst [vmem:[#allocation26_spill] sm:$0xff] %v6428_v54  ;;  %v1855_v23 = vor.u32 %v1854_v34, %v1850_v28  ;;  %v5992_v34 = vor.u32 %v5991_v14, %v5990_v50 }
  0x7b   : > { %v1560_v59 = vrot.slane %v1558_v45, 1  ;;  %v6459_v45 = vpack.c.b16 %v811_v15, %v811_v15 }
  0x7c   : > { %v6441_v28 = vsel %vm450_vm0, %v1855_v23, %v6428_v54  ;;  %v1862_v23 = vshll.u32 %v5992_v34, 16 }
  0x7d   : > { %1963 = vrot.lane.b32.xlu0 %v6395_v7, %s6032_s26  ;;  %9108 = vst [vmem:[#allocation28_spill] sm:$0xff] %v6441_v28 }
  0x7e   : > { %1965 = vrot.lane.b32.xlu2 %v8988_v4, %s6032_s26  ;;  %v426_v4 = vunpack.c.l.b16 %v265_v41  ;;  %9111 = vst [vmem:[#allocation30_spill] sm:$0xff] %v6459_v45  ;;  %v1864_v15 = vrot.slane %v1862_v23, 1 }
  0x80   : > { %v6410_v53 = vpop.permute.xlu2 %1641  ;;  %v6426_v41 = vpack.c.b16 %v426_v4, %v426_v4 }
  0x82   : > { %769 = vrot.lane.b32.xlu1 %v5833_v26, %s6030_s24  ;;  %v6423_v26 = vld [vmem:[%s6077_s23 + $0x6c] sm:$0xff]   ;;  %v555_v4 = vshll.u32 %v6426_v41, 16 }
  0x83   : > { %9105 = vst [vmem:[#allocation25_spill] sm:$0xff] %v6423_v26 }
  0x84   : > { %v6417_v7 = vpop.permute.xlu1 %757  ;;  %v6431_v58 = vpop.permute.xlu0 %755  ;;  %v6457_v50 = vrot.slane %v555_v4, 1 }
  0x85   : > { %9104 = vst [vmem:[#allocation24_spill] sm:$0xff] %v6417_v7  ;;  %1663 = vrot.lane.b32.xlu0 %v1552_v31, %s6031_s25 }
  0x86   : > { %1665 = vrot.lane.b32.xlu2 %v1553_v63, %s6031_s25  ;;  %9107 = vst [vmem:[#allocation27_spill] sm:$0xff] %v6431_v58  ;;  %v1556_v63 = vshrl.u32 %v5852_v5, 16  ;;  %v6455_v5 = vld [vmem:[%s6077_s23] sm:$0xff]  }
  0x87   : > { %9110 = vst [vmem:[#allocation29_spill] sm:$0xff] %v6457_v50 }
  0x88   : > { %v6433_v35 = vpop.permute.xlu2 %1945  ;;  %v1561_v14 = vor.u32 %v1560_v59, %v1556_v63  ;;  %v1563_v59 = vshrl.u32 %v6426_v41, 16 }
  0x8a   : > { %1713 = vrot.lane.b32.xlu1 %v6405_v29, %s6030_s24  ;;  %v266_v29 = vld [vmem:[%s6077_s23 + $0x74] sm:$0x1]  ;;  %v1562_v4 = vsel %vm450_vm0, %v1561_v14, %v6457_v50  ;;  %v356_v50 = vunpack.c.l.b16 %v227_v51 }
  0x8b   : > { %v427_v6 = vunpack.c.l.b16 %v266_v29 }
  0x8c   : > { %v1638_v37 = vpop.permute.xlu1 %1637 }
  0x8d   : > { %v2006_v31 = vsel %vm1059_vm1, %v6100_v16, %v1638_v37  ;;  %1967 = vrot.lane.b32.xlu0 %v6441_v28, %s6032_s26 }
  0x8e   : > { %1969 = vrot.lane.b32.xlu2 %v9109_v49, %s6032_s26  ;;  %v2069_v16 = vsel %vm1092_vm2, %v2006_v31, %v6359_v30  ;;  %v939_v30 = vshll.u32 %v6459_v45, 16  ;;  %v1860_v31 = vshrl.u32 %v5992_v34, 16  ;;  %v5141_v34 = vld [vmem:[%s6077_s23 + $0x80] sm:$0x1] }
  0x8f   : > { %v1636_v49 = vpop.permute.xlu0 %1635  ;;  %v2118_v63 = vsel %vm1125_vm3, %v2069_v16, %v6383_v61  ;;  %v6488_v16 = vpack.c.b16 %v427_v6, %v427_v6 }
  0x90   : > { %v6464_v37 = vpop.permute.xlu2 %1645  ;;  %v2004_v28 = vsel %vm1059_vm1, %v6455_v5, %v1636_v49  ;;  %v9112_v49 = vunpack.c.l.b16 %v6444_v21  ;;  %v2185_v61 = vshll.u32 %v2118_v63, 16  ;;  %v6486_v23 = vrot.slane %v939_v30, 1 }
  0x91   : > { %v2067_v54 = vsel %vm1092_vm2, %v2004_v28, %v6431_v58  ;;  %v1865_v29 = vor.u32 %v1864_v15, %v1860_v31  ;;  %v9018_v30 = vshrl.u32 %v6459_v45, 16  ;;  %v5142_v58 = vld [vmem:[%s6077_s23 + $0x8c] sm:$0x1] }
  0x92   : > { %771 = vrot.lane.b32.xlu1 %v6423_v26, %s6030_s24  ;;  %v1468_v13 = vpack.c.b16 %v9112_v49, %v1452_v10  ;;  %9113 = vst [vmem:[#allocation31_spill] sm:$0xff] %v6486_v23  ;;  %v5874_v49 = vld [vmem:[%s6077_s23 + $0x78] sm:$0xf0]  ;;  %v2187_v6 = vrot.slane %v2185_v61, 1 }
  0x93   : > { %v5876_v31 = vor.u32 %v5875_v11, %v5874_v49  ;;  %v5834_v49 = vld [vmem:[%s6077_s23 + $0x78] sm:$0xff]  }
  0x94   : > { %v1940_v47 = vpop.permute.xlu1 %1939  ;;  %v1568_v10 = vshll.u32 %v1468_v13, 16 }
  0x95   : > { %v2116_v14 = vsel %vm1125_vm3, %v2067_v54, %v1940_v47  ;;  %1667 = vrot.lane.b32.xlu0 %v1562_v4, %s6031_s25  ;;  %v9114_v54 = vunpack.c.l.b16 %v6095_v12  ;;  %v812_v4 = vunpack.c.l.b16 %v5141_v34  ;;  %v567_v12 = vshll.u32 %v6488_v16, 16  ;;  %v5853_v34 = vld [vmem:[%s6077_s23 + $0x78] sm:$0xf0] }
  0x96   : > { %v2181_v19 = vshll.u32 %v2116_v14, 16  ;;  %1669 = vrot.lane.b32.xlu2 %v1563_v59, %s6031_s25  ;;  %v2179_v57 = vshrl.u32 %v2116_v14, 16  ;;  %v1570_v63 = vrot.slane %v1568_v10, 1  ;;  %v2010_v14 = vsel %vm1059_vm1, %v6108_v22, %v6410_v53  ;;  %v5854_v10 = vld [vmem:[%s6077_s23 + $0x78] sm:$0xe] }
  0x97   : > { %v1640_v47 = vpop.permute.xlu0 %1639  ;;  %v6496_v59 = vpack.c.b16 %v9114_v54, %v356_v50  ;;  %v1566_v50 = vshrl.u32 %v1468_v13, 16  ;;  %v6512_v61 = vpack.c.b16 %v812_v4, %v812_v4  ;;  %v1872_v13 = vshll.u32 %v5876_v31, 16 }
  0x98   : > { %v2183_v28 = vrot.slane %v2181_v19, 1  ;;  %v6492_v26 = vpop.permute.xlu2 %1949  ;;  %v6503_v19 = vsel %vm450_vm0, %v1865_v29, %v6486_v23  ;;  %v267_v29 = vld [vmem:[%s6077_s23 + $0x80] sm:$0x1] }
  0x99   : > { %9115 = vst [vmem:[#allocation32_spill] sm:$0xff] %v6503_v19  ;;  %v2008_v11 = vsel %vm1059_vm1, %v6496_v59, %v1640_v47  ;;  %v1571_v22 = vor.u32 %v1570_v63, %v1566_v50  ;;  %v1573_v50 = vshrl.u32 %v6488_v16, 16  ;;  %v1870_v63 = vshrl.u32 %v5876_v31, 16 }
  0x9a   : > { %v2184_v51 = vor.u32 %v2183_v28, %v2179_v57  ;;  %1715 = vrot.lane.b32.xlu1 %v6459_v45, %s6030_s24  ;;  %9116 = vst [vmem:[#allocation33_spill] sm:$0xff] %v6512_v61  ;;  %v6523_v28 = vrot.slane %v567_v12, 1  ;;  %v2070_v54 = vsel %vm1092_vm2, %v2008_v11, %v6417_v7 }
  0x9c   : > { %v1702_v15 = vpop.permute.xlu1 %1701  ;;  %v2188_v57 = vsel %vm450_vm0, %v2184_v51, %v2187_v6  ;;  %9117 = vst [vmem:[#allocation34_spill] sm:$0xff] %v6523_v28  ;;  %v951_v6 = vshll.u32 %v6512_v61, 16  ;;  %v1572_v11 = vsel %vm450_vm0, %v1571_v22, %v6523_v28 }
  0x9d   : > { %2428 = vmatmul.bf16.vlgmr.msra.gmra.mxu1 %v2188_v57  ;;  %1971 = vrot.lane.b32.xlu0 %v6503_v19, %s6032_s26  ;;  %v2072_v53 = vsel %vm1092_vm2, %v2010_v14, %v1702_v15  ;;  %v428_v57 = vunpack.c.l.b16 %v267_v29  ;;  %v1874_v15 = vrot.slane %v1872_v13, 1  ;;  %v6542_v29 = vld [vmem:[%s6077_s23 + $0x84] sm:$0xff]  }
  0x9e   : > { %1973 = vrot.lane.b32.xlu2 %v9018_v30, %s6032_s26  ;;  %v5855_v30 = vor.u32 %v5854_v10, %v5853_v34  ;;  %v2122_v14 = vsel %vm1125_vm3, %v2072_v53, %v6433_v35  ;;  %v5993_v34 = vld [vmem:[%s6077_s23 + $0x84] sm:$0xf0]  ;;  %v5994_v10 = vld [vmem:[%s6077_s23 + $0x84] sm:$0xe]  ;;  %v454_v53 = vshll.u32 %v6455_v5, 16 }
  0x9f   : > { %v1944_v4 = vpop.permute.xlu0 %1943  ;;  %v6548_v31 = vpack.c.b16 %v428_v57, %v428_v57  ;;  %v2195_v19 = vshll.u32 %v2122_v14, 16  ;;  %v1875_v22 = vor.u32 %v1874_v15, %v1870_v63  ;;  %v452_v63 = vshrl.u32 %v6455_v5, 16 }
  0xa0   : > { %v6526_v47 = vpop.permute.xlu2 %1649  ;;  %v2120_v51 = vsel %vm1125_vm3, %v2070_v54, %v1944_v4  ;;  %v838_v54 = vshll.u32 %v6084_v2, 16  ;;  %v1578_v13 = vshll.u32 %v5855_v30, 16  ;;  %v1576_v40 = vshrl.u32 %v5855_v30, 16 }
  0xa1   : > { %v2191_v12 = vshll.u32 %v2120_v51, 16  ;;  %v2189_v35 = vshrl.u32 %v2120_v51, 16  ;;  %v579_v57 = vshll.u32 %v6548_v31, 16  ;;  %v2197_v51 = vrot.slane %v2195_v19, 1 }
  0xa2   : > { %773 = vrot.lane.b32.xlu1 %v5834_v49, %s6030_s24  ;;  %v6546_v49 = vrot.slane %v951_v6, 1  ;;  %v840_v28 = vrot.slane %v838_v54, 1  ;;  %v1580_v14 = vrot.slane %v1578_v13, 1  ;;  %v456_v15 = vrot.slane %v454_v53, 1 }
  0xa3   : > { %v2193_v4 = vrot.slane %v2191_v12, 1  ;;  %v836_v12 = vshrl.u32 %v6084_v2, 16  ;;  %v2014_v13 = vsel %vm1059_vm1, %v6154_v1, %v6464_v37  ;;  %v6572_v53 = vrot.slane %v579_v57, 1  ;;  %v6586_v37 = vld [vmem:[%s6077_s23 + $0x88] sm:$0xf] }
  0xa4   : > { %v6539_v45 = vpop.permute.xlu1 %759 }
  0xa5   : > { %1671 = vrot.lane.b32.xlu0 %v1572_v11, %s6031_s25  ;;  %v2194_v7 = vor.u32 %v2193_v4, %v2189_v35  ;;  %v6564_v11 = vsel %vm450_vm0, %v1875_v22, %v6546_v49  ;;  %v841_v54 = vor.u32 %v840_v28, %v836_v12  ;;  %v813_v4 = vunpack.c.l.b16 %v5142_v58  ;;  %v1406_v28 = vld [vmem:[%s6077_s23 + $0x84] sm:$0xe] }
  0xa6   : > { %1673 = vrot.lane.b32.xlu2 %v1573_v50, %s6031_s25  ;;  %v9028_v50 = vshrl.u32 %v6512_v61, 16  ;;  %9118 = vst [vmem:[#allocation35_spill] sm:$0xff] %v6564_v11  ;;  %v5995_v35 = vor.u32 %v5994_v10, %v5993_v34  ;;  %v1581_v22 = vor.u32 %v1580_v14, %v1576_v40 }
  0xa7   : > { %v1644_v6 = vpop.permute.xlu0 %1643  ;;  %v2198_v19 = vsel %vm450_vm0, %v2194_v7, %v2197_v51  ;;  %v457_v7 = vor.u32 %v456_v15, %v452_v63  ;;  %v6581_v58 = vsel %vm450_vm0, %v841_v54, %v6121_v36  ;;  %v6583_v1 = vpack.c.b16 %v813_v4, %v813_v4  ;;  %v231_v51 = vld [vmem:[%s6077_s23 + $0x24] sm:$0xf] }
  0xa8   : > { %v6554_v23 = vpop.permute.xlu2 %1953  ;;  %v2012_v5 = vsel %vm1059_vm1, %v6080_v0, %v1644_v6  ;;  %9119 = vst [vmem:[#allocation36_spill] sm:$0xff] %v6581_v58  ;;  %v1882_v0 = vshll.u32 %v5995_v35, 16  ;;  %v1582_v36 = vsel %vm450_vm0, %v1581_v22, %v6572_v53  ;;  %v9029_v63 = vunpack.c.l.b16 %v6586_v37 }
  0xa9   : > { %9120 = vst [vmem:[#allocation37_spill] sm:$0xff] %v6583_v1  ;;  %v2073_v10 = vsel %vm1092_vm2, %v2012_v5, %v6539_v45  ;;  %v462_v14 = vsel %vm450_vm0, %v457_v7, %v6116_v33  ;;  %v1454_v15 = vunpack.c.l.b16 %v1406_v28  ;;  %v963_v4 = vshll.u32 %v6583_v1, 16 }
  0xaa   : > { %1717 = vrot.lane.b32.xlu1 %v6512_v61, %s6030_s24  ;;  %v466_v33 = vshll.u32 %v6496_v59, 16 }
  0xac   : > { %v1704_v30 = vpop.permute.xlu1 %1703 }
  0xad   : > { %2433 = vmatmul.bf16.gmra.mxu1 %v2198_v19  ;;  %1975 = vrot.lane.b32.xlu0 %v6564_v11, %s6032_s26  ;;  %v2075_v40 = vsel %vm1092_vm2, %v2014_v13, %v1704_v30  ;;  %v1880_v30 = vshrl.u32 %v5995_v35, 16  ;;  %v1884_v19 = vrot.slane %v1882_v0, 1  ;;  %v268_v13 = vld [vmem:[%s6077_s23 + $0x8c] sm:$0x1]  ;;  %v1470_v35 = vpack.c.b16 %v9029_v63, %v1454_v15 }
  0xae   : > { %1977 = vrot.lane.b32.xlu2 %v9028_v50, %s6032_s26  ;;  %v2126_v54 = vsel %vm1125_vm3, %v2075_v40, %v6492_v26  ;;  %v429_v26 = vunpack.c.l.b16 %v268_v13  ;;  %v6615_v0 = vrot.slane %v963_v4, 1 }
  0xaf   : > { %v1948_v12 = vpop.permute.xlu0 %1947  ;;  %v2205_v7 = vshll.u32 %v2126_v54, 16  ;;  %v1885_v28 = vor.u32 %v1884_v19, %v1880_v30  ;;  %v1588_v4 = vshll.u32 %v1470_v35, 16 }
  0xb0   : > { %v6590_v34 = vpop.permute.xlu2 %1653  ;;  %v2124_v6 = vsel %vm1125_vm3, %v2073_v10, %v1948_v12  ;;  %v360_v10 = vunpack.c.l.b16 %v231_v51  ;;  %v1583_v12 = vshrl.u32 %v6548_v31, 16  ;;  %v6625_v15 = vpack.c.b16 %v429_v26, %v429_v26 }
  0xb1   : > { %v2201_v57 = vshll.u32 %v2124_v6, 16  ;;  %v2199_v50 = vshrl.u32 %v2124_v6, 16  ;;  %v9122_v6 = vunpack.c.l.b16 %v6168_v17  ;;  %v2207_v13 = vrot.slane %v2205_v7, 1  ;;  %v5877_v17 = vld [vmem:[%s6077_s23 + $0x90] sm:$0xf0] }
  0xb2   : > { %1027 = vrot.lane.b32.xlu1 %v6581_v58, %s6032_s26  ;;  %v6629_v30 = vsel %vm450_vm0, %v1885_v28, %v6615_v0  ;;  %v591_v28 = vshll.u32 %v6625_v15, 16 }
  0xb3   : > { %v2203_v5 = vrot.slane %v2201_v57, 1  ;;  %v6621_v54 = vpack.c.b16 %v9122_v6, %v360_v10  ;;  %9123 = vst [vmem:[#allocation39_spill] sm:$0xff] %v6629_v30  ;;  %v5878_v10 = vld [vmem:[%s6077_s23 + $0x90] sm:$0xe]  ;;  %v1590_v6 = vrot.slane %v1588_v4, 1 }
  0xb4   : > { %v6607_v22 = vpop.permute.xlu1 %761  ;;  %v6658_v4 = vrot.slane %v591_v28, 1 }
  0xb5   : > { %9121 = vst [vmem:[#allocation38_spill] sm:$0xff] %v6607_v22  ;;  %643 = vrot.lane.b32.xlu0 %v462_v14, %s6031_s25  ;;  %v2204_v40 = vor.u32 %v2203_v5, %v2199_v50  ;;  %v468_v14 = vrot.slane %v466_v33, 1  ;;  %v5143_v5 = vld [vmem:[%s6077_s23 + $0x98] sm:$0x1]  ;;  %v2018_v33 = vsel %vm1059_vm1, %v6192_v38, %v6526_v47  ;;  %v5879_v47 = vor.u32 %v5878_v10, %v5877_v17 }
  0xb6   : > { %1675 = vrot.lane.b32.xlu2 %v1582_v36, %s6031_s25  ;;  %v464_v36 = vshrl.u32 %v6496_v59, 16  ;;  %v814_v38 = vunpack.c.l.b16 %v5143_v5 }
  0xb7   : > { %v1648_v51 = vpop.permute.xlu0 %1647  ;;  %v2208_v19 = vsel %vm450_vm0, %v2204_v40, %v2207_v13  ;;  %v1586_v40 = vshrl.u32 %v1470_v35, 16  ;;  %v5947_v13 = vld [vmem:[%s6077_s23 + $0x18] sm:$0xff]   ;;  %v9124_v35 = vshrl.u32 %v6583_v1, 16 }
  0xb8   : > { %v6617_v57 = vpop.permute.xlu2 %1957  ;;  %v469_v7 = vor.u32 %v468_v14, %v464_v36  ;;  %v850_v63 = vshll.u32 %v5947_v13, 16 }
  0xb9   : > { %v1591_v17 = vor.u32 %v1590_v6, %v1586_v40 }
  0xba   : > { %1677 = vrot.lane.b32.xlu1 %v1583_v12, %s6031_s25  ;;  %v2016_v12 = vsel %vm1059_vm1, %v6621_v54, %v1648_v51  ;;  %v474_v26 = vsel %vm450_vm0, %v469_v7, %v6130_v46  ;;  %v852_v10 = vrot.slane %v850_v63, 1  ;;  %v1890_v63 = vshrl.u32 %v5879_v47, 16 }
  0xbb   : > { %v2076_v36 = vsel %vm1092_vm2, %v2016_v12, %v6607_v22  ;;  %v1892_v12 = vshll.u32 %v5879_v47, 16  ;;  %v1592_v28 = vsel %vm450_vm0, %v1591_v17, %v6658_v4 }
  0xbc   : > { %v1706_v50 = vpop.permute.xlu1 %1705 }
  0xbd   : > { %2438 = vmatmul.bf16.gmra.mxu1 %v2208_v19  ;;  %775 = vrot.lane.b32.xlu0 %v6542_v29, %s6030_s24  ;;  %v2078_v51 = vsel %vm1092_vm2, %v2018_v33, %v1706_v50  ;;  %v848_v50 = vshrl.u32 %v5947_v13, 16  ;;  %v6662_v33 = vpack.c.b16 %v814_v38, %v814_v38  ;;  %v1894_v6 = vrot.slane %v1892_v12, 1 }
  0xbe   : > { %1979 = vrot.lane.b32.xlu2 %v6629_v30, %s6032_s26  ;;  %v2130_v5 = vsel %vm1125_vm3, %v2078_v51, %v6554_v23 }
  0xbf   : > { %v1952_v14 = vpop.permute.xlu0 %1951  ;;  %9125 = vst [vmem:[#allocation40_spill] sm:$0xff] %v6662_v33  ;;  %v2215_v46 = vshll.u32 %v2130_v5, 16  ;;  %v853_v40 = vor.u32 %v852_v10, %v848_v50  ;;  %v975_v23 = vshll.u32 %v6662_v33, 16  ;;  %v1895_v47 = vor.u32 %v1894_v6, %v1890_v63  ;;  %v235_v63 = vld [vmem:[%s6077_s23 + $0x3c] sm:$0xf] }
  0xc0   : > { %v6648_v19 = vpop.permute.xlu2 %1657  ;;  %v2128_v30 = vsel %vm1125_vm3, %v2076_v36, %v1952_v14  ;;  %v2022_v5 = vsel %vm1059_vm1, %v6235_v24, %v6590_v34 }
  0xc1   : > { %v2211_v61 = vshll.u32 %v2128_v30, 16  ;;  %v2209_v7 = vshrl.u32 %v2128_v30, 16  ;;  %v2217_v51 = vrot.slane %v2215_v46, 1  ;;  %v6676_v30 = vld [vmem:[%s6077_s23 + $0x90] sm:$0xff]  }
  0xc2   : > { %1981 = vrot.lane.b32.xlu1 %v9124_v35, %s6032_s26  ;;  %v6682_v35 = vrot.slane %v975_v23, 1  ;;  %v5856_v46 = vld [vmem:[%s6077_s23 + $0x90] sm:$0xf0] }
  0xc3   : > { %v2213_v36 = vrot.slane %v2211_v61, 1 }
  0xc4   : > { %v6664_v14 = vpop.permute.xlu1 %763  ;;  %v6697_v12 = vsel %vm450_vm0, %v1895_v47, %v6682_v35 }
  0xc5   : > { %9126 = vst [vmem:[#allocation41_spill] sm:$0xff] %v6664_v14  ;;  %1719 = vrot.lane.b32.xlu0 %v6583_v1, %s6030_s24  ;;  %v2214_v13 = vor.u32 %v2213_v36, %v2209_v7  ;;  %v862_v36 = vshll.u32 %v6151_v62, 16  ;;  %v5857_v7 = vld [vmem:[%s6077_s23 + $0x90] sm:$0xe] }
  0xc6   : > { %645 = vrot.lane.b32.xlu2 %v474_v26, %s6031_s25  ;;  %v6680_v26 = vsel %vm450_vm0, %v853_v40, %v6156_v3  ;;  %v269_v3 = vld [vmem:[%s6077_s23 + $0x98] sm:$0x1]  ;;  %9128 = vst [vmem:[#allocation43_spill] sm:$0xff] %v6697_v12 }
  0xc7   : > { %v1652_v38 = vpop.permute.xlu0 %1651  ;;  %9127 = vst [vmem:[#allocation42_spill] sm:$0xff] %v6680_v26  ;;  %v2218_v50 = vsel %vm450_vm0, %v2214_v13, %v2217_v51  ;;  %v430_v6 = vunpack.c.l.b16 %v269_v3  ;;  %v5858_v51 = vor.u32 %v5857_v7, %v5856_v46  ;;  %v364_v3 = vunpack.c.l.b16 %v235_v63  ;;  %v6724_v46 = vld [vmem:[%s6077_s23 + $0x9c] sm:$0xff]   ;;  %v5144_v63 = vld [vmem:[%s6077_s23 + $0xa4] sm:$0x1] }
  0xc8   : > { %v6672_v61 = vpop.permute.xlu2 %1961  ;;  %v2020_v10 = vsel %vm1059_vm1, %v6213_v55, %v1652_v38  ;;  %v1593_v38 = vshrl.u32 %v6625_v15, 16 }
  0xc9   : > { %v2079_v55 = vsel %vm1092_vm2, %v2020_v10, %v6664_v14  ;;  %v1598_v7 = vshll.u32 %v5858_v51, 16  ;;  %v5145_v14 = vld [vmem:[%s6077_s23 + $0xb0] sm:$0x1] }
  0xca   : > { %1679 = vrot.lane.b32.xlu1 %v1592_v28, %s6031_s25 }
  0xcc   : > { %v1708_v17 = vpop.permute.xlu1 %1707 }
  0xcd   : > { %2443 = vmatmul.bf16.gmra.mxu1 %v2218_v50  ;;  %1029 = vrot.lane.b32.xlu0 %v6680_v26, %s6032_s26  ;;  %v2081_v24 = vsel %vm1092_vm2, %v2022_v5, %v1708_v17  ;;  %v860_v17 = vshrl.u32 %v6151_v62, 16  ;;  %v864_v50 = vrot.slane %v862_v36, 1  ;;  %v486_v36 = vsel %vm450_vm0, %v853_v40, %v6176_v20 }
  0xce   : > { %777 = vrot.lane.b32.xlu2 %v6676_v30, %s6030_s24  ;;  %v2134_v47 = vsel %vm1125_vm3, %v2081_v24, %v6617_v57  ;;  %v5996_v57 = vld [vmem:[%s6077_s23 + $0x9c] sm:$0xf0]  ;;  %v1596_v20 = vshrl.u32 %v5858_v51, 16  ;;  %v1600_v40 = vrot.slane %v1598_v7, 1 }
  0xcf   : > { %v1956_v28 = vpop.permute.xlu0 %1955  ;;  %v2225_v1 = vshll.u32 %v2134_v47, 16  ;;  %v865_v24 = vor.u32 %v864_v50, %v860_v17  ;;  %v815_v17 = vunpack.c.l.b16 %v5144_v63 }
  0xd0   : > { %v6703_v34 = vpop.permute.xlu2 %1661  ;;  %v2132_v23 = vsel %vm1125_vm3, %v2079_v55, %v1956_v28  ;;  %v5997_v55 = vld [vmem:[%s6077_s23 + $0x9c] sm:$0xe]  ;;  %v6718_v28 = vpack.c.b16 %v430_v6, %v430_v6 }
  0xd1   : > { %v2221_v13 = vshll.u32 %v2132_v23, 16  ;;  %v2227_v2 = vrot.slane %v2225_v1, 1  ;;  %v5998_v50 = vor.u32 %v5997_v55, %v5996_v57  ;;  %v2026_v1 = vsel %vm1059_vm1, %v6273_v8, %v6648_v19 }
  0xd2   : > { %1983 = vrot.lane.b32.xlu1 %v6697_v12, %s6032_s26  ;;  %v2219_v12 = vshrl.u32 %v2132_v23, 16  ;;  %v9130_v23 = vunpack.c.l.b16 %v6249_v42  ;;  %v603_v62 = vshll.u32 %v6718_v28, 16  ;;  %v6744_v42 = vld [vmem:[%s6077_s23 + $0xa0] sm:$0xf]  ;;  %v6760_v55 = vpack.c.b16 %v815_v17, %v815_v17 }
  0xd3   : > { %v2223_v5 = vrot.slane %v2221_v13, 1  ;;  %v9045_v57 = vunpack.c.l.b16 %v6744_v42  ;;  %v1902_v19 = vshll.u32 %v5998_v50, 16 }
  0xd4   : > { %v6715_v10 = vpop.permute.xlu1 %765  ;;  %v6734_v47 = vpack.c.b16 %v9130_v23, %v364_v3  ;;  %v6753_v7 = vrot.slane %v603_v62, 1  ;;  %9133 = vst [vmem:[#allocation47_spill] sm:$0xff] %v6760_v55 }
  0xd5   : > { %9129 = vst [vmem:[#allocation44_spill] sm:$0xff] %v6715_v10  ;;  %1681 = vrot.lane.b32.xlu0 %v1593_v38, %s6031_s25  ;;  %v2224_v6 = vor.u32 %v2223_v5, %v2219_v12  ;;  %v9041_v38 = vshrl.u32 %v6662_v33, 16  ;;  %v6741_v12 = vsel %vm450_vm0, %v865_v24, %v6194_v39  ;;  %v1408_v5 = vld [vmem:[%s6077_s23 + $0x9c] sm:$0xe]  ;;  %v1601_v39 = vor.u32 %v1600_v40, %v1596_v20 }
  0xd6   : > { %1721 = vrot.lane.b32.xlu2 %v6662_v33, %s6030_s24  ;;  %9131 = vst [vmem:[#allocation45_spill] sm:$0xff] %v6734_v47  ;;  %v1456_v8 = vunpack.c.l.b16 %v1408_v5  ;;  %v987_v5 = vshll.u32 %v6760_v55, 16 }
  0xd7   : > { %v1656_v11 = vpop.permute.xlu0 %1655  ;;  %9132 = vst [vmem:[#allocation46_spill] sm:$0xff] %v6741_v12  ;;  %v2228_v23 = vsel %vm450_vm0, %v2224_v6, %v2227_v2  ;;  %v270_v2 = vld [vmem:[%s6077_s23 + $0xa4] sm:$0x1]  ;;  %v1603_v6 = vshrl.u32 %v6718_v28, 16  ;;  %v1602_v17 = vsel %vm450_vm0, %v1601_v39, %v6753_v7 }
  0xd8   : > { %v6730_v13 = vpop.permute.xlu2 %1965  ;;  %v2024_v51 = vsel %vm1059_vm1, %v6734_v47, %v1656_v11  ;;  %v431_v20 = vunpack.c.l.b16 %v270_v2 }
  0xda   : > { %647 = vrot.lane.b32.xlu1 %v486_v36, %s6031_s25  ;;  %v2082_v36 = vsel %vm1092_vm2, %v2024_v51, %v6715_v10  ;;  %v1904_v51 = vrot.slane %v1902_v19, 1  ;;  %v6783_v33 = vpack.c.b16 %v431_v20, %v431_v20 }
  0xdc   : > { %v1710_v3 = vpop.permute.xlu1 %1709 }
  0xdd   : > { %2448 = vmatmul.bf16.gmra.mxu1 %v2228_v23  ;;  %1985 = vrot.lane.b32.xlu0 %v9041_v38, %s6032_s26  ;;  %v2084_v11 = vsel %vm1092_vm2, %v2026_v1, %v1710_v3  ;;  %v1472_v3 = vpack.c.b16 %v9045_v57, %v1456_v8  ;;  %v1900_v1 = vshrl.u32 %v5998_v50, 16  ;;  %v6788_v50 = vrot.slane %v987_v5, 1  ;;  %v5880_v57 = vld [vmem:[%s6077_s23 + $0xa8] sm:$0xf0] }
  0xde   : > { %1031 = vrot.lane.b32.xlu2 %v6741_v12, %s6032_s26  ;;  %v2138_v23 = vsel %vm1125_vm3, %v2084_v11, %v6672_v61  ;;  %v490_v61 = vshll.u32 %v6621_v54, 16 }
  0xdf   : > { %v1960_v24 = vpop.permute.xlu0 %1959  ;;  %v2235_v39 = vshll.u32 %v2138_v23, 16  ;;  %v1608_v8 = vshll.u32 %v1472_v3, 16  ;;  %v1905_v19 = vor.u32 %v1904_v51, %v1900_v1  ;;  %v5881_v23 = vld [vmem:[%s6077_s23 + $0xa8] sm:$0xe]  ;;  %v1606_v5 = vshrl.u32 %v1472_v3, 16  ;;  %v5590_v3 = vld [vmem:[%s8971_s1 + $0x38] sm:$0xff] }
  0xe0   : > { %v6765_v62 = vpop.permute.xlu2 %1665  ;;  %v2136_v63 = vsel %vm1125_vm3, %v2082_v36, %v1960_v24  ;;  %v5948_v36 = vld [vmem:[%s6077_s23 + $0x30] sm:$0xff]   ;;  %v492_v51 = vrot.slane %v490_v61, 1  ;;  %v2030_v61 = vsel %vm1059_vm1, %v6325_v43, %v6703_v34  ;;  %1242 = vmatpush.bf16.msra.mxu0 %v5590_v3  ;;  %v5860_v3 = vld [vmem:[%s6077_s23 + $0xa8] sm:$0xe] }
  0xe1   : > { %v2231_v40 = vshll.u32 %v2136_v63, 16  ;;  %v874_v2 = vshll.u32 %v5948_v36, 16  ;;  %v2229_v12 = vshrl.u32 %v2136_v63, 16  ;;  %v872_v11 = vshrl.u32 %v5948_v36, 16  ;;  %v5614_v63 = vld [vmem:[%s8973_s3 + $0x78] sm:$0xff]  ;;  %v5589_v34 = vld [vmem:[%s8971_s1 + $0x30] sm:$0xff] }
  0xe2   : > { %779 = vrot.lane.b32.xlu1 %v6724_v46, %s6030_s24  ;;  %v2237_v58 = vrot.slane %v2235_v39, 1  ;;  %v1610_v1 = vrot.slane %v1608_v8, 1  ;;  %2622 = vmatpush.bf16.msra.mxu2 %v5614_v63  ;;  %v6805_v36 = vsel %vm450_vm0, %v1905_v19, %v6788_v50  ;;  %v5613_v8 = vld [vmem:[%s8973_s3 + $0x70] sm:$0xff] }
  0xe3   : > { %v2233_v24 = vrot.slane %v2231_v40, 1  ;;  %v876_v40 = vrot.slane %v874_v2, 1  ;;  %9135 = vst [vmem:[#allocation49_spill] sm:$0xff] %v6805_v36 }
  0xe4   : > { %v6781_v38 = vpop.permute.xlu1 %767  ;;  %1243 = vmatpush.bf16.msra.mxu0 %v5589_v34 }
  0xe5   : > { %9134 = vst [vmem:[#allocation48_spill] sm:$0xff] %v6781_v38  ;;  %1683 = vrot.lane.b32.xlu0 %v1602_v17, %s6031_s25  ;;  %v2234_v26 = vor.u32 %v2233_v24, %v2229_v12  ;;  %v615_v17 = vshll.u32 %v6783_v33, 16  ;;  %v488_v12 = vshrl.u32 %v6621_v54, 16  ;;  %v6807_v2 = vor.u32 %v876_v40, %v872_v11 }
  0xe6   : > { %1685 = vrot.lane.b32.xlu2 %v1603_v6, %s6031_s25  ;;  %v816_v24 = vunpack.c.l.b16 %v5145_v14  ;;  %v5882_v6 = vor.u32 %v5881_v23, %v5880_v57  ;;  %v9136_v14 = vshrl.u32 %v6760_v55, 16  ;;  %2623 = vmatpush.bf16.msra.mxu2 %v5613_v8 }
  0xe7   : > { %v1660_v20 = vpop.permute.xlu0 %1659  ;;  %v2238_v22 = vsel %vm450_vm0, %v2234_v26, %v2237_v58  ;;  %v6826_v58 = vrot.slane %v615_v17, 1  ;;  %v1611_v26 = vor.u32 %v1610_v1, %v1606_v5  ;;  %v493_v57 = vor.u32 %v492_v51, %v488_v12  ;;  %v239_v17 = vld [vmem:[%s6077_s23 + $0x54] sm:$0xf]  ;;  %v5859_v5 = vld [vmem:[%s6077_s23 + $0xa8] sm:$0xf0] }
  0xe8   : > { %v6791_v10 = vpop.permute.xlu2 %1969  ;;  %v2028_v19 = vsel %vm1059_vm1, %v6297_v48, %v1660_v20  ;;  %v6831_v43 = vsel %vm450_vm0, %v6807_v2, %v6237_v27  ;;  %v6833_v48 = vpack.c.b16 %v816_v24, %v816_v24  ;;  %v5612_v27 = vld [vmem:[%s8973_s3 + $0x68] sm:$0xff]  ;;  %v271_v24 = vld [vmem:[%s6077_s23 + $0xb0] sm:$0x1] }
  0xe9   : > { %9137 = vst [vmem:[#allocation50_spill] sm:$0xff] %v6831_v43  ;;  %v2085_v20 = vsel %vm1092_vm2, %v2028_v19, %v6781_v38  ;;  %v1612_v12 = vsel %vm450_vm0, %v1611_v26, %v6826_v58  ;;  %v498_v51 = vsel %vm450_vm0, %v493_v57, %v6215_v56  ;;  %v5611_v56 = vld [vmem:[%s8973_s3 + $0x60] sm:$0xff]  ;;  %v368_v26 = vunpack.c.l.b16 %v239_v17 }
  0xea   : > { %1723 = vrot.lane.b32.xlu1 %v6760_v55, %s6030_s24  ;;  %9138 = vst [vmem:[#allocation51_spill] sm:$0xff] %v6833_v48  ;;  %v999_v8 = vshll.u32 %v6833_v48, 16  ;;  %2624 = vmatpush.bf16.msra.mxu2 %v5612_v27  ;;  %v432_v57 = vunpack.c.l.b16 %v271_v24  ;;  %v5587_v17 = vld [vmem:[%s8971_s1 + $0x20] sm:$0xff] }
  0xec   : > { %v1712_v39 = vpop.permute.xlu1 %1711 }
  0xed   : > { %2453 = vmatmul.bf16.gmra.mxu1 %v2238_v22  ;;  %1987 = vrot.lane.b32.xlu0 %v6805_v36, %s6032_s26  ;;  %v1912_v22 = vshll.u32 %v5882_v6, 16  ;;  %v2087_v11 = vsel %vm1092_vm2, %v2030_v61, %v1712_v39  ;;  %v1910_v61 = vshrl.u32 %v5882_v6, 16 }
  0xee   : > { %1989 = vrot.lane.b32.xlu2 %v9136_v14, %s6032_s26  ;;  %v2142_v39 = vsel %vm1125_vm3, %v2087_v11, %v6730_v13  ;;  %v5588_v14 = vld [vmem:[%s8971_s1 + $0x28] sm:$0xff]  ;;  %v5861_v13 = vor.u32 %v5860_v3, %v5859_v5  ;;  %v1613_v11 = vshrl.u32 %v6783_v33, 16  ;;  %2625 = vmatpush.bf16.msra.mxu2 %v5611_v56  ;;  %v5610_v3 = vld [vmem:[%s8973_s3 + $0x58] sm:$0xff] }
  0xef   : > { %v1964_v23 = vpop.permute.xlu0 %1963  ;;  %v1914_v19 = vrot.slane %v1912_v22, 1  ;;  %1244 = vmatpush.bf16.msra.mxu0 %v5588_v14  ;;  %v2245_v6 = vshll.u32 %v2142_v39, 16  ;;  %v9141_v39 = vunpack.c.l.b16 %v6342_v25  ;;  %v6898_v56 = vld [vmem:[%s6077_s23 + $0xa8] sm:$0xff]   ;;  %v5586_v25 = vld [vmem:[%s8971_s1 + $0x18] sm:$0xff] }
  0xf0   : > { %v6839_v40 = vpop.permute.xlu2 %1669  ;;  %v2140_v63 = vsel %vm1125_vm3, %v2085_v20, %v1964_v23  ;;  %v6871_v23 = vrot.slane %v999_v8, 1 }
  0xf1   : > { %v2241_v1 = vshll.u32 %v2140_v63, 16  ;;  %v2239_v22 = vshrl.u32 %v2140_v63, 16  ;;  %v1915_v27 = vor.u32 %v1914_v19, %v1910_v61  ;;  %v6879_v63 = vld [vmem:[%s6077_s23 + $0xb4] sm:$0xff]   ;;  %v6888_v8 = vpack.c.b16 %v9141_v39, %v368_v26 }
  0xf2   : > { %1033 = vrot.lane.b32.xlu1 %v6831_v43, %s6032_s26  ;;  %9140 = vst [vmem:[#allocation53_spill] sm:$0xff] %v6879_v63  ;;  %v6890_v61 = vpack.c.b16 %v432_v57, %v432_v57  ;;  %v1618_v19 = vshll.u32 %v5861_v13, 16  ;;  %v2247_v14 = vrot.slane %v2245_v6, 1  ;;  %2626 = vmatpush.bf16.msra.mxu2 %v5610_v3  ;;  %v2034_v26 = vsel %vm1059_vm1, %v6377_v32, %v6765_v62  ;;  %v5608_v32 = vld [vmem:[%s8973_s3 + $0x48] sm:$0xff] }
  0xf3   : > { %v2243_v34 = vrot.slane %v2241_v1, 1  ;;  %9142 = vst [vmem:[#allocation54_spill] sm:$0xff] %v6888_v8  ;;  %1245 = vmatpush.bf16.msra.mxu0 %v5587_v17  ;;  %v1616_v3 = vshrl.u32 %v5861_v13, 16  ;;  %v886_v62 = vshll.u32 %v6232_v18, 16 }
  0xf4   : > { %v6863_v20 = vpop.permute.xlu1 %769  ;;  %v627_v17 = vshll.u32 %v6890_v61, 16  ;;  %v1620_v39 = vrot.slane %v1618_v19, 1 }
  0xf5   : > { %9139 = vst [vmem:[#allocation52_spill] sm:$0xff] %v6863_v20  ;;  %649 = vrot.lane.b32.xlu0 %v498_v51, %s6031_s25  ;;  %v2244_v5 = vor.u32 %v2243_v34, %v2239_v22  ;;  %v6000_v51 = vld [vmem:[%s6077_s23 + $0xb4] sm:$0xe]  ;;  %v6895_v34 = vsel %vm450_vm0, %v1915_v27, %v6871_v23  ;;  %v5146_v22 = vld [vmem:[%s6077_s23 + $0xbc] sm:$0x1]  ;;  %v888_v55 = vrot.slane %v886_v62, 1 }
  0xf6   : > { %1687 = vrot.lane.b32.xlu2 %v1612_v12, %s6031_s25  ;;  %v5999_v12 = vld [vmem:[%s6077_s23 + $0xb4] sm:$0xf0]  ;;  %9143 = vst [vmem:[#allocation55_spill] sm:$0xff] %v6895_v34 }
  0xf7   : > { %v1664_v24 = vpop.permute.xlu0 %1663  ;;  %v2248_v6 = vsel %vm450_vm0, %v2244_v5, %v2247_v14  ;;  %1246 = vmatpush.bf16.msra.mxu0 %v5586_v25  ;;  %v817_v5 = vunpack.c.l.b16 %v5146_v22  ;;  %v6001_v14 = vor.u32 %v6000_v51, %v5999_v12  ;;  %v6932_v51 = vrot.slane %v627_v17, 1 }
  0xf8   : > { %v6876_v1 = vpop.permute.xlu2 %1973  ;;  %v2032_v27 = vsel %vm1059_vm1, %v6888_v8, %v1664_v24  ;;  %v5585_v24 = vld [vmem:[%s8971_s1 + $0x10] sm:$0xff]  ;;  %v1621_v22 = vor.u32 %v1620_v39, %v1616_v3  ;;  %v5584_v3 = vld [vmem:[%s8971_s1 + $0x8] sm:$0xff] }
  0xf9   : > { %v2088_v25 = vsel %vm1092_vm2, %v2032_v27, %v6863_v20  ;;  %v884_v27 = vshrl.u32 %v6232_v18, 16  ;;  %v1922_v17 = vshll.u32 %v6001_v14, 16  ;;  %v6949_v39 = vld [vmem:[%s6077_s23 + $0xb4] sm:$0xff]   ;;  %v538_v20 = vshll.u32 %v6888_v8, 16 }
  0xfa   : > { %1689 = vrot.lane.b32.xlu1 %v1613_v11, %s6031_s25  ;;  %v5609_v11 = vld [vmem:[%s8973_s3 + $0x50] sm:$0xff] }
  0xfb   : > { %2627 = vmatpush.bf16.msra.mxu2 %v5609_v11  ;;  %1247 = vmatpush.bf16.msra.mxu0 %v5585_v24  ;;  %v5974_v24 = vld [vmem:[%s6077_s23 + $0xb4] sm:$0xf0]  ;;  %v889_v62 = vor.u32 %v888_v55, %v884_v27 }
  0xfc   : > { %v1714_v57 = vpop.permute.xlu1 %1713 }
  0xfd   : > { %2458 = vmatmul.bf16.gmra.mxu1 %v2248_v6  ;;  %781 = vrot.lane.b32.xlu0 %v6898_v56, %s6030_s24  ;;  %v2090_v13 = vsel %vm1092_vm2, %v2034_v26, %v1714_v57  ;;  %v9144_v26 = vshrl.u32 %v6833_v48, 16  ;;  %v510_v57 = vsel %vm450_vm0, %v6807_v2, %v6257_v44  ;;  %v5607_v44 = vld [vmem:[%s8973_s3 + $0x40] sm:$0xff]  ;;  %v6974_v55 = vsel %vm450_vm0, %v889_v62, %v6275_v9  ;;  %v272_v9 = vld [vmem:[%s6077_s23 + $0xbc] sm:$0x1] }
  0xfe   : > { %1991 = vrot.lane.b32.xlu2 %v6895_v34, %s6032_s26  ;;  %v2146_v34 = vsel %vm1125_vm3, %v2090_v13, %v6791_v10  ;;  %v1622_v10 = vsel %vm450_vm0, %v1621_v22, %v6932_v51  ;;  %v1920_v13 = vshrl.u32 %v6001_v14, 16  ;;  %v5583_v22 = vld [vmem:[%s8971_s1] sm:$0xff]  ;;  %9147 = vst [vmem:[#allocation58_spill] sm:$0xff] %v6974_v55 }
  0xff   : > { %v1968_v6 = vpop.permute.xlu0 %1967  ;;  %2628 = vmatpush.bf16.msra.mxu2 %v5608_v32  ;;  %1248 = vmatpush.bf16.msra.mxu0 %v5584_v3  ;;  %v2255_v2 = vshll.u32 %v2146_v34, 16 }
 0x100   : > { %v6924_v19 = vpop.permute.xlu2 %1673  ;;  %v2144_v12 = vsel %vm1125_vm3, %v2088_v25, %v1968_v6  ;;  %v6943_v25 = vpack.c.b16 %v817_v5, %v817_v5 }
 0x101   : > { %v2251_v11 = vshll.u32 %v2144_v12, 16  ;;  %v2249_v32 = vshrl.u32 %v2144_v12, 16  ;;  %v2257_v12 = vrot.slane %v2255_v2, 1  ;;  %v2038_v2 = vsel %vm1059_vm1, %v6426_v41, %v6839_v40  ;;  %v5949_v41 = vld [vmem:[%s6077_s23 + $0x48] sm:$0xff]  }
 0x102   : > { %1993 = vrot.lane.b32.xlu1 %v9144_v26, %s6032_s26  ;;  %9145 = vst [vmem:[#allocation56_spill] sm:$0xff] %v6943_v25  ;;  %v1011_v5 = vshll.u32 %v6943_v25, 16  ;;  %v898_v40 = vshll.u32 %v5949_v41, 16 }
 0x103   : > { %v2253_v6 = vrot.slane %v2251_v11, 1  ;;  %v1924_v11 = vrot.slane %v1922_v17, 1  ;;  %2629 = vmatpush.bf16.msra.mxu2 %v5607_v44  ;;  %1249 = vmatpush.bf16.msra.mxu0 %v5583_v22  ;;  %v514_v17 = vshll.u32 %v6734_v47, 16 }
 0x104   : > { %v6952_v26 = vpop.permute.xlu1 %771  ;;  %v6976_v14 = vrot.slane %v1011_v5, 1  ;;  %v512_v5 = vshrl.u32 %v6734_v47, 16  ;;  %v900_v43 = vrot.slane %v898_v40, 1  ;;  %v5883_v40 = vld [vmem:[%s6077_s23 + $0xc0] sm:$0xf0] }
 0x105   : > { %9146 = vst [vmem:[#allocation57_spill] sm:$0xff] %v6952_v26  ;;  %1725 = vrot.lane.b32.xlu0 %v6833_v48, %s6030_s24  ;;  %v2254_v3 = vor.u32 %v2253_v6, %v2249_v32  ;;  %v1925_v27 = vor.u32 %v1924_v11, %v1920_v13  ;;  %v5975_v6 = vld [vmem:[%s6077_s23 + $0xb4] sm:$0xe]  ;;  %v516_v13 = vrot.slane %v514_v17, 1  ;;  %v243_v17 = vld [vmem:[%s6077_s23 + $0x6c] sm:$0xf] }
 0x106   : > { %651 = vrot.lane.b32.xlu2 %v510_v57, %s6031_s25  ;;  %v6969_v57 = vld [vmem:[%s6077_s23 + $0x60] sm:$0xff]   ;;  %v5976_v18 = vor.u32 %v5975_v6, %v5974_v24 }
 0x107   : > { %v1668_v34 = vpop.permute.xlu0 %1667  ;;  %v2258_v32 = vsel %vm450_vm0, %v2254_v3, %v2257_v12  ;;  %v6993_v62 = vsel %vm450_vm0, %v1925_v27, %v6976_v14  ;;  %v1623_v27 = vshrl.u32 %v6890_v61, 16 }
 0x108   : > { %v6966_v36 = vpop.permute.xlu2 %1977  ;;  %9148 = vst [vmem:[#allocation59_spill] sm:$0xff] %v6993_v62  ;;  %v1628_v24 = vshll.u32 %v5976_v18, 16 }
 0x10a   : > { %1691 = vrot.lane.b32.xlu1 %v1622_v10, %s6031_s25  ;;  %v2036_v10 = vsel %vm1059_vm1, %v6969_v57, %v1668_v34 }
 0x10b   : > { %v2091_v3 = vsel %vm1092_vm2, %v2036_v10, %v6952_v26 }
 0x10c   : > { %v1716_v44 = vpop.permute.xlu1 %1715 }
 0x10d   : > { %2463 = vmatmul.bf16.gmra.mxu1 %v2258_v32  ;;  %1035 = vrot.lane.b32.xlu0 %v6974_v55, %s6032_s26  ;;  %v2093_v11 = vsel %vm1092_vm2, %v2038_v2, %v1716_v44  ;;  %v433_v32 = vunpack.c.l.b16 %v272_v9  ;;  %v517_v2 = vor.u32 %v516_v13, %v512_v5  ;;  %v896_v55 = vshrl.u32 %v5949_v41, 16 }
 0x10e   : > { %783 = vrot.lane.b32.xlu2 %v6879_v63, %s6030_s24  ;;  %v2150_v44 = vsel %vm1125_vm3, %v2093_v11, %v6876_v1  ;;  %v372_v9 = vunpack.c.l.b16 %v243_v17  ;;  %v5884_v11 = vld [vmem:[%s6077_s23 + $0xc0] sm:$0xe]  ;;  %v9063_v17 = vshrl.u32 %v6943_v25, 16 }
 0x10f   : > { %v1972_v34 = vpop.permute.xlu0 %1971  ;;  %v522_v1 = vsel %vm450_vm0, %v517_v2, %v6299_v52  ;;  %v7018_v6 = vor.u32 %v900_v43, %v896_v55  ;;  %v1626_v43 = vshrl.u32 %v5976_v18, 16  ;;  %v7046_v18 = vld [vmem:[%s8972_s2] ss:$0 sm:$0xff] }
 0x110   : > { %v6998_v22 = vpop.permute.xlu2 %1675  ;;  %v2148_v12 = vsel %vm1125_vm3, %v2091_v3, %v1972_v34  ;;  %v7011_v34 = vpack.c.b16 %v433_v32, %v433_v32 }
 0x111   : > { %v2261_v48 = vshll.u32 %v2148_v12, 16  ;;  %v2259_v26 = vshrl.u32 %v2148_v12, 16  ;;  %v9151_v12 = vunpack.c.l.b16 %v6444_v21  ;;  %v7035_v2 = vsel %vm450_vm0, %v7018_v6, %v6327_v60 }
 0x112   : > { %1995 = vrot.lane.b32.xlu1 %v6993_v62, %s6032_s26  ;;  %9150 = vst [vmem:[#allocation61_spill] sm:$0xff] %v7011_v34  ;;  %v2265_v62 = vshll.u32 %v2150_v44, 16  ;;  %v5885_v21 = vor.u32 %v5884_v11, %v5883_v40 }
 0x113   : > { %v2263_v10 = vrot.slane %v2261_v48, 1  ;;  %v5147_v48 = vld [vmem:[%s6077_s23 + $0xc8] sm:$0x1]  ;;  %v7027_v32 = vpack.c.b16 %v9151_v12, %v372_v9  ;;  %9152 = vst [vmem:[#allocation62_spill] sm:$0xff] %v7035_v2 }
 0x114   : > { %v7009_v3 = vpop.permute.xlu1 %773  ;;  %v2267_v44 = vrot.slane %v2265_v62, 1  ;;  %v818_v55 = vunpack.c.l.b16 %v5147_v48  ;;  %v2042_v62 = vsel %vm1059_vm1, %v6488_v16, %v6924_v19  ;;  %v7058_v19 = vld [vmem:[%s6077_s23 + $0xc0] sm:$0xff]   ;;  %v1932_v48 = vshll.u32 %v5885_v21, 16 }
 0x115   : > { %9149 = vst [vmem:[#allocation60_spill] sm:$0xff] %v7009_v3  ;;  %1693 = vrot.lane.b32.xlu0 %v1623_v27, %s6031_s25  ;;  %v2264_v5 = vor.u32 %v2263_v10, %v2259_v26  ;;  %v639_v27 = vshll.u32 %v7011_v34, 16  ;;  %v1630_v26 = vrot.slane %v1628_v24, 1 }
 0x116   : > { %1727 = vrot.lane.b32.xlu2 %v6943_v25, %s6030_s24  ;;  %v7055_v16 = vpack.c.b16 %v818_v55, %v818_v55 }
 0x117   : > { %v1672_v41 = vpop.permute.xlu0 %1671  ;;  %v2268_v9 = vsel %vm450_vm0, %v2264_v5, %v2267_v44  ;;  %v7053_v60 = vrot.slane %v639_v27, 1  ;;  %v1631_v24 = vor.u32 %v1630_v26, %v1626_v43  ;;  %v1633_v27 = vshrl.u32 %v7011_v34, 16 }
 0x118   : > { %v7021_v13 = vpop.permute.xlu2 %1979  ;;  %9153 = vst [vmem:[#allocation63_spill] sm:$0xff] %v7055_v16 }
 0x119   : > { %v1632_v55 = vsel %vm450_vm0, %v1631_v24, %v7053_v60 }
 0x11a   : > { %653 = vrot.lane.b32.xlu1 %v522_v1, %s6031_s25  ;;  %v2429_v52 = vpop.f32.mrf.mxu1  ;;  %v2040_v1 = vsel %vm1059_vm1, %v7027_v32, %v1672_v41 }
 0x11b   : > { %v2094_v40 = vsel %vm1092_vm2, %v2040_v1, %v7009_v3  ;;  %v2430_v12 = vadd.f32 %v7046_v18, %v2429_v52  ;;  %v1934_v1 = vrot.slane %v1932_v48, 1 }
 0x11c   : > { %v1718_v10 = vpop.permute.xlu1 %1717 }
 0x11d   : > { %2468 = vmatmul.bf16.gmra.mxu1 %v2268_v9  ;;  %1997 = vrot.lane.b32.xlu0 %v9063_v17, %s6032_s26  ;;  %v2096_v5 = vsel %vm1092_vm2, %v2042_v62, %v1718_v10  ;;  %v1023_v10 = vshll.u32 %v7055_v16, 16  ;;  %v1930_v9 = vshrl.u32 %v5885_v21, 16 }
 0x11e   : > { %1037 = vrot.lane.b32.xlu2 %v7035_v2, %s6032_s26  ;;  %v2154_v62 = vsel %vm1125_vm3, %v2096_v5, %v6966_v36  ;;  %v2509_v2 = vmax.f32 %v2430_v12, 0.0 }
 0x11f   : > { %v1976_v11 = vpop.permute.xlu0 %1975  ;;  %v2275_v38 = vshll.u32 %v2154_v62, 16  ;;  %v7080_v21 = vrot.slane %v1023_v10, 1  ;;  %v1935_v5 = vor.u32 %v1934_v1, %v1930_v9  ;;  %v9072_v9 = vshrl.u32 %v7055_v16, 16  ;;  %v5638_v62 = vld [vmem:[%s8971_s1 + $0xf8] sm:$0xff] }
 0x120   : > { %v7061_v41 = vpop.permute.xlu2 %645  ;;  %v2152_v44 = vsel %vm1125_vm3, %v2094_v40, %v1976_v11  ;;  %v9154_v40 = vld [vmem:[#allocation16_spill] sm:$0xff]  ;;  %4614 = vmatpush.bf16.msrb.mxu2 %v5638_v62 }
 0x121   : > { %v2271_v43 = vshll.u32 %v2152_v44, 16  ;;  %v910_v11 = vshll.u32 %v9154_v40, 16  ;;  %v2269_v24 = vshrl.u32 %v2152_v44, 16  ;;  %v908_v48 = vshrl.u32 %v9154_v40, 16 }
 0x122   : > { %785 = vrot.lane.b32.xlu1 %v7058_v19, %s6030_s24  ;;  %v2431_v26 = vpop.f32.mrf.mxu1  ;;  %v536_v44 = vshrl.u32 %v6888_v8, 16  ;;  %v2277_v10 = vrot.slane %v2275_v38, 1 }
 0x123   : > { %v2432_v52 = vadd.f32 %v7046_v18, %v2431_v26  ;;  %v2273_v17 = vrot.slane %v2271_v43, 1  ;;  %v912_v26 = vrot.slane %v910_v11, 1 }
 0x124   : > { %v1028_v25 = vpop.permute.xlu1 %1027 }
 0x125   : > { %v2510_v3 = vmax.f32 %v2432_v52, 0.0  ;;  %1695 = vrot.lane.b32.xlu0 %v1632_v55, %s6031_s25  ;;  %v2274_v43 = vor.u32 %v2273_v17, %v2269_v24  ;;  %v5950_v52 = vld [vmem:[%s6077_s23] sm:$0xff]   ;;  %v550_v55 = vshll.u32 %v6969_v57, 16  ;;  %v913_v38 = vor.u32 %v912_v26, %v908_v48  ;;  %v5622_v48 = vld [vmem:[%s8971_s1 + $0xb8] sm:$0xff]  ;;  %v9158_v26 = vld [vmem:[#allocation20_spill] sm:$0xff] }
 0x126   : > { %1697 = vrot.lane.b32.xlu2 %v1633_v27, %s6031_s25  ;;  %v540_v27 = vrot.slane %v538_v20, 1  ;;  %v7100_v20 = vsel %vm450_vm0, %v1935_v5, %v7080_v21  ;;  %3490 = vmatpush.bf16.msrb.mxu0 %v5622_v48 }
 0x127   : > { %v2541_v36 = vpack.c.bf16 %v2510_v3, %v2509_v2  ;;  %v644_v12 = vpop.permute.xlu0 %643  ;;  %v9155_v2 = vld [vmem:[#allocation27_spill] sm:$0xff] }
 0x128   : > { %v7083_v34 = vpop.permute.xlu2 %777  ;;  %v1061_v47 = vsel %vm1059_vm1, %v5950_v52, %v644_v12  ;;  %9156 = vst [vmem:[#allocation27_spill] sm:$0xff] %v7100_v20  ;;  %v541_v24 = vor.u32 %v540_v27, %v536_v44  ;;  %v552_v12 = vrot.slane %v550_v55, 1  ;;  %v247_v52 = vld [vmem:[%s6077_s23 + $0x84] sm:$0xf]  ;;  %v5952_v27 = vld [vmem:[%s6077_s23 + $0x78] sm:$0xff]  }
 0x129   : > { %2630 = vmatmul.bf16.vlgmr.msra.gmra.mxu2 %v2541_v36  ;;  %v1094_v17 = vsel %vm1092_vm2, %v1061_v47, %v9155_v2  ;;  %v2278_v47 = vsel %vm450_vm0, %v2274_v43, %v2277_v10  ;;  %v548_v36 = vshrl.u32 %v6969_v57, 16  ;;  %v7115_v43 = vsel %vm450_vm0, %v913_v38, %v9158_v26  ;;  %v5951_v57 = vld [vmem:[%s6077_s23 + $0x60] sm:$0xff]  }
 0x12a   : > { %1729 = vrot.lane.b32.xlu1 %v7055_v16, %s6030_s24  ;;  %v2434_v3 = vpop.f32.mrf.mxu1  ;;  %v1127_v1 = vsel %vm1125_vm3, %v1094_v17, %v1028_v25  ;;  %v9157_v25 = vld [vmem:[#allocation25_spill] sm:$0xff]  ;;  %v922_v44 = vshll.u32 %v5951_v57, 16  ;;  %v2044_v55 = vsel %vm1059_vm1, %v5952_v27, %v6998_v22  ;;  %v9160_v17 = vld [vmem:[#allocation18_spill] sm:$0xff] }
 0x12b   : > { %1250 = vmatmul.bf16.vlgmr.msra.gmra.mxu0 %v1127_v1  ;;  %v934_v5 = vshll.u32 %v9157_v25, 16  ;;  %v534_v62 = vsel %vm450_vm0, %v7018_v6, %v9160_v17  ;;  %v2435_v1 = vadd.f32 %v7046_v18, %v2434_v3  ;;  %v932_v6 = vshrl.u32 %v9157_v25, 16 }
 0x12c   : > { %v1678_v11 = vpop.permute.xlu1 %1677  ;;  %v920_v17 = vshrl.u32 %v5951_v57, 16  ;;  %v924_v40 = vrot.slane %v922_v44, 1 }
 0x12d   : > { %2473 = vmatmul.bf16.gmra.mxu1 %v2278_v47  ;;  %1999 = vrot.lane.b32.xlu0 %v7100_v20, %s6032_s26  ;;  %v9161_v47 = vld [vmem:[#allocation22_spill] sm:$0xff]  ;;  %v376_v20 = vunpack.c.l.b16 %v247_v52  ;;  %v936_v48 = vrot.slane %v934_v5, 1  ;;  %v2511_v8 = vmax.f32 %v2435_v1, 0.0  ;;  %v9163_v5 = vunpack.c.l.b16 %v6586_v37 }
 0x12e   : > { %2001 = vrot.lane.b32.xlu2 %v9072_v9, %s6032_s26  ;;  %v546_v26 = vsel %vm450_vm0, %v541_v24, %v9161_v47  ;;  %v553_v9 = vor.u32 %v552_v12, %v548_v36  ;;  %v562_v12 = vshll.u32 %v7027_v32, 16  ;;  %v925_v44 = vor.u32 %v924_v40, %v920_v17  ;;  %v9164_v40 = vld [vmem:[#allocation31_spill] sm:$0xff] }
 0x12f   : > { %v7124_v2 = vpop.permute.xlu0 %775  ;;  %v944_v1 = vshrl.u32 %v5952_v27, 16  ;;  %v560_v37 = vshrl.u32 %v7027_v32, 16 }
 0x130   : > { %v7122_v10 = vpop.permute.xlu2 %1721  ;;  %9159 = vst [vmem:[#allocation20_spill] sm:$0xff] %v7124_v2  ;;  %v2097_v38 = vsel %vm1092_vm2, %v2044_v55, %v7124_v2  ;;  %v946_v55 = vshll.u32 %v5952_v27, 16 }
 0x131   : > { %v2156_v22 = vsel %vm1125_vm3, %v2097_v38, %v7021_v13  ;;  %v9162_v13 = vld [vmem:[#allocation29_spill] sm:$0xff]  ;;  %v7147_v38 = vpack.c.b16 %v9163_v5, %v376_v20  ;;  %v564_v20 = vrot.slane %v562_v12, 1 }
 0x132   : > { %1039 = vrot.lane.b32.xlu1 %v7115_v43, %s6032_s26  ;;  %v2436_v16 = vpop.f32.mrf.mxu1  ;;  %v2281_v24 = vshll.u32 %v2156_v22, 16  ;;  %v558_v52 = vsel %vm450_vm0, %v553_v9, %v9162_v13  ;;  %v948_v47 = vrot.slane %v946_v55, 1  ;;  %v9165_v55 = vld [vmem:[#allocation26_spill] sm:$0xff] }
 0x133   : > { %v2437_v3 = vadd.f32 %v7046_v18, %v2436_v16  ;;  %v937_v16 = vor.u32 %v936_v48, %v932_v6  ;;  %v2279_v48 = vshrl.u32 %v2156_v22, 16  ;;  %v565_v5 = vor.u32 %v564_v20, %v560_v37 }
 0x134   : > { %v1982_v2 = vpop.permute.xlu1 %1981  ;;  %v2283_v9 = vrot.slane %v2281_v24, 1  ;;  %v7165_v24 = vsel %vm450_vm0, %v925_v44, %v9165_v55  ;;  %v584_v22 = vshrl.u32 %v7147_v38, 16  ;;  %v970_v44 = vshll.u32 %v6676_v30, 16 }
 0x135   : > { %v2512_v36 = vmax.f32 %v2437_v3, 0.0  ;;  %655 = vrot.lane.b32.xlu0 %v534_v62, %s6031_s25  ;;  %v2046_v3 = vsel %vm1059_vm1, %v6548_v31, %v1678_v11  ;;  %v7159_v27 = vsel %vm450_vm0, %v937_v16, %v9164_v40  ;;  %v586_v31 = vshll.u32 %v7147_v38, 16  ;;  %v251_v11 = vld [vmem:[%s6077_s23 + $0x9c] sm:$0xf] }
 0x136   : > { %657 = vrot.lane.b32.xlu2 %v546_v26, %s6031_s25  ;;  %v380_v16 = vunpack.c.l.b16 %v251_v11  ;;  %v9168_v40 = vunpack.c.l.b16 %v6744_v42  ;;  %v982_v42 = vshll.u32 %v6724_v46, 16 }
 0x137   : > { %v2542_v57 = vpack.c.bf16 %v2512_v36, %v2511_v8  ;;  %v1720_v26 = vpop.permute.xlu0 %1719  ;;  %v949_v36 = vor.u32 %v948_v47, %v944_v1 }
 0x138   : > { %v7151_v25 = vpop.permute.xlu2 %1031  ;;  %v2099_v62 = vsel %vm1092_vm2, %v2046_v3, %v1720_v26  ;;  %v9166_v26 = vld [vmem:[#allocation24_spill] sm:$0xff] }
 0x139   : > { %2635 = vmatmul.bf16.gmra.mxu2 %v2542_v57  ;;  %v2158_v6 = vsel %vm1125_vm3, %v2099_v62, %v1982_v2  ;;  %v1063_v2 = vsel %vm1059_vm1, %v6496_v59, %v7061_v41  ;;  %v588_v57 = vrot.slane %v586_v31, 1  ;;  %v7179_v59 = vsel %vm450_vm0, %v949_v36, %v6546_v49 }
 0x13a   : > { %659 = vrot.lane.b32.xlu1 %v558_v52, %s6031_s25  ;;  %v2439_v8 = vpop.f32.mrf.mxu1  ;;  %v2285_v17 = vshll.u32 %v2158_v6, 16  ;;  %v2284_v52 = vor.u32 %v2283_v9, %v2279_v48  ;;  %v958_v41 = vshll.u32 %v6542_v29, 16  ;;  %v1096_v62 = vsel %vm1092_vm2, %v1063_v2, %v9166_v26  ;;  %v9167_v6 = vld [vmem:[#allocation34_spill] sm:$0xff] }
 0x13b   : > { %v582_v9 = vsel %vm450_vm0, %v949_v36, %v6572_v53  ;;  %v2440_v37 = vadd.f32 %v7046_v18, %v2439_v8  ;;  %v570_v49 = vsel %vm450_vm0, %v565_v5, %v9167_v6  ;;  %v7194_v31 = vpack.c.b16 %v9168_v40, %v380_v16 }
 0x13c   : > { %v1680_v12 = vpop.permute.xlu1 %1679  ;;  %v2287_v13 = vrot.slane %v2285_v17, 1  ;;  %v589_v48 = vor.u32 %v588_v57, %v584_v22  ;;  %v968_v53 = vshrl.u32 %v6676_v30, 16  ;;  %v972_v17 = vrot.slane %v970_v44, 1 }
 0x13d   : > { %1041 = vrot.lane.b32.xlu0 %v7165_v24, %s6032_s26  ;;  %v956_v8 = vshrl.u32 %v6542_v29, 16  ;;  %v2048_v55 = vsel %vm1059_vm1, %v7147_v38, %v1680_v12  ;;  %v960_v2 = vrot.slane %v958_v41, 1  ;;  %v2513_v5 = vmax.f32 %v2440_v37, 0.0 }
 0x13e   : > { %1043 = vrot.lane.b32.xlu2 %v7159_v27, %s6032_s26  ;;  %v2288_v1 = vsel %vm450_vm0, %v2284_v52, %v2287_v13  ;;  %v7205_v13 = vld [vmem:[%s6077_s23 + $0x90] sm:$0xff]   ;;  %v610_v22 = vshll.u32 %v7194_v31, 16  ;;  %v2100_v30 = vsel %vm1092_vm2, %v2048_v55, %v7083_v34  ;;  %v594_v12 = vsel %vm450_vm0, %v589_v48, %v6658_v4 }
 0x13f   : > { %2478 = vmatmul.bf16.gmra.mxu1 %v2288_v1  ;;  %v1030_v3 = vpop.permute.xlu0 %1029  ;;  %v973_v57 = vor.u32 %v972_v17, %v968_v53  ;;  %v598_v44 = vshll.u32 %v7205_v13, 16  ;;  %v5637_v1 = vld [vmem:[%s8971_s1 + $0xf0] sm:$0xff]  ;;  %v980_v26 = vshrl.u32 %v6724_v46, 16  ;;  %v608_v4 = vshrl.u32 %v7194_v31, 16 }
 0x140   : > { %v7182_v47 = vpop.permute.xlu2 %1685  ;;  %v1130_v20 = vsel %vm1125_vm3, %v1096_v62, %v1030_v3  ;;  %v961_v3 = vor.u32 %v960_v2, %v956_v8  ;;  %v984_v62 = vrot.slane %v982_v42, 1  ;;  %4615 = vmatpush.bf16.msrb.mxu2 %v5637_v1  ;;  %v612_v6 = vrot.slane %v610_v22, 1  ;;  %v5953_v42 = vld [vmem:[%s6077_s23 + $0x18] sm:$0xff]  }
 0x141   : > { %1255 = vmatmul.bf16.gmra.mxu0 %v1130_v20  ;;  %v596_v40 = vshrl.u32 %v7205_v13, 16  ;;  %v622_v48 = vshll.u32 %v6898_v56, 16  ;;  %v7228_v53 = vsel %vm450_vm0, %v973_v57, %v6682_v35 }
 0x142   : > { %1045 = vrot.lane.b32.xlu1 %v7179_v59, %s6032_s26  ;;  %v2441_v11 = vpop.f32.mrf.mxu1  ;;  %v7232_v17 = vsel %vm450_vm0, %v961_v3, %v6615_v0  ;;  %v985_v8 = vor.u32 %v984_v62, %v980_v26 }
 0x143   : > { %v2442_v36 = vadd.f32 %v7046_v18, %v2441_v11  ;;  %v600_v11 = vrot.slane %v598_v44, 1  ;;  %v624_v22 = vrot.slane %v622_v48, 1 }
 0x144   : > { %v1984_v52 = vpop.permute.xlu1 %1983 }
 0x145   : > { %v2514_v16 = vmax.f32 %v2442_v36, 0.0  ;;  %661 = vrot.lane.b32.xlu0 %v570_v49, %s6031_s25  ;;  %v2160_v20 = vsel %vm1125_vm3, %v2100_v30, %v1984_v52  ;;  %v601_v35 = vor.u32 %v600_v11, %v596_v40  ;;  %v7250_v30 = vsel %vm450_vm0, %v985_v8, %v6788_v50 }
 0x146   : > { %663 = vrot.lane.b32.xlu2 %v582_v9, %s6031_s25  ;;  %v2291_v55 = vshll.u32 %v2160_v20, 16  ;;  %v2289_v26 = vshrl.u32 %v2160_v20, 16 }
 0x147   : > { %v2543_v41 = vpack.c.bf16 %v2514_v16, %v2513_v5  ;;  %v1682_v9 = vpop.permute.xlu0 %1681  ;;  %v613_v5 = vor.u32 %v612_v6, %v608_v4  ;;  %v620_v16 = vshrl.u32 %v6898_v56, 16 }
 0x148   : > { %v7219_v37 = vpop.permute.xlu2 %1989  ;;  %v2050_v2 = vsel %vm1059_vm1, %v6625_v15, %v1682_v9  ;;  %v5621_v15 = vld [vmem:[%s8971_s1 + $0xb0] sm:$0xff]  ;;  %v2293_v57 = vrot.slane %v2291_v55, 1 }
 0x149   : > { %2640 = vmatmul.bf16.gmra.mxu2 %v2543_v41  ;;  %3491 = vmatpush.bf16.msrb.mxu0 %v5621_v15  ;;  %v618_v50 = vsel %vm450_vm0, %v613_v5, %v6826_v58  ;;  %v625_v4 = vor.u32 %v624_v22, %v620_v16  ;;  %v5894_v16 = vld [vmem:[%s6077_s23 + $0x18] sm:$0xf0]  ;;  %v5895_v22 = vld [vmem:[%s6077_s23 + $0x18] sm:$0xe]  ;;  %v2054_v15 = vsel %vm1059_vm1, %v6718_v28, %v7182_v47 }
 0x14a   : > { %665 = vrot.lane.b32.xlu1 %v594_v12, %s6031_s25  ;;  %v2444_v49 = vpop.f32.mrf.mxu1  ;;  %v1006_v12 = vshll.u32 %v6879_v63, 16  ;;  %v2294_v11 = vor.u32 %v2293_v57, %v2289_v26 }
 0x14b   : > { %v2445_v56 = vadd.f32 %v7046_v18, %v2444_v49  ;;  %v1018_v49 = vshll.u32 %v7058_v19, 16  ;;  %v630_v55 = vsel %vm450_vm0, %v625_v4, %v6932_v51 }
 0x14c   : > { %v648_v36 = vpop.permute.xlu1 %647  ;;  %v1008_v40 = vrot.slane %v1006_v12, 1  ;;  %v632_v12 = vshrl.u32 %v6949_v39, 16 }
 0x14d   : > { %v1065_v52 = vsel %vm1059_vm1, %v5953_v42, %v648_v36  ;;  %1047 = vrot.lane.b32.xlu0 %v7232_v17, %s6032_s26  ;;  %v2515_v48 = vmax.f32 %v2445_v56, 0.0  ;;  %v634_v36 = vshll.u32 %v6949_v39, 16  ;;  %v1016_v42 = vshrl.u32 %v7058_v19, 16 }
 0x14e   : > { %1049 = vrot.lane.b32.xlu2 %v7228_v53, %s6032_s26  ;;  %v1098_v0 = vsel %vm1092_vm2, %v1065_v52, %v6539_v45  ;;  %v2102_v45 = vsel %vm1092_vm2, %v2050_v2, %v7122_v10  ;;  %v606_v10 = vsel %vm450_vm0, %v601_v35, %v6753_v7  ;;  %v1020_v52 = vrot.slane %v1018_v49, 1 }
 0x14f   : > { %v1986_v1 = vpop.permute.xlu0 %1985  ;;  %v1133_v3 = vsel %vm1125_vm3, %v1098_v0, %v7151_v25  ;;  %v1004_v25 = vshrl.u32 %v6879_v63, 16  ;;  %v636_v57 = vrot.slane %v634_v36, 1  ;;  %v7291_v19 = vsel %vm450_vm0, %v625_v4, %v6871_v23 }
 0x150   : > { %v7253_v44 = vpop.permute.xlu2 %1687  ;;  %v2162_v41 = vsel %vm1125_vm3, %v2102_v45, %v1986_v1  ;;  %v5356_v45 = vld [vmem:[%s6077_s23 + $0x20] sm:$0x1]  ;;  %v1021_v1 = vor.u32 %v1020_v52, %v1016_v42 }
 0x151   : > { %v2295_v62 = vshll.u32 %v2162_v41, 16  ;;  %1260 = vmatmul.bf16.gmra.mxu0 %v1133_v3  ;;  %v1009_v5 = vor.u32 %v1008_v40, %v1004_v25  ;;  %v5896_v41 = vor.u32 %v5895_v22, %v5894_v16  ;;  %v637_v26 = vor.u32 %v636_v57, %v632_v12 }
 0x152   : > { %1051 = vrot.lane.b32.xlu1 %v7250_v30, %s6032_s26  ;;  %v2446_v9 = vpop.f32.mrf.mxu1 }
 0x153   : > { %v2447_v6 = vadd.f32 %v7046_v18, %v2446_v9  ;;  %v2297_v58 = vrot.slane %v2295_v62, 1  ;;  %v7295_v56 = vsel %vm450_vm0, %v1009_v5, %v6976_v14  ;;  %v7308_v14 = vsel %vm450_vm0, %v1021_v1, %v7080_v21 }
 0x154   : > { %v7270_v20 = vpop.permute.xlu1 %779  ;;  %v3976_v62 = vshll.u32 %v5896_v41, 16 }
 0x155   : > { %v2516_v8 = vmax.f32 %v2447_v6, 0.0  ;;  %667 = vrot.lane.b32.xlu0 %v606_v10, %s6031_s25  ;;  %v2298_v7 = vsel %vm450_vm0, %v2294_v11, %v2297_v58 }
 0x156   : > { %669 = vrot.lane.b32.xlu2 %v618_v50, %s6031_s25  ;;  %2483 = vmatmul.bf16.gmra.mxu1 %v2298_v7  ;;  %v3057_v50 = vunpack.c.l.b16 %v5356_v45  ;;  %v9170_v45 = vld [vmem:[#allocation3_spill] sm:$0xff] }
 0x157   : > { %v2544_v2 = vpack.c.bf16 %v2516_v8, %v2515_v48  ;;  %v1684_v35 = vpop.permute.xlu0 %1683  ;;  %v3974_v48 = vshrl.u32 %v5896_v41, 16  ;;  %v3978_v8 = vrot.slane %v3976_v62, 1  ;;  %v9171_v1 = vshrl.u32 %v9170_v45, 16  ;;  %v6003_v62 = vld [vmem:[%s6077_s23 + $0x24] sm:$0xe] }
 0x158   : > { %v7279_v0 = vpop.permute.xlu2 %1991  ;;  %v2052_v28 = vsel %vm1059_vm1, %v7205_v13, %v1684_v35  ;;  %v7316_v49 = vpack.c.b16 %v3057_v50, %v3057_v50  ;;  %v9169_v35 = vld [vmem:[#allocation4_spill] sm:$0xff] }
 0x159   : > { %2645 = vmatmul.bf16.gmra.mxu2 %v2544_v2  ;;  %v2103_v13 = vsel %vm1092_vm2, %v2052_v28, %v7270_v20  ;;  %v3979_v22 = vor.u32 %v3978_v8, %v3974_v48 }
 0x15a   : > { %671 = vrot.lane.b32.xlu1 %v630_v55, %s6031_s25  ;;  %v2449_v51 = vpop.f32.mrf.mxu1  ;;  %v3097_v58 = vshll.u32 %v7316_v49, 16 }
 0x15b   : > { %v2450_v4 = vadd.f32 %v7046_v18, %v2449_v51 }
 0x15c   : > { %v1724_v3 = vpop.permute.xlu1 %1723  ;;  %v7327_v16 = vrot.slane %v3097_v58, 1 }
 0x15d   : > { %v2105_v47 = vsel %vm1092_vm2, %v2054_v15, %v1724_v3  ;;  %1053 = vrot.lane.b32.xlu0 %v7291_v19, %s6032_s26  ;;  %v2517_v2 = vmax.f32 %v2450_v4, 0.0  ;;  %v9172_v3 = vld [vmem:[#allocation38_spill] sm:$0xff]  ;;  %v6002_v4 = vld [vmem:[%s6077_s23 + $0x24] sm:$0xf0] }
 0x15e   : > { %1055 = vrot.lane.b32.xlu2 %v7295_v56, %s6032_s26  ;;  %v2166_v23 = vsel %vm1125_vm3, %v2105_v47, %v7219_v37  ;;  %v642_v37 = vsel %vm450_vm0, %v637_v26, %v7053_v60  ;;  %v5636_v47 = vld [vmem:[%s8971_s1 + $0xe8] sm:$0xff]  ;;  %v3980_v26 = vsel %vm450_vm0, %v3979_v22, %v7327_v16 }
 0x15f   : > { %v1988_v10 = vpop.permute.xlu0 %1987  ;;  %v2305_v25 = vshll.u32 %v2166_v23, 16  ;;  %4616 = vmatpush.bf16.msrb.mxu2 %v5636_v47  ;;  %v9173_v22 = vld [vmem:[#allocation7_spill] sm:$0xff] }
 0x160   : > { %v7310_v9 = vpop.permute.xlu2 %651  ;;  %v2164_v6 = vsel %vm1125_vm3, %v2103_v13, %v1988_v10  ;;  %v3981_v13 = vshrl.u32 %v7316_v49, 16  ;;  %v7350_v10 = vld [vmem:[%s6077_s23 + $0x24] sm:$0xff]  }
 0x161   : > { %v2301_v40 = vshll.u32 %v2164_v6, 16  ;;  %v2299_v7 = vshrl.u32 %v2164_v6, 16  ;;  %v2307_v52 = vrot.slane %v2305_v25, 1  ;;  %v5620_v6 = vld [vmem:[%s8971_s1 + $0xa8] sm:$0xff] }
 0x162   : > { %1057 = vrot.lane.b32.xlu1 %v7308_v14, %s6032_s26  ;;  %v2451_v21 = vpop.f32.mrf.mxu1  ;;  %v5357_v25 = vld [vmem:[%s6077_s23 + $0x2c] sm:$0x1]  ;;  %3492 = vmatpush.bf16.msrb.mxu0 %v5620_v6 }
 0x163   : > { %v2452_v11 = vadd.f32 %v7046_v18, %v2451_v21  ;;  %v2303_v55 = vrot.slane %v2301_v40, 1  ;;  %v2056_v40 = vsel %vm1059_vm1, %v7194_v31, %v7253_v44 }
 0x164   : > { %v1034_v36 = vpop.permute.xlu1 %1033 }
 0x165   : > { %v2518_v42 = vmax.f32 %v2452_v11, 0.0  ;;  %v2304_v5 = vor.u32 %v2303_v55, %v2299_v7  ;;  %673 = vrot.lane.b32.xlu0 %v642_v37, %s6031_s25  ;;  %v3058_v55 = vunpack.c.l.b16 %v5357_v25  ;;  %v5954_v25 = vld [vmem:[%s6077_s23 + $0x30] sm:$0xff]  }
 0x166   : > { %3829 = vrot.lane.b32.xlu2 %v9169_v35, %s6031_s25 }
 0x167   : > { %v2545_v60 = vpack.c.bf16 %v2518_v42, %v2517_v2  ;;  %v650_v51 = vpop.permute.xlu0 %649  ;;  %v2308_v12 = vsel %vm450_vm0, %v2304_v5, %v2307_v52 }
 0x168   : > { %v7329_v15 = vpop.permute.xlu2 %783  ;;  %v1067_v57 = vsel %vm1059_vm1, %v6621_v54, %v650_v51  ;;  %2488 = vmatmul.bf16.gmra.mxu1 %v2308_v12  ;;  %v5886_v54 = vld [vmem:[%s6077_s23 + $0x18] sm:$0xff]  }
 0x169   : > { %2650 = vmatmul.bf16.gmra.mxu2 %v2545_v60  ;;  %v1100_v28 = vsel %vm1092_vm2, %v1067_v57, %v9172_v3  ;;  %v3092_v48 = vshll.u32 %v5886_v54, 16  ;;  %v3090_v35 = vshrl.u32 %v5886_v54, 16  ;;  %v5598_v57 = vld [vmem:[%s8973_s3 + $0x38] sm:$0xff] }
 0x16a   : > { %3831 = vrot.lane.b32.xlu1 %v9171_v1, %s6031_s25  ;;  %v2454_v41 = vpop.f32.mrf.mxu1  ;;  %v1136_v50 = vsel %vm1125_vm3, %v1100_v28, %v1034_v36  ;;  %v6004_v36 = vor.u32 %v6003_v62, %v6002_v4  ;;  %2759 = vmatpush.bf16.msra.mxu3 %v5598_v57  ;;  %v5597_v4 = vld [vmem:[%s8973_s3 + $0x30] sm:$0xff]  ;;  %v5358_v57 = vld [vmem:[%s6077_s23 + $0x38] sm:$0x1] }
 0x16b   : > { %1265 = vmatmul.bf16.gmra.mxu0 %v1136_v50  ;;  %v2455_v11 = vadd.f32 %v7046_v18, %v2454_v41  ;;  %v3094_v60 = vrot.slane %v3092_v48, 1  ;;  %v9174_v48 = vld [vmem:[#allocation36_spill] sm:$0xff] }
 0x16c   : > { %v1690_v23 = vpop.permute.xlu1 %1689  ;;  %v3986_v12 = vshll.u32 %v6004_v36, 16 }
 0x16d   : > { %3009 = vrot.lane.b32.xlu0 %v5886_v54, %s6030_s24  ;;  %v2519_v42 = vmax.f32 %v2455_v11, 0.0  ;;  %v2058_v1 = vsel %vm1059_vm1, %v6783_v33, %v1690_v23  ;;  %v3095_v47 = vor.u32 %v3094_v60, %v3090_v35  ;;  %v3984_v23 = vshrl.u32 %v6004_v36, 16  ;;  %v5897_v60 = vld [vmem:[%s6077_s23 + $0x30] sm:$0xf0] }
 0x16e   : > { %4133 = vrot.lane.b32.xlu2 %v3980_v26, %s6032_s26  ;;  %2760 = vmatpush.bf16.msra.mxu3 %v5597_v4 }
 0x16f   : > { %v7363_v37 = vpop.permute.xlu0 %781 }
 0x170   : > { %v7361_v21 = vpop.permute.xlu2 %1727  ;;  %v2106_v58 = vsel %vm1092_vm2, %v2056_v40, %v7363_v37  ;;  %v1069_v40 = vsel %vm1059_vm1, %v5954_v25, %v7310_v9  ;;  %v5594_v25 = vld [vmem:[%s8973_s3 + $0x18] sm:$0xff] }
 0x171   : > { %v2168_v8 = vsel %vm1125_vm3, %v2106_v58, %v7279_v0  ;;  %v7376_v0 = vpack.c.b16 %v3058_v55, %v3058_v55 }
 0x172   : > { %4135 = vrot.lane.b32.xlu1 %v3981_v13, %s6032_s26  ;;  %v2456_v7 = vpop.f32.mrf.mxu1  ;;  %v2311_v52 = vshll.u32 %v2168_v8, 16  ;;  %v2309_v62 = vshrl.u32 %v2168_v8, 16  ;;  %v3988_v13 = vrot.slane %v3986_v12, 1  ;;  %v9175_v8 = vld [vmem:[#allocation5_spill] sm:$0xff] }
 0x173   : > { %v2457_v44 = vadd.f32 %v7046_v18, %v2456_v7  ;;  %v3109_v26 = vshll.u32 %v7376_v0, 16  ;;  %v9176_v7 = vshrl.u32 %v9175_v8, 16 }
 0x174   : > { %v1994_v2 = vpop.permute.xlu1 %1993  ;;  %v2313_v28 = vrot.slane %v2311_v52, 1  ;;  %v3989_v9 = vor.u32 %v3988_v13, %v3984_v23  ;;  %v5635_v13 = vld [vmem:[%s8971_s1 + $0xe0] sm:$0xff] }
 0x175   : > { %v2520_v5 = vmax.f32 %v2457_v44, 0.0  ;;  %3893 = vrot.lane.b32.xlu0 %v7316_v49, %s6030_s24  ;;  %v3100_v44 = vsel %vm450_vm0, %v3095_v47, %v7327_v16  ;;  %v7404_v36 = vrot.slane %v3109_v26, 1  ;;  %4617 = vmatpush.bf16.msrb.mxu2 %v5635_v13  ;;  %v6006_v13 = vld [vmem:[%s6077_s23 + $0x3c] sm:$0xe] }
 0x176   : > { %3833 = vrot.lane.b32.xlu2 %v9173_v22, %s6031_s25  ;;  %v2314_v58 = vor.u32 %v2313_v28, %v2309_v62  ;;  %v5898_v22 = vld [vmem:[%s6077_s23 + $0x30] sm:$0xe] }
 0x177   : > { %v2546_v51 = vpack.c.bf16 %v2520_v5, %v2519_v42  ;;  %v1726_v3 = vpop.permute.xlu0 %1725  ;;  %v9177_v5 = vld [vmem:[#allocation41_spill] sm:$0xff]  ;;  %v5899_v47 = vor.u32 %v5898_v22, %v5897_v60 }
 0x178   : > { %v7383_v41 = vpop.permute.xlu2 %1037  ;;  %v2108_v49 = vsel %vm1092_vm2, %v2058_v1, %v1726_v3  ;;  %v1102_v35 = vsel %vm1092_vm2, %v1069_v40, %v9177_v5  ;;  %v7420_v1 = vld [vmem:[%s6077_s23 + $0xa8] sm:$0xff]   ;;  %v5593_v5 = vld [vmem:[%s8973_s3 + $0x10] sm:$0xff] }
 0x179   : > { %2655 = vmatmul.bf16.gmra.mxu2 %v2546_v51  ;;  %v2170_v50 = vsel %vm1125_vm3, %v2108_v49, %v1994_v2  ;;  %v5596_v2 = vld [vmem:[%s8973_s3 + $0x28] sm:$0xff]  ;;  %v3990_v49 = vsel %vm450_vm0, %v3989_v9, %v7404_v36 }
 0x17a   : > { %3011 = vrot.lane.b32.xlu1 %v7350_v10, %s6030_s24  ;;  %v2459_v54 = vpop.f32.mrf.mxu1  ;;  %v2315_v33 = vshll.u32 %v2170_v50, 16  ;;  %2761 = vmatpush.bf16.msra.mxu3 %v5596_v2  ;;  %v5595_v50 = vld [vmem:[%s8973_s3 + $0x20] sm:$0xff]  ;;  %v3994_v2 = vshrl.u32 %v5899_v47, 16 }
 0x17b   : > { %v2460_v16 = vadd.f32 %v7046_v18, %v2459_v54 }
 0x17c   : > { %v1692_v6 = vpop.permute.xlu1 %1691  ;;  %v2317_v11 = vrot.slane %v2315_v33, 1  ;;  %v3059_v33 = vunpack.c.l.b16 %v5358_v57 }
 0x17d   : > { %2897 = vrot.lane.b32.xlu0 %v9174_v48, %s6031_s25  ;;  %v2060_v3 = vsel %vm1059_vm1, %v7420_v1, %v1692_v6  ;;  %v2521_v26 = vmax.f32 %v2460_v16, 0.0  ;;  %v3996_v6 = vshll.u32 %v5899_v47, 16  ;;  %v9179_v16 = vld [vmem:[#allocation45_spill] sm:$0xff]  ;;  %v5592_v47 = vld [vmem:[%s8973_s3 + $0x8] sm:$0xff] }
 0x17e   : > { %3835 = vrot.lane.b32.xlu2 %v9176_v7, %s6031_s25  ;;  %v2318_v55 = vsel %vm450_vm0, %v2314_v58, %v2317_v11  ;;  %2762 = vmatpush.bf16.msra.mxu3 %v5595_v50  ;;  %v2109_v23 = vsel %vm1092_vm2, %v2060_v3, %v7329_v15  ;;  %v7444_v48 = vpack.c.b16 %v3059_v33, %v3059_v33  ;;  %v9178_v7 = vld [vmem:[#allocation9_spill] sm:$0xff]  ;;  %v9181_v3 = vld [vmem:[#allocation42_spill] sm:$0xff] }
 0x17f   : > { %2493 = vmatmul.bf16.gmra.mxu1 %v2318_v55  ;;  %v1036_v52 = vpop.permute.xlu0 %1035  ;;  %v7476_v33 = vld [vmem:[%s6077_s23 + $0x3c] sm:$0xff]  }
 0x180   : > { %v7409_v42 = vpop.permute.xlu2 %1697  ;;  %v1139_v51 = vsel %vm1125_vm3, %v1102_v35, %v1036_v52  ;;  %v3121_v9 = vshll.u32 %v7444_v48, 16  ;;  %v3998_v52 = vrot.slane %v3996_v6, 1 }
 0x181   : > { %1270 = vmatmul.bf16.gmra.mxu0 %v1139_v51 }
 0x182   : > { %3281 = vrot.lane.b32.xlu1 %v3100_v44, %s6032_s26  ;;  %v2461_v12 = vpop.f32.mrf.mxu1  ;;  %2763 = vmatpush.bf16.msra.mxu3 %v5594_v25  ;;  %v3991_v44 = vshrl.u32 %v7376_v0, 16 }
 0x183   : > { %v2462_v28 = vadd.f32 %v7046_v18, %v2461_v12  ;;  %v9180_v12 = vld [vmem:[#allocation44_spill] sm:$0xff] }
 0x184   : > { %v1996_v54 = vpop.permute.xlu1 %1995 }
 0x185   : > { %v2522_v62 = vmax.f32 %v2462_v28, 0.0  ;;  %4137 = vrot.lane.b32.xlu0 %v3990_v49, %s6032_s26  ;;  %v2172_v58 = vsel %vm1125_vm3, %v2109_v23, %v1996_v54  ;;  %v7466_v28 = vrot.slane %v3121_v9, 1  ;;  %v3999_v49 = vor.u32 %v3998_v52, %v3994_v2  ;;  %v6005_v23 = vld [vmem:[%s6077_s23 + $0x3c] sm:$0xf0]  ;;  %v9182_v9 = vld [vmem:[#allocation8_spill] sm:$0xff] }
 0x186   : > { %3895 = vrot.lane.b32.xlu2 %v7376_v0, %s6030_s24  ;;  %v2321_v35 = vshll.u32 %v2172_v58, 16  ;;  %2764 = vmatpush.bf16.msra.mxu3 %v5593_v5  ;;  %v3104_v0 = vshll.u32 %v7350_v10, 16  ;;  %v9183_v2 = vshrl.u32 %v9182_v9, 16  ;;  %v5887_v5 = vld [vmem:[%s6077_s23 + $0x30] sm:$0xff]  }
 0x187   : > { %v2547_v4 = vpack.c.bf16 %v2522_v62, %v2521_v26  ;;  %v1694_v11 = vpop.permute.xlu0 %1693 }
 0x188   : > { %v7441_v40 = vpop.permute.xlu2 %2001  ;;  %v2062_v22 = vsel %vm1059_vm1, %v6890_v61, %v1694_v11  ;;  %v5619_v61 = vld [vmem:[%s8971_s1 + $0xa0] sm:$0xff]  ;;  %v2323_v50 = vrot.slane %v2321_v35, 1  ;;  %v3102_v11 = vshrl.u32 %v7350_v10, 16  ;;  %v4000_v35 = vsel %vm450_vm0, %v3999_v49, %v7466_v28 }
 0x189   : > { %2660 = vmatmul.bf16.gmra.mxu2 %v2547_v4  ;;  %v2111_v26 = vsel %vm1092_vm2, %v2062_v22, %v7361_v21  ;;  %3493 = vmatpush.bf16.msrb.mxu0 %v5619_v61  ;;  %v2319_v21 = vshrl.u32 %v2172_v58, 16  ;;  %v5359_v22 = vld [vmem:[%s6077_s23 + $0x44] sm:$0x1]  ;;  %v6007_v61 = vor.u32 %v6006_v13, %v6005_v23 }
 0x18a   : > { %3837 = vrot.lane.b32.xlu1 %v9178_v7, %s6031_s25  ;;  %v2464_v55 = vpop.f32.mrf.mxu1  ;;  %2765 = vmatpush.bf16.msra.mxu3 %v5592_v47  ;;  %v3106_v7 = vrot.slane %v3104_v0, 1 }
 0x18b   : > { %v2465_v4 = vadd.f32 %v7046_v18, %v2464_v55  ;;  %v2324_v10 = vor.u32 %v2323_v50, %v2319_v21  ;;  %v9184_v50 = vld [vmem:[#allocation61_spill] sm:$0xff]  ;;  %v4006_v23 = vshll.u32 %v6007_v61, 16  ;;  %v3116_v21 = vshll.u32 %v5887_v5, 16 }
 0x18c   : > { %v654_v60 = vpop.permute.xlu1 %653 }
 0x18d   : > { %v1071_v51 = vsel %vm1059_vm1, %v9179_v16, %v654_v60  ;;  %4139 = vrot.lane.b32.xlu0 %v3991_v44, %s6032_s26  ;;  %v2523_v16 = vmax.f32 %v2465_v4, 0.0  ;;  %v4001_v4 = vshrl.u32 %v7444_v48, 16 }
 0x18e   : > { %v1104_v57 = vsel %vm1092_vm2, %v1071_v51, %v9180_v12  ;;  %2899 = vrot.lane.b32.xlu2 %v9181_v3, %s6031_s25  ;;  %v3060_v3 = vunpack.c.l.b16 %v5359_v22 }
 0x18f   : > { %v1998_v62 = vpop.permute.xlu0 %1997  ;;  %v1142_v25 = vsel %vm1125_vm3, %v1104_v57, %v7383_v41  ;;  %v5591_v41 = vld [vmem:[%s8973_s3] sm:$0xff]  ;;  %v3107_v57 = vor.u32 %v3106_v7, %v3102_v11 }
 0x190   : > { %v7471_v54 = vpop.permute.xlu2 %657  ;;  %v2174_v6 = vsel %vm1125_vm3, %v2111_v26, %v1998_v62  ;;  %2766 = vmatpush.bf16.msra.mxu3 %v5591_v41  ;;  %v2066_v26 = vsel %vm1059_vm1, %v9184_v50, %v7409_v42 }
 0x191   : > { %v2325_v44 = vshll.u32 %v2174_v6, 16  ;;  %1275 = vmatmul.bf16.gmra.mxu0 %v1142_v25  ;;  %v3112_v6 = vsel %vm450_vm0, %v3107_v57, %v7404_v36  ;;  %v7511_v25 = vpack.c.b16 %v3060_v3, %v3060_v3  ;;  %v4004_v36 = vshrl.u32 %v6007_v61, 16 }
 0x192   : > { %3839 = vrot.lane.b32.xlu1 %v9183_v2, %s6031_s25  ;;  %v2466_v52 = vpop.f32.mrf.mxu1 }
 0x193   : > { %v2467_v55 = vadd.f32 %v7046_v18, %v2466_v52  ;;  %v2327_v60 = vrot.slane %v2325_v44, 1  ;;  %v4008_v44 = vrot.slane %v4006_v23, 1 }
 0x194   : > { %v7495_v58 = vpop.permute.xlu1 %785 }
 0x195   : > { %v2524_v51 = vmax.f32 %v2467_v55, 0.0  ;;  %3013 = vrot.lane.b32.xlu0 %v5887_v5, %s6030_s24  ;;  %v2328_v0 = vsel %vm450_vm0, %v2324_v10, %v2327_v60  ;;  %v3114_v10 = vshrl.u32 %v5887_v5, 16  ;;  %v4009_v57 = vor.u32 %v4008_v44, %v4004_v36 }
 0x196   : > { %4141 = vrot.lane.b32.xlu2 %v4000_v35, %s6032_s26  ;;  %2498 = vmatmul.bf16.gmra.mxu1 %v2328_v0 }
 0x197   : > { %v2548_v12 = vpack.c.bf16 %v2524_v51, %v2523_v16  ;;  %v1696_v47 = vpop.permute.xlu0 %1695  ;;  %v9185_v16 = vld [vmem:[#allocation46_spill] sm:$0xff]  ;;  %v3118_v51 = vrot.slane %v3116_v21, 1  ;;  %v5634_v21 = vld [vmem:[%s8971_s1 + $0xd8] sm:$0xff] }
 0x198   : > { %v7501_v49 = vpop.permute.xlu2 %1043  ;;  %v2064_v11 = vsel %vm1059_vm1, %v6949_v39, %v1696_v47  ;;  %4618 = vmatpush.bf16.msrb.mxu2 %v5634_v21 }
 0x199   : > { %2665 = vmatmul.bf16.gmra.mxu2 %v2548_v12  ;;  %v2112_v52 = vsel %vm1092_vm2, %v2064_v11, %v7495_v58 }
 0x19a   : > { %3897 = vrot.lane.b32.xlu1 %v7444_v48, %s6030_s24  ;;  %v2469_v62 = vpop.f32.mrf.mxu1  ;;  %v3133_v48 = vshll.u32 %v7511_v25, 16 }
 0x19b   : > { %v2470_v35 = vadd.f32 %v7046_v18, %v2469_v62 }
 0x19c   : > { %v1730_v13 = vpop.permute.xlu1 %1729  ;;  %v7530_v12 = vrot.slane %v3133_v48, 1 }
 0x19d   : > { %v2114_v7 = vsel %vm1092_vm2, %v2066_v26, %v1730_v13  ;;  %3283 = vrot.lane.b32.xlu0 %v3112_v6, %s6032_s26  ;;  %v2525_v50 = vmax.f32 %v2470_v35, 0.0  ;;  %v3119_v6 = vor.u32 %v3118_v51, %v3114_v10  ;;  %v7564_v51 = vld [vmem:[%s8972_s2] ss:$0 sm:$0xff] }
 0x19e   : > { %4143 = vrot.lane.b32.xlu2 %v4001_v4, %s6032_s26  ;;  %v2178_v42 = vsel %vm1125_vm3, %v2114_v7, %v7441_v40  ;;  %v9186_v4 = vld [vmem:[#allocation12_spill] sm:$0xff] }
 0x19f   : > { %v2000_v55 = vpop.permute.xlu0 %1999  ;;  %v2335_v60 = vshll.u32 %v2178_v42, 16  ;;  %v5956_v42 = vld [vmem:[%s6077_s23 + $0x48] sm:$0xff]  }
 0x1a0   : > { %v7521_v2 = vpop.permute.xlu2 %663  ;;  %v2176_v41 = vsel %vm1125_vm3, %v2112_v52, %v2000_v55  ;;  %v9187_v52 = vld [vmem:[#allocation48_spill] sm:$0xff] }
 0x1a1   : > { %v2331_v22 = vshll.u32 %v2176_v41, 16  ;;  %v2329_v3 = vshrl.u32 %v2176_v41, 16  ;;  %v2337_v62 = vrot.slane %v2335_v60, 1  ;;  %v3124_v41 = vsel %vm450_vm0, %v3119_v6, %v7466_v28  ;;  %v5618_v6 = vld [vmem:[%s8971_s1 + $0x98] sm:$0xff] }
 0x1a2   : > { %2901 = vrot.lane.b32.xlu1 %v9185_v16, %s6031_s25  ;;  %v2471_v40 = vpop.f32.mrf.mxu1  ;;  %3494 = vmatpush.bf16.msrb.mxu0 %v5618_v6 }
 0x1a3   : > { %v2472_v0 = vadd.f32 %v7046_v18, %v2471_v40  ;;  %v2333_v61 = vrot.slane %v2331_v22, 1  ;;  %v4010_v18 = vsel %vm450_vm0, %v4009_v57, %v7530_v12  ;;  %v9189_v22 = vld [vmem:[#allocation10_spill] sm:$0xff]  ;;  %v4011_v40 = vshrl.u32 %v7511_v25, 16 }
 0x1a4   : > { %v1040_v47 = vpop.permute.xlu1 %1039  ;;  %v9190_v16 = vshrl.u32 %v9189_v22, 16 }
 0x1a5   : > { %v2526_v26 = vmax.f32 %v2472_v0, 0.0  ;;  %v2334_v5 = vor.u32 %v2333_v61, %v2329_v3  ;;  %3841 = vrot.lane.b32.xlu0 %v9186_v4, %s6031_s25  ;;  %v5900_v3 = vld [vmem:[%s6077_s23 + $0x48] sm:$0xf0]  ;;  %v5360_v61 = vld [vmem:[%s6077_s23 + $0x50] sm:$0x1]  ;;  %v3128_v4 = vshll.u32 %v7476_v33, 16 }
 0x1a6   : > { %3015 = vrot.lane.b32.xlu2 %v7476_v33, %s6030_s24 }
 0x1a7   : > { %v2549_v23 = vpack.c.bf16 %v2526_v26, %v2525_v50  ;;  %v656_v11 = vpop.permute.xlu0 %655  ;;  %v2338_v7 = vsel %vm450_vm0, %v2334_v5, %v2337_v62 }
 0x1a8   : > { %v7538_v13 = vpop.permute.xlu2 %1049  ;;  %v1073_v48 = vsel %vm1059_vm1, %v5956_v42, %v656_v11  ;;  %v1251_v36 = vpop.f32.mrf.mxu0  ;;  %2503 = vmatmul.bf16.gmra.mxu1 %v2338_v7 }
 0x1a9   : > { %2670 = vmatmul.bf16.gmra.mxu2 %v2549_v23  ;;  %v1106_v55 = vsel %vm1092_vm2, %v1073_v48, %v9187_v52  ;;  %v1252_v28 = vadd.f32 %v7564_v51, %v1251_v36 }
 0x1aa   : > { %4145 = vrot.lane.b32.xlu1 %v4010_v18, %s6032_s26  ;;  %v2474_v44 = vpop.f32.mrf.mxu1  ;;  %v1145_v35 = vsel %vm1125_vm3, %v1106_v55, %v1040_v47  ;;  %v5901_v47 = vld [vmem:[%s6077_s23 + $0x48] sm:$0xe]  ;;  %v3061_v18 = vunpack.c.l.b16 %v5360_v61  ;;  %v3126_v55 = vshrl.u32 %v7476_v33, 16  ;;  %v9194_v33 = vld [vmem:[#allocation52_spill] sm:$0xff] }
 0x1ab   : > { %1280 = vmatmul.bf16.gmra.mxu0 %v1145_v35  ;;  %v2475_v50 = vadd.f32 %v7564_v51, %v2474_v44  ;;  %v5902_v11 = vor.u32 %v5901_v47, %v5900_v3  ;;  %v1331_v7 = vmax.f32 %v1252_v28, 0.0  ;;  %v3130_v35 = vrot.slane %v3128_v4, 1  ;;  %v7593_v3 = vld [vmem:[%s6077_s23 + $0x48] sm:$0xff]  }
 0x1ac   : > { %v7552_v10 = vpop.permute.xlu1 %659  ;;  %v7554_v60 = vpop.f32.mrf.mxu2  ;;  %v7595_v61 = vpack.c.b16 %v3061_v18, %v3061_v18 }
 0x1ad   : > { %9188 = vst [vmem:[#allocation18_spill] sm:$0xff] %v7554_v60  ;;  %3843 = vrot.lane.b32.xlu0 %v9190_v16, %s6031_s25  ;;  %v2527_v36 = vmax.f32 %v2475_v50, 0.0  ;;  %v9193_v16 = vld [vmem:[#allocation54_spill] sm:$0xff]  ;;  %v4016_v47 = vshll.u32 %v5902_v11, 16 }
 0x1ae   : > { %3285 = vrot.lane.b32.xlu2 %v3124_v41, %s6032_s26  ;;  %v9192_v41 = vld [vmem:[#allocation14_spill] sm:$0xff]  ;;  %v3145_v6 = vshll.u32 %v7595_v61, 16 }
 0x1af   : > { %v1042_v57 = vpop.permute.xlu0 %1041  ;;  %v4018_v18 = vrot.slane %v4016_v47, 1 }
 0x1b0   : > { %v7567_v0 = vpop.permute.xlu2 %669  ;;  %v1253_v26 = vpop.f32.mrf.mxu0 }
 0x1b1   : > { %v1254_v62 = vadd.f32 %v7564_v51, %v1253_v26 }
 0x1b2   : > { %4147 = vrot.lane.b32.xlu1 %v4011_v40, %s6032_s26  ;;  %v2476_v5 = vpop.f32.mrf.mxu1  ;;  %v1075_v40 = vsel %vm1059_vm1, %v9193_v16, %v7471_v54  ;;  %v3131_v54 = vor.u32 %v3130_v35, %v3126_v55 }
 0x1b3   : > { %v2477_v23 = vadd.f32 %v7564_v51, %v2476_v5  ;;  %v1332_v21 = vmax.f32 %v1254_v62, 0.0  ;;  %v1108_v26 = vsel %vm1092_vm2, %v1075_v40, %v9194_v33  ;;  %v5646_v62 = vld [vmem:[%s8973_s3 + $0xf8] sm:$0xff] }
 0x1b4   : > { %v7580_v42 = vpop.permute.xlu1 %1045  ;;  %v7582_v48 = vpop.f32.mrf.mxu2  ;;  %v5630_v5 = vld [vmem:[%s8973_s3 + $0xb8] sm:$0xff]  ;;  %v1148_v4 = vsel %vm1125_vm3, %v1108_v26, %v1042_v57  ;;  %4816 = vmatpush.bf16.msrb.mxu3 %v5646_v62  ;;  %v3136_v35 = vsel %vm450_vm0, %v3131_v54, %v7530_v12 }
 0x1b5   : > { %9191 = vst [vmem:[#allocation22_spill] sm:$0xff] %v7582_v48  ;;  %v2528_v44 = vmax.f32 %v2477_v23, 0.0  ;;  %3899 = vrot.lane.b32.xlu0 %v7511_v25, %s6030_s24  ;;  %v1363_v52 = vpack.c.bf16 %v1332_v21, %v1331_v7  ;;  %v4014_v23 = vshrl.u32 %v5902_v11, 16  ;;  %3692 = vmatpush.bf16.msrb.mxu1 %v5630_v5  ;;  %v9197_v57 = vld [vmem:[#allocation13_spill] sm:$0xff]  ;;  %v5958_v5 = vld [vmem:[%s6077_s23 + $0x60] sm:$0xff]  }
 0x1b6   : > { %3845 = vrot.lane.b32.xlu2 %v9192_v41, %s6031_s25  ;;  %v9198_v55 = vshrl.u32 %v9197_v57, 16  ;;  %v7625_v41 = vrot.slane %v3145_v6, 1  ;;  %v7628_v40 = vld [vmem:[%s6077_s23 + $0x54] sm:$0xff]   ;;  %v5361_v62 = vld [vmem:[%s6077_s23 + $0x5c] sm:$0x1]  ;;  %v1077_v12 = vsel %vm1059_vm1, %v5958_v5, %v7552_v10 }
 0x1b7   : > { %v2550_v28 = vpack.c.bf16 %v2528_v44, %v2527_v36  ;;  %2767 = vmatmul.bf16.vlgmr.msra.gmra.mxu3 %v1363_v52  ;;  %v7597_v50 = vpop.permute.xlu0 %661  ;;  %v6009_v44 = vld [vmem:[%s6077_s23 + $0x54] sm:$0xe]  ;;  %v9196_v52 = vld [vmem:[#allocation50_spill] sm:$0xff]  ;;  %v4019_v16 = vor.u32 %v4018_v18, %v4014_v23  ;;  %v9200_v10 = vld [vmem:[#allocation57_spill] sm:$0xff] }
 0x1b8   : > { %v7599_v25 = vpop.permute.xlu2 %1055  ;;  %v5633_v5 = vld [vmem:[%s8971_s1 + $0xd0] sm:$0xff] }
 0x1b9   : > { %2675 = vmatmul.bf16.gmra.mxu2 %v2550_v28  ;;  %v6008_v28 = vld [vmem:[%s6077_s23 + $0x54] sm:$0xf0]  ;;  %v4020_v26 = vsel %vm450_vm0, %v4019_v16, %v7625_v41 }
 0x1ba   : > { %3017 = vrot.lane.b32.xlu1 %v7593_v3, %s6030_s24  ;;  %v6010_v23 = vor.u32 %v6009_v44, %v6008_v28  ;;  %4619 = vmatpush.bf16.msrb.mxu2 %v5633_v5 }
 0x1bb   : > { %1285 = vmatmul.bf16.gmra.mxu0 %v1148_v4 }
 0x1bc   : > { %v7613_v7 = vpop.permute.xlu1 %665  ;;  %v7615_v21 = vpop.f32.mrf.mxu2  ;;  %v4024_v5 = vshrl.u32 %v6010_v23, 16 }
 0x1bd   : > { %9195 = vst [vmem:[#allocation29_spill] sm:$0xff] %v7615_v21  ;;  %v2479_v36 = vpop.f32.mrf.mxu1  ;;  %2903 = vrot.lane.b32.xlu0 %v9196_v52, %s6031_s25  ;;  %v4021_v21 = vshrl.u32 %v7595_v61, 16 }
 0x1be   : > { %3847 = vrot.lane.b32.xlu2 %v9198_v55, %s6031_s25  ;;  %v1256_v11 = vpop.f32.mrf.mxu0  ;;  %v2480_v54 = vadd.f32 %v7564_v51, %v2479_v36  ;;  %v1110_v36 = vsel %vm1092_vm2, %v1077_v12, %v9200_v10  ;;  %v9201_v12 = vld [vmem:[#allocation17_spill] sm:$0xff] }
 0x1bf   : > { %v7631_v47 = vpop.permute.xlu0 %1047  ;;  %v1257_v52 = vadd.f32 %v7564_v51, %v1256_v11 }
 0x1c0   : > { %v7633_v33 = vpop.permute.xlu2 %3829  ;;  %v2529_v44 = vmax.f32 %v2480_v54, 0.0  ;;  %v1151_v54 = vsel %vm1125_vm3, %v1110_v36, %v7501_v49 }
 0x1c2   : > { %3287 = vrot.lane.b32.xlu1 %v3136_v35, %s6032_s26  ;;  %v3062_v35 = vunpack.c.l.b16 %v5361_v62  ;;  %v1333_v62 = vmax.f32 %v1257_v52, 0.0 }
 0x1c4   : > { %v7643_v4 = vpop.permute.xlu1 %1051  ;;  %v7645_v6 = vpop.f32.mrf.mxu2  ;;  %v7665_v60 = vpack.c.b16 %v3062_v35, %v3062_v35  ;;  %v3140_v35 = vshll.u32 %v7593_v3, 16 }
 0x1c5   : > { %9199 = vst [vmem:[#allocation31_spill] sm:$0xff] %v7645_v6  ;;  %v2481_v18 = vpop.f32.mrf.mxu1  ;;  %4149 = vrot.lane.b32.xlu0 %v4020_v26, %s6032_s26  ;;  %v4026_v26 = vshll.u32 %v6010_v23, 16  ;;  %v9203_v23 = vld [vmem:[#allocation58_spill] sm:$0xff] }
 0x1c6   : > { %v2482_v55 = vadd.f32 %v7564_v51, %v2481_v18  ;;  %3901 = vrot.lane.b32.xlu2 %v7595_v61, %s6030_s24  ;;  %v1258_v16 = vpop.f32.mrf.mxu0  ;;  %v3157_v61 = vshll.u32 %v7665_v60, 16 }
 0x1c7   : > { %v1259_v11 = vadd.f32 %v7564_v51, %v1258_v16  ;;  %v7658_v6 = vpop.permute.xlu0 %667  ;;  %v4028_v52 = vrot.slane %v4026_v26, 1  ;;  %v5617_v26 = vld [vmem:[%s8971_s1 + $0x90] sm:$0xff] }
 0x1c8   : > { %v2530_v28 = vmax.f32 %v2482_v55, 0.0  ;;  %v7660_v18 = vpop.permute.xlu2 %4133  ;;  %3495 = vmatpush.bf16.msrb.mxu0 %v5617_v26 }
 0x1c9   : > { %v1334_v48 = vmax.f32 %v1259_v11, 0.0  ;;  %v1087_v11 = vsel %vm1059_vm1, %v7194_v31, %v7567_v0 }
 0x1ca   : > { %3849 = vrot.lane.b32.xlu1 %v9201_v12, %s6031_s25  ;;  %v2551_v10 = vpack.c.bf16 %v2530_v28, %v2529_v44  ;;  %v3142_v28 = vrot.slane %v3140_v35, 1 }
 0x1cb   : > { %1290 = vmatmul.bf16.gmra.mxu0 %v1151_v54  ;;  %v1364_v63 = vpack.c.bf16 %v1334_v48, %v1333_v62  ;;  %v9204_v62 = vld [vmem:[#allocation15_spill] sm:$0xff] }
 0x1cc   : > { %v672_v55 = vpop.permute.xlu1 %671  ;;  %v7669_v16 = vpop.f32.mrf.mxu2  ;;  %2680 = vmatmul.bf16.gmra.mxu2 %v2551_v10  ;;  %v9205_v12 = vshrl.u32 %v9204_v62, 16  ;;  %v1079_v10 = vsel %vm1059_vm1, %v7027_v32, %v7597_v50  ;;  %v5362_v54 = vld [vmem:[%s6077_s23 + $0x68] sm:$0x1] }
 0x1cd   : > { %9202 = vst [vmem:[#allocation26_spill] sm:$0xff] %v7669_v16  ;;  %v1089_v44 = vsel %vm1059_vm1, %v7420_v1, %v672_v55  ;;  %4151 = vrot.lane.b32.xlu0 %v4021_v21, %s6032_s26  ;;  %2772 = vmatmul.bf16.gmra.mxu3 %v1364_v63  ;;  %v7689_v1 = vrot.slane %v3157_v61, 1  ;;  %v4029_v63 = vor.u32 %v4028_v52, %v4024_v5  ;;  %v5903_v61 = vld [vmem:[%s6077_s23 + $0x60] sm:$0xf0]  ;;  %v5904_v5 = vld [vmem:[%s6077_s23 + $0x60] sm:$0xe]  ;;  %v3063_v50 = vunpack.c.l.b16 %v5362_v54 }
 0x1ce   : > { %v1122_v49 = vsel %vm1092_vm2, %v1089_v44, %v7329_v15  ;;  %v1261_v48 = vpop.f32.mrf.mxu0  ;;  %2905 = vrot.lane.b32.xlu2 %v9203_v23, %s6031_s25  ;;  %v1120_v21 = vsel %vm1092_vm2, %v1087_v11, %v7363_v37  ;;  %v3138_v15 = vshrl.u32 %v7593_v3, 16  ;;  %v9207_v44 = vld [vmem:[#allocation60_spill] sm:$0xff]  ;;  %v5905_v23 = vor.u32 %v5904_v5, %v5903_v61 }
 0x1cf   : > { %v7685_v36 = vsel %vm1125_vm3, %v1122_v49, %v7599_v25  ;;  %v1054_v31 = vpop.permute.xlu0 %1053  ;;  %v4030_v55 = vsel %vm450_vm0, %v4029_v63, %v7689_v1  ;;  %v1262_v35 = vadd.f32 %v7564_v51, %v1261_v48  ;;  %v1112_v32 = vsel %vm1092_vm2, %v1079_v10, %v9207_v44 }
 0x1d0   : > { %v7687_v0 = vpop.permute.xlu2 %3833  ;;  %v7698_v25 = vsel %vm1125_vm3, %v1120_v21, %v1054_v31  ;;  %v3143_v52 = vor.u32 %v3142_v28, %v3138_v15  ;;  %v5645_v15 = vld [vmem:[%s8973_s3 + $0xf0] sm:$0xff]  ;;  %v1154_v28 = vsel %vm1125_vm3, %v1112_v32, %v7580_v42  ;;  %v7731_v54 = vpack.c.b16 %v3063_v50, %v3063_v50  ;;  %v9209_v50 = vld [vmem:[#allocation2_spill] sm:$0xff] }
 0x1d1   : > { %4817 = vmatpush.bf16.msrb.mxu3 %v5645_v15  ;;  %v4031_v5 = vshrl.u32 %v7665_v60, 16 }
 0x1d2   : > { %3851 = vrot.lane.b32.xlu1 %v9205_v12, %s6031_s25  ;;  %v3148_v26 = vsel %vm450_vm0, %v3143_v52, %v7625_v41  ;;  %v1335_v12 = vmax.f32 %v1262_v35, 0.0 }
 0x1d3   : > { %v2484_v3 = vpop.f32.mrf.mxu1 }
 0x1d4   : > { %v1058_v37 = vpop.permute.xlu1 %1057  ;;  %v7711_v11 = vpop.f32.mrf.mxu2  ;;  %v2485_v61 = vadd.f32 %v7564_v51, %v2484_v3  ;;  %v5629_v3 = vld [vmem:[%s8973_s3 + $0xb0] sm:$0xff] }
 0x1d5   : > { %9206 = vst [vmem:[#allocation24_spill] sm:$0xff] %v7711_v11  ;;  %3019 = vrot.lane.b32.xlu0 %v7628_v40, %s6030_s24  ;;  %3693 = vmatpush.bf16.msrb.mxu1 %v5629_v3 }
 0x1d6   : > { %v1263_v49 = vpop.f32.mrf.mxu0  ;;  %4153 = vrot.lane.b32.xlu2 %v4030_v55, %s6032_s26 }
 0x1d7   : > { %v1264_v31 = vadd.f32 %v7564_v51, %v1263_v49  ;;  %v674_v63 = vpop.permute.xlu0 %673  ;;  %v2531_v49 = vmax.f32 %v2485_v61, 0.0 }
 0x1d8   : > { %v3836_v21 = vpop.permute.xlu2 %3835  ;;  %v1091_v48 = vsel %vm1059_vm1, %v6949_v39, %v674_v63  ;;  %v4036_v39 = vshll.u32 %v5905_v23, 16  ;;  %v4034_v63 = vshrl.u32 %v5905_v23, 16 }
 0x1d9   : > { %v1336_v10 = vmax.f32 %v1264_v31, 0.0  ;;  %v1124_v55 = vsel %vm1092_vm2, %v1091_v48, %v7495_v58  ;;  %v4198_v58 = vsel %vm1059_vm1, %v9209_v50, %v7633_v33 }
 0x1da   : > { %3903 = vrot.lane.b32.xlu1 %v7665_v60, %s6030_s24  ;;  %v7738_v42 = vsel %vm1125_vm3, %v1124_v55, %v1058_v37  ;;  %v4204_v60 = vsel %vm1059_vm1, %v9175_v8, %v3836_v21  ;;  %v3169_v37 = vshll.u32 %v7731_v54, 16  ;;  %v4038_v15 = vrot.slane %v4036_v39, 1 }
 0x1db   : > { %1295 = vmatmul.bf16.gmra.mxu0 %v1154_v28  ;;  %v2486_v52 = vpop.f32.mrf.mxu1  ;;  %v1365_v35 = vpack.c.bf16 %v1336_v10, %v1335_v12  ;;  %v3152_v8 = vshll.u32 %v7628_v40, 16  ;;  %v9210_v12 = vld [vmem:[#allocation62_spill] sm:$0xff] }
 0x1dc   : > { %v3832_v41 = vpop.permute.xlu1 %3831  ;;  %v2487_v44 = vadd.f32 %v7564_v51, %v2486_v52  ;;  %v7741_v32 = vpop.f32.mrf.mxu2  ;;  %v7766_v10 = vrot.slane %v3169_v37, 1  ;;  %v4039_v55 = vor.u32 %v4038_v15, %v4034_v63  ;;  %v3150_v52 = vshrl.u32 %v7628_v40, 16  ;;  %v9212_v37 = vld [vmem:[#allocation21_spill] sm:$0xff] }
 0x1dd   : > { %9208 = vst [vmem:[#allocation34_spill] sm:$0xff] %v7741_v32  ;;  %3289 = vrot.lane.b32.xlu0 %v3148_v26, %s6032_s26  ;;  %2777 = vmatmul.bf16.gmra.mxu3 %v1365_v35  ;;  %v3154_v35 = vrot.slane %v3152_v8, 1  ;;  %v9213_v8 = vld [vmem:[#allocation20_spill] sm:$0xff] }
 0x1de   : > { %v2532_v31 = vmax.f32 %v2487_v44, 0.0  ;;  %4155 = vrot.lane.b32.xlu2 %v4031_v5, %s6032_s26  ;;  %v7769_v5 = vld [vmem:[%s6077_s23 + $0x60] sm:$0xff]  }
 0x1df   : > { %v7754_v33 = vpop.permute.xlu0 %3009 }
 0x1e0   : > { %v3896_v48 = vpop.permute.xlu2 %3895  ;;  %v4261_v21 = vsel %vm1092_vm2, %v4198_v58, %v7754_v33  ;;  %v2552_v28 = vpack.c.bf16 %v2532_v31, %v2531_v49  ;;  %v5959_v58 = vld [vmem:[%s6077_s23 + $0x78] sm:$0xff]   ;;  %v4040_v49 = vsel %vm450_vm0, %v4039_v55, %v7766_v10 }
 0x1e1   : > { %v7760_v26 = vsel %vm1092_vm2, %v4204_v60, %v3896_v48  ;;  %v4310_v23 = vsel %vm1125_vm3, %v4261_v21, %v7660_v18  ;;  %v1081_v18 = vsel %vm1059_vm1, %v5959_v58, %v7521_v2  ;;  %v4200_v60 = vsel %vm1059_vm1, %v9170_v45, %v3832_v41  ;;  %v5632_v45 = vld [vmem:[%s8971_s1 + $0xc8] sm:$0xff] }
 0x1e2   : > { %2907 = vrot.lane.b32.xlu1 %v9210_v12, %s6031_s25  ;;  %2685 = vmatmul.bf16.gmra.mxu2 %v2552_v28  ;;  %v4375_v61 = vshll.u32 %v4310_v23, 16  ;;  %v4373_v40 = vshrl.u32 %v4310_v23, 16  ;;  %v3155_v48 = vor.u32 %v3154_v35, %v3150_v52  ;;  %v1114_v21 = vsel %vm1092_vm2, %v1081_v18, %v9213_v8  ;;  %v5960_v28 = vld [vmem:[%s6077_s23 + $0x18] sm:$0xff]   ;;  %v6012_v18 = vld [vmem:[%s6077_s23 + $0x6c] sm:$0xe] }
 0x1e3   : > { %v4202_v12 = vsel %vm1059_vm1, %v5960_v28, %v7687_v0  ;;  %4620 = vmatpush.bf16.msrb.mxu2 %v5632_v45  ;;  %v1157_v52 = vsel %vm1125_vm3, %v1114_v21, %v7631_v47  ;;  %v9215_v47 = vld [vmem:[#allocation19_spill] sm:$0xff] }
 0x1e4   : > { %v4136_v39 = vpop.permute.xlu1 %4135  ;;  %v7772_v44 = vpop.f32.mrf.mxu2  ;;  %v4377_v31 = vrot.slane %v4375_v61, 1  ;;  %v3160_v0 = vsel %vm450_vm0, %v3155_v48, %v7689_v1  ;;  %v7814_v45 = vld [vmem:[%s6077_s23 + $0x6c] sm:$0xff]  }
 0x1e5   : > { %9211 = vst [vmem:[#allocation4_spill] sm:$0xff] %v7772_v44  ;;  %3853 = vrot.lane.b32.xlu0 %v9212_v37, %s6031_s25  ;;  %v2489_v3 = vpop.f32.mrf.mxu1  ;;  %v6011_v1 = vld [vmem:[%s6077_s23 + $0x6c] sm:$0xf0] }
 0x1e6   : > { %3021 = vrot.lane.b32.xlu2 %v7769_v5, %s6030_s24  ;;  %v4378_v35 = vor.u32 %v4377_v31, %v4373_v40  ;;  %v9216_v40 = vshrl.u32 %v9215_v47, 16 }
 0x1e7   : > { %v3894_v63 = vpop.permute.xlu0 %3893 }
 0x1e8   : > { %v2900_v15 = vpop.permute.xlu2 %2899  ;;  %v4263_v2 = vsel %vm1092_vm2, %v4200_v60, %v3894_v63  ;;  %v1266_v41 = vpop.f32.mrf.mxu0 }
 0x1e9   : > { %v4312_v23 = vsel %vm1125_vm3, %v4263_v2, %v4136_v39  ;;  %v3316_v55 = vsel %vm1059_vm1, %v5960_v28, %v2900_v15  ;;  %v2490_v39 = vadd.f32 %v7564_v51, %v2489_v3  ;;  %v4041_v15 = vshrl.u32 %v7731_v54, 16  ;;  %v5363_v28 = vld [vmem:[%s6077_s23 + $0x74] sm:$0x1] }
 0x1ea   : > { %4157 = vrot.lane.b32.xlu1 %v4040_v49, %s6032_s26  ;;  %v4379_v61 = vshll.u32 %v4312_v23, 16  ;;  %v1267_v2 = vadd.f32 %v7564_v51, %v1266_v41 }
 0x1eb   : > { %1300 = vmatmul.bf16.gmra.mxu0 %v1157_v52  ;;  %v1083_v52 = vsel %vm1059_vm1, %v7147_v38, %v7613_v7 }
 0x1ec   : > { %v3012_v58 = vpop.permute.xlu1 %3011  ;;  %v4381_v60 = vrot.slane %v4379_v61, 1  ;;  %v7804_v49 = vpop.f32.mrf.mxu2 }
 0x1ed   : > { %v4264_v37 = vsel %vm1092_vm2, %v4202_v12, %v3012_v58  ;;  %9214 = vst [vmem:[#allocation3_spill] sm:$0xff] %v7804_v49  ;;  %v7807_v63 = vsel %vm1092_vm2, %v3316_v55, %v3012_v58  ;;  %3855 = vrot.lane.b32.xlu0 %v9216_v40, %s6031_s25  ;;  %v2491_v31 = vpop.f32.mrf.mxu1  ;;  %v2533_v12 = vmax.f32 %v2490_v39, 0.0  ;;  %v1337_v40 = vmax.f32 %v1267_v2, 0.0  ;;  %v9218_v2 = vld [vmem:[#allocation28_spill] sm:$0xff] }
 0x1ee   : > { %v2492_v3 = vadd.f32 %v7564_v51, %v2491_v31  ;;  %3291 = vrot.lane.b32.xlu2 %v3160_v0, %s6032_s26  ;;  %v7820_v48 = vsel %vm450_vm0, %v4378_v35, %v4381_v60  ;;  %v5616_v35 = vld [vmem:[%s8971_s1 + $0x88] sm:$0xff]  ;;  %v3164_v0 = vshll.u32 %v7769_v5, 16  ;;  %v3064_v60 = vunpack.c.l.b16 %v5363_v28 }
 0x1ef   : > { %v2898_v8 = vpop.permute.xlu0 %2897  ;;  %3496 = vmatpush.bf16.msrb.mxu0 %v5616_v35 }
 0x1f0   : > { %v7823_v21 = vpop.permute.xlu2 %4141  ;;  %v2534_v23 = vmax.f32 %v2492_v3, 0.0  ;;  %v3314_v55 = vsel %vm1059_vm1, %v9209_v50, %v2898_v8  ;;  %v1268_v61 = vpop.f32.mrf.mxu0  ;;  %v6013_v50 = vor.u32 %v6012_v18, %v6011_v1  ;;  %v3162_v18 = vshrl.u32 %v7769_v5, 16  ;;  %v5628_v5 = vld [vmem:[%s8973_s3 + $0xa8] sm:$0xff] }
 0x1f1   : > { %v1269_v58 = vadd.f32 %v7564_v51, %v1268_v61  ;;  %v3346_v41 = vsel %vm1092_vm2, %v3314_v55, %v7754_v33  ;;  %v3166_v1 = vrot.slane %v3164_v0, 1  ;;  %v7851_v8 = vpack.c.b16 %v3064_v60, %v3064_v60  ;;  %3694 = vmatpush.bf16.msrb.mxu1 %v5628_v5 }
 0x1f2   : > { %4159 = vrot.lane.b32.xlu1 %v4041_v15, %s6032_s26  ;;  %v2553_v39 = vpack.c.bf16 %v2534_v23, %v2533_v12  ;;  %v1116_v15 = vsel %vm1092_vm2, %v1083_v52, %v7083_v34  ;;  %v4046_v28 = vshll.u32 %v6013_v50, 16 }
 0x1f3   : > { %v1338_v31 = vmax.f32 %v1269_v58, 0.0  ;;  %v1160_v34 = vsel %vm1125_vm3, %v1116_v15, %v7538_v13  ;;  %v3167_v61 = vor.u32 %v3166_v1, %v3162_v18  ;;  %v3181_v52 = vshll.u32 %v7851_v8, 16 }
 0x1f4   : > { %v3282_v3 = vpop.permute.xlu1 %3281  ;;  %v7842_v7 = vpop.f32.mrf.mxu2  ;;  %2690 = vmatmul.bf16.gmra.mxu2 %v2553_v39  ;;  %v4044_v58 = vshrl.u32 %v6013_v50, 16 }
 0x1f5   : > { %v7840_v38 = vsel %vm1125_vm3, %v3346_v41, %v3282_v3  ;;  %9217 = vst [vmem:[#allocation38_spill] sm:$0xff] %v7842_v7  ;;  %3905 = vrot.lane.b32.xlu0 %v7731_v54, %s6030_s24  ;;  %v1366_v33 = vpack.c.bf16 %v1338_v31, %v1337_v40  ;;  %v5644_v54 = vld [vmem:[%s8973_s3 + $0xe8] sm:$0xff]  ;;  %v4048_v41 = vrot.slane %v4046_v28, 1  ;;  %v3172_v50 = vsel %vm450_vm0, %v3167_v61, %v7766_v10  ;;  %v5364_v10 = vld [vmem:[%s6077_s23 + $0x80] sm:$0x1] }
 0x1f6   : > { %3857 = vrot.lane.b32.xlu2 %v9218_v2, %s6031_s25  ;;  %4818 = vmatpush.bf16.msrb.mxu3 %v5644_v54  ;;  %v7873_v60 = vrot.slane %v3181_v52, 1  ;;  %v9220_v31 = vld [vmem:[#allocation23_spill] sm:$0xff]  ;;  %v5907_v2 = vld [vmem:[%s6077_s23 + $0x78] sm:$0xe] }
 0x1f7   : > { %2782 = vmatmul.bf16.gmra.mxu3 %v1366_v33  ;;  %v4138_v12 = vpop.permute.xlu0 %4137  ;;  %v4049_v40 = vor.u32 %v4048_v41, %v4044_v58  ;;  %v9221_v3 = vshrl.u32 %v9220_v31, 16 }
 0x1f8   : > { %v7853_v23 = vpop.permute.xlu2 %4143  ;;  %v4314_v55 = vsel %vm1125_vm3, %v4264_v37, %v4138_v12 }
 0x1f9   : > { %v4385_v37 = vshll.u32 %v4314_v55, 16  ;;  %v4383_v28 = vshrl.u32 %v4314_v55, 16  ;;  %v4050_v5 = vsel %vm450_vm0, %v4049_v40, %v7873_v60 }
 0x1fa   : > { %3023 = vrot.lane.b32.xlu1 %v7814_v45, %s6030_s24 }
 0x1fb   : > { %1305 = vmatmul.bf16.gmra.mxu0 %v1160_v34  ;;  %v4387_v33 = vrot.slane %v4385_v37, 1  ;;  %v5961_v34 = vld [vmem:[%s6077_s23 + $0x90] sm:$0xff]  }
 0x1fc   : > { %v3838_v35 = vpop.permute.xlu1 %3837  ;;  %v7867_v13 = vpop.f32.mrf.mxu2  ;;  %v1085_v54 = vsel %vm1059_vm1, %v5961_v34, %v7658_v6  ;;  %v9223_v6 = vld [vmem:[#allocation6_spill] sm:$0xff] }
 0x1fd   : > { %9219 = vst [vmem:[#allocation7_spill] sm:$0xff] %v7867_v13  ;;  %v2494_v0 = vpop.f32.mrf.mxu1  ;;  %2909 = vrot.lane.b32.xlu0 %v7115_v43, %s6031_s25  ;;  %v5906_v43 = vld [vmem:[%s6077_s23 + $0x78] sm:$0xf0]  ;;  %v4388_v61 = vor.u32 %v4387_v33, %v4383_v28 }
 0x1fe   : > { %v1271_v39 = vpop.f32.mrf.mxu0  ;;  %3859 = vrot.lane.b32.xlu2 %v9221_v3, %s6031_s25  ;;  %v2495_v52 = vadd.f32 %v7564_v51, %v2494_v0 }
 0x1ff   : > { %v4140_v15 = vpop.permute.xlu0 %4139  ;;  %v1272_v37 = vadd.f32 %v7564_v51, %v1271_v39  ;;  %v1118_v39 = vsel %vm1092_vm2, %v1085_v54, %v7270_v20 }
 0x200   : > { %v7878_v18 = vpop.permute.xlu2 %3015  ;;  %v4316_v1 = vsel %vm1125_vm3, %v7760_v26, %v4140_v15  ;;  %v5908_v26 = vor.u32 %v5907_v2, %v5906_v43  ;;  %v5631_v15 = vld [vmem:[%s8971_s1 + $0xc0] sm:$0xff]  ;;  %v2535_v43 = vmax.f32 %v2495_v52, 0.0 }
 0x201   : > { %v4389_v12 = vshll.u32 %v4316_v1, 16  ;;  %v4206_v1 = vsel %vm1059_vm1, %v9223_v6, %v3838_v35  ;;  %4621 = vmatpush.bf16.msrb.mxu2 %v5631_v15  ;;  %v1339_v34 = vmax.f32 %v1272_v37, 0.0  ;;  %v1163_v37 = vsel %vm1125_vm3, %v1118_v39, %v7643_v4 }
 0x202   : > { %3293 = vrot.lane.b32.xlu1 %v3172_v50, %s6032_s26  ;;  %v3065_v50 = vunpack.c.l.b16 %v5364_v10  ;;  %v4056_v10 = vshll.u32 %v5908_v26, 16 }
 0x203   : > { %v4391_v58 = vrot.slane %v4389_v12, 1 }
 0x204   : > { %v3840_v41 = vpop.permute.xlu1 %3839  ;;  %v7893_v55 = vpop.f32.mrf.mxu2 }
 0x205   : > { %9222 = vst [vmem:[#allocation36_spill] sm:$0xff] %v7893_v55  ;;  %v2496_v3 = vpop.f32.mrf.mxu1  ;;  %4161 = vrot.lane.b32.xlu0 %v4050_v5, %s6032_s26  ;;  %v7903_v0 = vsel %vm450_vm0, %v4388_v61, %v4391_v58  ;;  %v4051_v61 = vshrl.u32 %v7851_v8, 16  ;;  %v7912_v58 = vpack.c.b16 %v3065_v50, %v3065_v50  ;;  %v4208_v20 = vsel %vm1059_vm1, %v9182_v9, %v3840_v41 }
 0x206   : > { %v2497_v40 = vadd.f32 %v7564_v51, %v2496_v3  ;;  %v1273_v33 = vpop.f32.mrf.mxu0  ;;  %3907 = vrot.lane.b32.xlu2 %v7851_v8, %s6030_s24  ;;  %v9224_v3 = vld [vmem:[#allocation32_spill] sm:$0xff]  ;;  %v4058_v9 = vrot.slane %v4056_v10, 1 }
 0x207   : > { %v1274_v28 = vadd.f32 %v7564_v51, %v1273_v33  ;;  %v3014_v35 = vpop.permute.xlu0 %3013  ;;  %v3193_v50 = vshll.u32 %v7912_v58, 16  ;;  %v4054_v33 = vshrl.u32 %v5908_v26, 16  ;;  %v3176_v26 = vshll.u32 %v7814_v45, 16 }
 0x208   : > { %v2536_v2 = vmax.f32 %v2497_v40, 0.0  ;;  %v3286_v12 = vpop.permute.xlu2 %3285  ;;  %v4267_v5 = vsel %vm1092_vm2, %v4206_v1, %v3014_v35 }
 0x209   : > { %v1340_v54 = vmax.f32 %v1274_v28, 0.0  ;;  %v4318_v52 = vsel %vm1125_vm3, %v4267_v5, %v7823_v21  ;;  %v7934_v5 = vrot.slane %v3193_v50, 1  ;;  %v3178_v50 = vrot.slane %v3176_v26, 1 }
 0x20a   : > { %3861 = vrot.lane.b32.xlu1 %v9224_v3, %s6031_s25  ;;  %v2554_v15 = vpack.c.bf16 %v2536_v2, %v2535_v43  ;;  %v4395_v40 = vshll.u32 %v4318_v52, 16  ;;  %v4393_v4 = vshrl.u32 %v4318_v52, 16  ;;  %v5615_v3 = vld [vmem:[%s8971_s1 + $0x80] sm:$0xff] }
 0x20b   : > { %1310 = vmatmul.bf16.gmra.mxu0 %v1163_v37  ;;  %v1367_v8 = vpack.c.bf16 %v1340_v54, %v1339_v34  ;;  %v6015_v54 = vld [vmem:[%s6077_s23 + $0x84] sm:$0xe]  ;;  %v3174_v37 = vshrl.u32 %v7814_v45, 16 }
 0x20c   : > { %v3898_v1 = vpop.permute.xlu1 %3897  ;;  %2695 = vmatmul.bf16.gmra.mxu2 %v2554_v15  ;;  %v4397_v41 = vrot.slane %v4395_v40, 1  ;;  %v7927_v2 = vpop.f32.mrf.mxu2  ;;  %3497 = vmatpush.bf16.msrb.mxu0 %v5615_v3 }
 0x20d   : > { %v4269_v21 = vsel %vm1092_vm2, %v4208_v20, %v3898_v1  ;;  %4163 = vrot.lane.b32.xlu0 %v4051_v61, %s6032_s26  ;;  %2787 = vmatmul.bf16.gmra.mxu3 %v1367_v8  ;;  %9225 = vst [vmem:[#allocation5_spill] sm:$0xff] %v7927_v2  ;;  %v7937_v61 = vld [vmem:[%s6077_s23 + $0x84] sm:$0xff]   ;;  %v7953_v8 = vld [vmem:[%s6077_s23 + $0x78] sm:$0xff]  }
 0x20e   : > { %v4320_v43 = vsel %vm1125_vm3, %v4269_v21, %v7853_v23  ;;  %v1276_v28 = vpop.f32.mrf.mxu0  ;;  %2911 = vrot.lane.b32.xlu2 %v7165_v24, %s6031_s25  ;;  %v4059_v23 = vor.u32 %v4058_v9, %v4054_v33  ;;  %v6014_v20 = vld [vmem:[%s6077_s23 + $0x84] sm:$0xf0]  ;;  %v4398_v15 = vor.u32 %v4397_v41, %v4393_v4  ;;  %v9226_v24 = vld [vmem:[#allocation30_spill] sm:$0xff]  ;;  %v5365_v33 = vld [vmem:[%s6077_s23 + $0x8c] sm:$0x1] }
 0x20f   : > { %v4399_v39 = vshll.u32 %v4320_v43, 16  ;;  %v3284_v10 = vpop.permute.xlu0 %3283  ;;  %v9227_v40 = vshrl.u32 %v9226_v24, 16  ;;  %v3066_v4 = vunpack.c.l.b16 %v5365_v33 }
 0x210   : > { %v7932_v34 = vpop.permute.xlu2 %3845  ;;  %v7950_v1 = vsel %vm1125_vm3, %v7807_v63, %v3284_v10  ;;  %v4060_v43 = vsel %vm450_vm0, %v4059_v23, %v7934_v5  ;;  %v1277_v63 = vadd.f32 %v7564_v51, %v1276_v28  ;;  %v3179_v10 = vor.u32 %v3178_v50, %v3174_v37  ;;  %v5643_v28 = vld [vmem:[%s8973_s3 + $0xe0] sm:$0xff] }
 0x211   : > { %v4401_v52 = vrot.slane %v4399_v39, 1  ;;  %4819 = vmatpush.bf16.msrb.mxu3 %v5643_v28 }
 0x212   : > { %3863 = vrot.lane.b32.xlu1 %v9227_v40, %s6031_s25  ;;  %v7978_v40 = vld [vmem:[%s6077_s23 + $0x30] sm:$0xff]   ;;  %v1341_v37 = vmax.f32 %v1277_v63, 0.0 }
 0x213   : > { %v7957_v9 = vsel %vm450_vm0, %v4398_v15, %v4401_v52  ;;  %v2499_v41 = vpop.f32.mrf.mxu1  ;;  %v6016_v52 = vor.u32 %v6015_v54, %v6014_v20  ;;  %v7988_v54 = vpack.c.b16 %v3066_v4, %v3066_v4 }
 0x214   : > { %v2902_v21 = vpop.permute.xlu1 %2901  ;;  %v7982_v50 = vpop.f32.mrf.mxu2  ;;  %v2500_v33 = vadd.f32 %v7564_v51, %v2499_v41 }
 0x215   : > { %v3318_v45 = vsel %vm1059_vm1, %v9223_v6, %v2902_v21  ;;  %3025 = vrot.lane.b32.xlu0 %v7953_v8, %s6030_s24  ;;  %9228 = vst [vmem:[#allocation41_spill] sm:$0xff] %v7982_v50  ;;  %v3184_v21 = vsel %vm450_vm0, %v3179_v10, %v7873_v60  ;;  %v3205_v41 = vshll.u32 %v7988_v54, 16  ;;  %v4064_v4 = vshrl.u32 %v6016_v52, 16  ;;  %v5627_v60 = vld [vmem:[%s8973_s3 + $0xa0] sm:$0xff] }
 0x216   : > { %v3350_v39 = vsel %vm1092_vm2, %v3318_v45, %v3014_v35  ;;  %v1278_v26 = vpop.f32.mrf.mxu0  ;;  %4165 = vrot.lane.b32.xlu2 %v4060_v43, %s6032_s26  ;;  %v4066_v43 = vshll.u32 %v6016_v52, 16  ;;  %v4061_v45 = vshrl.u32 %v7912_v58, 16  ;;  %3695 = vmatpush.bf16.msrb.mxu1 %v5627_v60 }
 0x217   : > { %v7969_v3 = vsel %vm1125_vm3, %v3350_v39, %v3286_v12  ;;  %v1279_v23 = vadd.f32 %v7564_v51, %v1278_v26  ;;  %v3842_v15 = vpop.permute.xlu0 %3841  ;;  %v8008_v52 = vrot.slane %v3205_v41, 1 }
 0x218   : > { %v7972_v6 = vpop.permute.xlu2 %3847  ;;  %v4210_v35 = vsel %vm1059_vm1, %v7978_v40, %v3842_v15  ;;  %v4068_v28 = vrot.slane %v4066_v43, 1 }
 0x219   : > { %v1342_v20 = vmax.f32 %v1279_v23, 0.0  ;;  %v4270_v12 = vsel %vm1092_vm2, %v4210_v35, %v7878_v18 }
 0x21a   : > { %3909 = vrot.lane.b32.xlu1 %v7912_v58, %s6030_s24  ;;  %v2537_v58 = vmax.f32 %v2500_v33, 0.0  ;;  %v3186_v33 = vshrl.u32 %v7953_v8, 16 }
 0x21b   : > { %1315 = vmatmul.bf16.gmra.mxu0 %v7698_v25  ;;  %v2501_v39 = vpop.f32.mrf.mxu1  ;;  %v1368_v26 = vpack.c.bf16 %v1342_v20, %v1341_v37  ;;  %v3188_v25 = vshll.u32 %v7953_v8, 16 }
 0x21c   : > { %v4146_v63 = vpop.permute.xlu1 %4145  ;;  %v2502_v15 = vadd.f32 %v7564_v51, %v2501_v39  ;;  %v8011_v43 = vpop.f32.mrf.mxu2 }
 0x21d   : > { %v4322_v23 = vsel %vm1125_vm3, %v4270_v12, %v4146_v63  ;;  %3295 = vrot.lane.b32.xlu0 %v3184_v21, %s6032_s26  ;;  %2792 = vmatmul.bf16.gmra.mxu3 %v1368_v26  ;;  %v4069_v12 = vor.u32 %v4068_v28, %v4064_v4  ;;  %v3190_v21 = vrot.slane %v3188_v25, 1  ;;  %9229 = vst [vmem:[#allocation9_spill] sm:$0xff] %v8011_v43  ;;  %v9230_v26 = vld [vmem:[#allocation35_spill] sm:$0xff] }
 0x21e   : > { %v2538_v10 = vmax.f32 %v2502_v15, 0.0  ;;  %4167 = vrot.lane.b32.xlu2 %v4061_v45, %s6032_s26  ;;  %v4405_v63 = vshll.u32 %v4322_v23, 16  ;;  %v4403_v4 = vshrl.u32 %v4322_v23, 16 }
 0x21f   : > { %v3844_v35 = vpop.permute.xlu0 %3843  ;;  %v3191_v41 = vor.u32 %v3190_v21, %v3186_v33 }
 0x220   : > { %v8004_v37 = vpop.permute.xlu2 %3901  ;;  %v2555_v20 = vpack.c.bf16 %v2538_v10, %v2537_v58  ;;  %v4212_v39 = vsel %vm1059_vm1, %v9189_v22, %v3844_v35  ;;  %v4407_v60 = vrot.slane %v4405_v63, 1  ;;  %v9231_v22 = vld [vmem:[#allocation11_spill] sm:$0xff] }
 0x221   : > { %v4214_v25 = vsel %vm1059_vm1, %v9231_v22, %v7932_v34  ;;  %v3196_v23 = vsel %vm450_vm0, %v3191_v41, %v7934_v5 }
 0x222   : > { %2913 = vrot.lane.b32.xlu1 %v7159_v27, %s6031_s25  ;;  %2700 = vmatmul.bf16.gmra.mxu2 %v2555_v20  ;;  %v4070_v27 = vsel %vm450_vm0, %v4069_v12, %v8008_v52  ;;  %v4408_v33 = vor.u32 %v4407_v60, %v4403_v4  ;;  %v5909_v4 = vld [vmem:[%s6077_s23 + $0x90] sm:$0xf0]  ;;  %v5366_v60 = vld [vmem:[%s6077_s23 + $0x98] sm:$0x1] }
 0x224   : > { %v4148_v45 = vpop.permute.xlu1 %4147 }
 0x225   : > { %3865 = vrot.lane.b32.xlu0 %v9230_v26, %s6031_s25  ;;  %v2504_v15 = vpop.f32.mrf.mxu1 }
 0x226   : > { %3027 = vrot.lane.b32.xlu2 %v7937_v61, %s6030_s24  ;;  %v2505_v21 = vadd.f32 %v7564_v51, %v2504_v15 }
 0x227   : > { %v3900_v8 = vpop.permute.xlu0 %3899 }
 0x228   : > { %v4272_v58 = vsel %vm1092_vm2, %v4212_v39, %v3900_v8  ;;  %v1281_v10 = vpop.f32.mrf.mxu0  ;;  %v8022_v28 = vpop.permute.xlu2 %2905  ;;  %v9233_v39 = vld [vmem:[#allocation33_spill] sm:$0xff] }
 0x229   : > { %v4324_v35 = vsel %vm1125_vm3, %v4272_v58, %v4148_v45  ;;  %v8037_v45 = vpop.f32.mrf.mxu2  ;;  %v9234_v26 = vshrl.u32 %v9233_v39, 16  ;;  %v1282_v15 = vadd.f32 %v7564_v51, %v1281_v10  ;;  %v5910_v58 = vld [vmem:[%s6077_s23 + $0x90] sm:$0xe] }
 0x22a   : > { %4169 = vrot.lane.b32.xlu1 %v4070_v27, %s6032_s26  ;;  %v4409_v20 = vshll.u32 %v4324_v35, 16  ;;  %9232 = vst [vmem:[#allocation45_spill] sm:$0xff] %v8037_v45 }
 0x22b   : > { %1320 = vmatmul.bf16.gmra.mxu0 %v7685_v36  ;;  %v4071_v36 = vshrl.u32 %v7988_v54, 16 }
 0x22c   : > { %v8029_v12 = vpop.permute.xlu1 %3017  ;;  %v4411_v63 = vrot.slane %v4409_v20, 1 }
 0x22d   : > { %v4273_v34 = vsel %vm1092_vm2, %v4214_v25, %v8029_v12  ;;  %3867 = vrot.lane.b32.xlu0 %v9234_v26, %s6031_s25  ;;  %v2506_v27 = vpop.f32.mrf.mxu1  ;;  %v2539_v25 = vmax.f32 %v2505_v21, 0.0  ;;  %v3067_v21 = vunpack.c.l.b16 %v5366_v60 }
 0x22e   : > { %v2507_v8 = vadd.f32 %v7564_v51, %v2506_v27  ;;  %3297 = vrot.lane.b32.xlu2 %v3196_v23, %s6032_s26  ;;  %v8046_v5 = vsel %vm450_vm0, %v4408_v33, %v4411_v63  ;;  %v3200_v63 = vshll.u32 %v7937_v61, 16  ;;  %v5911_v27 = vor.u32 %v5910_v58, %v5909_v4 }
 0x22f   : > { %v2904_v41 = vpop.permute.xlu0 %2903 }
 0x230   : > { %v2540_v35 = vmax.f32 %v2507_v8, 0.0  ;;  %v3320_v20 = vsel %vm1059_vm1, %v7978_v40, %v2904_v41  ;;  %v1283_v26 = vpop.f32.mrf.mxu0  ;;  %v8054_v45 = vpop.permute.xlu2 %4153  ;;  %v1343_v8 = vmax.f32 %v1282_v15, 0.0  ;;  %v8068_v41 = vld [vmem:[%s6077_s23 + $0x90] sm:$0xff]   ;;  %v4076_v4 = vshll.u32 %v5911_v27, 16 }
 0x231   : > { %v1284_v23 = vadd.f32 %v7564_v51, %v1283_v26  ;;  %v8060_v10 = vsel %vm1092_vm2, %v3320_v20, %v7878_v18  ;;  %v3202_v18 = vrot.slane %v3200_v63, 1  ;;  %v8075_v15 = vpop.f32.mrf.mxu2  ;;  %v4216_v20 = vsel %vm1059_vm1, %v9197_v57, %v7972_v6  ;;  %v8101_v6 = vld [vmem:[%s6077_s23 + $0x9c] sm:$0xff]  }
 0x232   : > { %4171 = vrot.lane.b32.xlu1 %v4071_v36, %s6032_s26  ;;  %v2556_v33 = vpack.c.bf16 %v2540_v35, %v2539_v25  ;;  %v3198_v36 = vshrl.u32 %v7937_v61, 16  ;;  %v9235_v25 = vld [vmem:[#allocation39_spill] sm:$0xff]  ;;  %v8073_v35 = vpack.c.b16 %v3067_v21, %v3067_v21  ;;  %9236 = vst [vmem:[#allocation44_spill] sm:$0xff] %v8075_v15  ;;  %v4078_v63 = vrot.slane %v4076_v4, 1  ;;  %v5367_v15 = vld [vmem:[%s6077_s23 + $0xa4] sm:$0x1] }
 0x233   : > { %v1344_v43 = vmax.f32 %v1284_v23, 0.0  ;;  %v4275_v57 = vsel %vm1092_vm2, %v4216_v20, %v8004_v37 }
 0x234   : > { %v8063_v40 = vpop.permute.xlu1 %3287  ;;  %2705 = vmatmul.bf16.gmra.mxu2 %v2556_v33  ;;  %v3203_v26 = vor.u32 %v3202_v18, %v3198_v36  ;;  %v3217_v23 = vshll.u32 %v8073_v35, 16  ;;  %v4074_v33 = vshrl.u32 %v5911_v27, 16  ;;  %v6017_v27 = vld [vmem:[%s6077_s23 + $0x9c] sm:$0xf0] }
 0x235   : > { %3911 = vrot.lane.b32.xlu0 %v7988_v54, %s6030_s24  ;;  %v1369_v51 = vpack.c.bf16 %v1344_v43, %v1343_v8  ;;  %v5642_v54 = vld [vmem:[%s8973_s3 + $0xd8] sm:$0xff] }
 0x236   : > { %3869 = vrot.lane.b32.xlu2 %v9235_v25, %s6031_s25  ;;  %4820 = vmatpush.bf16.msrb.mxu3 %v5642_v54  ;;  %v6018_v8 = vld [vmem:[%s6077_s23 + $0x9c] sm:$0xe]  ;;  %v3208_v36 = vsel %vm450_vm0, %v3203_v26, %v8008_v52  ;;  %v8106_v18 = vrot.slane %v3217_v23, 1 }
 0x237   : > { %2797 = vmatmul.bf16.gmra.mxu3 %v1369_v51  ;;  %v4150_v60 = vpop.permute.xlu0 %4149  ;;  %v5626_v51 = vld [vmem:[%s8973_s3 + $0x98] sm:$0xff] }
 0x238   : > { %v4326_v43 = vsel %vm1125_vm3, %v4273_v34, %v4150_v60  ;;  %v1286_v58 = vpop.f32.mrf.mxu0  ;;  %v8081_v61 = vpop.permute.xlu2 %4155  ;;  %3696 = vmatpush.bf16.msrb.mxu1 %v5626_v51  ;;  %v9237_v25 = vld [vmem:[#allocation37_spill] sm:$0xff] }
 0x239   : > { %v4415_v21 = vshll.u32 %v4326_v43, 16  ;;  %v9238_v4 = vshrl.u32 %v9237_v25, 16  ;;  %v8120_v23 = vpop.f32.mrf.mxu2 }
 0x23a   : > { %3029 = vrot.lane.b32.xlu1 %v8068_v41, %s6030_s24  ;;  %9239 = vst [vmem:[#allocation42_spill] sm:$0xff] %v8120_v23 }
 0x23b   : > { %1325 = vmatmul.bf16.gmra.mxu0 %v7738_v42  ;;  %v4079_v42 = vor.u32 %v4078_v63, %v4074_v33  ;;  %v4417_v60 = vrot.slane %v4415_v21, 1  ;;  %v4413_v33 = vshrl.u32 %v4326_v43, 16 }
 0x23c   : > { %v8089_v34 = vpop.permute.xlu1 %3849 }
 0x23d   : > { %2915 = vrot.lane.b32.xlu0 %v7179_v59, %s6031_s25  ;;  %v8114_v59 = vld [vmem:[%s8972_s2] ss:$0 sm:$0xff]  ;;  %v4080_v21 = vsel %vm450_vm0, %v4079_v42, %v8106_v18 }
 0x23e   : > { %3871 = vrot.lane.b32.xlu2 %v9238_v4, %s6031_s25  ;;  %v1287_v37 = vadd.f32 %v8114_v59, %v1286_v58  ;;  %v6019_v4 = vor.u32 %v6018_v8, %v6017_v27  ;;  %v4418_v58 = vor.u32 %v4417_v60, %v4413_v33  ;;  %v9240_v60 = vld [vmem:[#allocation43_spill] sm:$0xff] }
 0x23f   : > { %v4152_v54 = vpop.permute.xlu0 %4151 }
 0x240   : > { %v4328_v20 = vsel %vm1125_vm3, %v4275_v57, %v4152_v54  ;;  %v1288_v52 = vpop.f32.mrf.mxu0  ;;  %v8118_v26 = vpop.permute.xlu2 %3021  ;;  %v1345_v50 = vmax.f32 %v1287_v37, 0.0  ;;  %v4086_v27 = vshll.u32 %v6019_v4, 16 }
 0x241   : > { %v4419_v63 = vshll.u32 %v4328_v20, 16  ;;  %v1289_v51 = vadd.f32 %v8114_v59, %v1288_v52  ;;  %v3068_v20 = vunpack.c.l.b16 %v5367_v15  ;;  %v8143_v15 = vpop.f32.mrf.mxu3 }
 0x242   : > { %3299 = vrot.lane.b32.xlu1 %v3208_v36, %s6032_s26  ;;  %9241 = vst [vmem:[#allocation8_spill] sm:$0xff] %v8143_v15 }
 0x243   : > { %v4421_v2 = vrot.slane %v4419_v63, 1  ;;  %v1346_v57 = vmax.f32 %v1289_v51, 0.0  ;;  %v4084_v63 = vshrl.u32 %v6019_v4, 16  ;;  %v4088_v51 = vrot.slane %v4086_v27, 1 }
 0x244   : > { %v8127_v54 = vpop.permute.xlu1 %3851  ;;  %4622 = vmatmul.bf16.vlgmr.msrb.gmra.mxu2 %v7820_v48  ;;  %v4081_v48 = vshrl.u32 %v8073_v35, 16 }
 0x245   : > { %4173 = vrot.lane.b32.xlu0 %v4080_v21, %s6032_s26  ;;  %v1370_v43 = vpack.c.bf16 %v1346_v57, %v1345_v50  ;;  %v8132_v52 = vsel %vm450_vm0, %v4418_v58, %v4421_v2  ;;  %v3084_v50 = vpack.c.b16 %v3068_v20, %v3068_v20  ;;  %v8145_v2 = vpop.f32.mrf.mxu2  ;;  %v3212_v21 = vshll.u32 %v8068_v41, 16  ;;  %v9243_v20 = vld [vmem:[#allocation40_spill] sm:$0xff] }
 0x246   : > { %3913 = vrot.lane.b32.xlu2 %v8073_v35, %s6030_s24  ;;  %9242 = vst [vmem:[#allocation61_spill] sm:$0xff] %v8145_v2  ;;  %v9244_v27 = vshrl.u32 %v9243_v20, 16  ;;  %v5912_v2 = vld [vmem:[%s6077_s23 + $0xa8] sm:$0xf0] }
 0x247   : > { %2802 = vmatmul.bf16.gmra.mxu3 %v1370_v43  ;;  %v8136_v8 = vpop.permute.xlu0 %3019  ;;  %v3229_v33 = vshll.u32 %v3084_v50, 16 }
 0x248   : > { %v1291_v36 = vpop.f32.mrf.mxu0  ;;  %v8138_v42 = vpop.permute.xlu2 %3291 }
 0x249   : > { %v1292_v35 = vadd.f32 %v8114_v59, %v1291_v36  ;;  %v8157_v57 = vrot.slane %v3229_v33, 1 }
 0x24a   : > { %3873 = vrot.lane.b32.xlu1 %v9240_v60, %s6031_s25 }
 0x24b   : > { %3498 = vmatmul.bf16.vlgmr.msrb.gmra.mxu0 %v7840_v38  ;;  %v4089_v38 = vor.u32 %v4088_v51, %v4084_v63  ;;  %v1347_v36 = vmax.f32 %v1292_v35, 0.0  ;;  %v5368_v63 = vld [vmem:[%s6077_s23 + $0xb0] sm:$0x1]  ;;  %v5913_v51 = vld [vmem:[%s6077_s23 + $0xa8] sm:$0xe] }
 0x24c   : > { %v8147_v37 = vpop.permute.xlu1 %3903  ;;  %v3069_v35 = vunpack.c.l.b16 %v5368_v63 }
 0x24d   : > { %4175 = vrot.lane.b32.xlu0 %v4081_v48, %s6032_s26  ;;  %v3214_v48 = vrot.slane %v3212_v21, 1  ;;  %v4090_v33 = vsel %vm450_vm0, %v4089_v38, %v8157_v57  ;;  %v5641_v38 = vld [vmem:[%s8973_s3 + $0xd0] sm:$0xff] }
 0x24e   : > { %2917 = vrot.lane.b32.xlu2 %v7232_v17, %s6031_s25  ;;  %v3210_v17 = vshrl.u32 %v8068_v41, 16  ;;  %4821 = vmatpush.bf16.msrb.mxu3 %v5641_v38 }
 0x24f   : > { %v8155_v58 = vpop.permute.xlu0 %3289 }
 0x250   : > { %v1293_v43 = vpop.f32.mrf.mxu0  ;;  %v8163_v60 = vpop.permute.xlu2 %3857  ;;  %v3215_v21 = vor.u32 %v3214_v48, %v3210_v17  ;;  %v8191_v17 = vpack.c.b16 %v3069_v35, %v3069_v35  ;;  %v3224_v35 = vshll.u32 %v8101_v6, 16 }
 0x251   : > { %v1294_v4 = vadd.f32 %v8114_v59, %v1293_v43  ;;  %v8173_v43 = vpop.f32.mrf.mxu3 }
 0x252   : > { %3875 = vrot.lane.b32.xlu1 %v9244_v27, %s6031_s25  ;;  %9245 = vst [vmem:[#allocation46_spill] sm:$0xff] %v8173_v43  ;;  %v8176_v27 = vpop.f32.mrf.mxu2  ;;  %v3226_v44 = vrot.slane %v3224_v35, 1  ;;  %v6021_v35 = vld [vmem:[%s6077_s23 + $0xb4] sm:$0xe] }
 0x253   : > { %v1348_v23 = vmax.f32 %v1294_v4, 0.0  ;;  %9246 = vst [vmem:[#allocation12_spill] sm:$0xff] %v8176_v27  ;;  %v5914_v4 = vor.u32 %v5913_v51, %v5912_v2  ;;  %v4091_v2 = vshrl.u32 %v3084_v50, 16  ;;  %v5625_v51 = vld [vmem:[%s8973_s3 + $0x90] sm:$0xff] }
 0x254   : > { %v8167_v55 = vpop.permute.xlu1 %2907  ;;  %4627 = vmatmul.bf16.gmra.mxu2 %v7903_v0  ;;  %3697 = vmatpush.bf16.msrb.mxu1 %v5625_v51  ;;  %v3222_v51 = vshrl.u32 %v8101_v6, 16 }
 0x255   : > { %3031 = vrot.lane.b32.xlu0 %v8101_v6, %s6030_s24  ;;  %v1371_v41 = vpack.c.bf16 %v1348_v23, %v1347_v36  ;;  %v3220_v23 = vsel %vm450_vm0, %v3215_v21, %v8106_v18  ;;  %v4096_v48 = vshll.u32 %v5914_v4, 16  ;;  %v3241_v18 = vshll.u32 %v8191_v17, 16 }
 0x256   : > { %4177 = vrot.lane.b32.xlu2 %v4090_v33, %s6032_s26 }
 0x257   : > { %2807 = vmatmul.bf16.gmra.mxu3 %v1371_v41  ;;  %v8181_v13 = vpop.permute.xlu0 %3853  ;;  %v4094_v41 = vshrl.u32 %v5914_v4, 16  ;;  %v4098_v21 = vrot.slane %v4096_v48, 1  ;;  %v8215_v4 = vrot.slane %v3241_v18, 1 }
 0x258   : > { %v1296_v7 = vpop.f32.mrf.mxu0  ;;  %v8187_v0 = vpop.permute.xlu2 %3859 }
 0x259   : > { %v8196_v33 = vpop.f32.mrf.mxu3  ;;  %v4099_v48 = vor.u32 %v4098_v21, %v4094_v41  ;;  %v3227_v21 = vor.u32 %v3226_v44, %v3222_v51  ;;  %v4101_v44 = vshrl.u32 %v8191_v17, 16  ;;  %v8247_v51 = vld [vmem:[%s6077_s23 + $0xb4] sm:$0xff]  }
 0x25a   : > { %3915 = vrot.lane.b32.xlu1 %v3084_v50, %s6030_s24  ;;  %9247 = vst [vmem:[#allocation48_spill] sm:$0xff] %v8196_v33  ;;  %v8198_v63 = vpop.f32.mrf.mxu2  ;;  %v1297_v50 = vadd.f32 %v8114_v59, %v1296_v7  ;;  %v5892_v7 = vld [vmem:[%s6077_s23 + $0xa8] sm:$0xff]  }
 0x25b   : > { %3503 = vmatmul.bf16.gmra.mxu0 %v7950_v1  ;;  %9248 = vst [vmem:[#allocation10_spill] sm:$0xff] %v8198_v63  ;;  %v4100_v18 = vsel %vm450_vm0, %v4099_v48, %v8215_v4  ;;  %v9252_v48 = vld [vmem:[#allocation47_spill] sm:$0xff]  ;;  %v3236_v16 = vshll.u32 %v5892_v7, 16 }
 0x25c   : > { %v8193_v36 = vpop.permute.xlu1 %4157  ;;  %v1349_v27 = vmax.f32 %v1297_v50, 0.0 }
 0x25d   : > { %3301 = vrot.lane.b32.xlu0 %v3220_v23, %s6032_s26  ;;  %v3238_v15 = vrot.slane %v3236_v16, 1  ;;  %v3387_v16 = vsel %vm1125_vm3, %v8060_v10, %v8063_v40  ;;  %v8297_v10 = vld [vmem:[%s6077_s23 + $0x48] sm:$0xff]  }
 0x25e   : > { %4179 = vrot.lane.b32.xlu2 %v4091_v2, %s6032_s26 }
 0x25f   : > { %v8207_v1 = vpop.permute.xlu0 %3855 }
 0x260   : > { %v1298_v38 = vpop.f32.mrf.mxu0  ;;  %v8213_v63 = vpop.permute.xlu2 %3907 }
 0x261   : > { %v1299_v23 = vadd.f32 %v8114_v59, %v1298_v38  ;;  %v9249_v38 = vld [vmem:[#allocation49_spill] sm:$0xff]  ;;  %v8224_v32 = vpop.f32.mrf.mxu3 }
 0x262   : > { %2919 = vrot.lane.b32.xlu1 %v7228_v53, %s6031_s25  ;;  %9250 = vst [vmem:[#allocation14_spill] sm:$0xff] %v8224_v32  ;;  %v8229_v41 = vpop.f32.mrf.mxu2 }
 0x263   : > { %v1350_v2 = vmax.f32 %v1299_v23, 0.0  ;;  %9251 = vst [vmem:[#allocation54_spill] sm:$0xff] %v8229_v41  ;;  %v3232_v23 = vsel %vm450_vm0, %v3227_v21, %v8157_v57  ;;  %v5369_v41 = vld [vmem:[%s6077_s23 + $0xbc] sm:$0x1] }
 0x264   : > { %v8217_v49 = vpop.permute.xlu1 %4159  ;;  %4632 = vmatmul.bf16.gmra.mxu2 %v7957_v9  ;;  %v3070_v33 = vunpack.c.l.b16 %v5369_v41 }
 0x265   : > { %3877 = vrot.lane.b32.xlu0 %v9249_v38, %s6031_s25  ;;  %v1372_v53 = vpack.c.bf16 %v1350_v2, %v1349_v27  ;;  %v9253_v2 = vshrl.u32 %v9252_v48, 16  ;;  %v6020_v38 = vld [vmem:[%s6077_s23 + $0xb4] sm:$0xf0] }
 0x266   : > { %3033 = vrot.lane.b32.xlu2 %v5892_v7, %s6030_s24  ;;  %v6022_v32 = vor.u32 %v6021_v35, %v6020_v38  ;;  %v5640_v35 = vld [vmem:[%s8973_s3 + $0xc8] sm:$0xff] }
 0x267   : > { %2812 = vmatmul.bf16.gmra.mxu3 %v1372_v53  ;;  %v8231_v6 = vpop.permute.xlu0 %3905 }
 0x268   : > { %v1301_v9 = vpop.f32.mrf.mxu0  ;;  %v8234_v27 = vpop.permute.xlu2 %2911  ;;  %v4106_v48 = vshll.u32 %v6022_v32, 16  ;;  %4822 = vmatpush.bf16.msrb.mxu3 %v5640_v35 }
 0x269   : > { %v8257_v11 = vpop.f32.mrf.mxu3 }
 0x26a   : > { %4181 = vrot.lane.b32.xlu1 %v4100_v18, %s6032_s26  ;;  %v8251_v53 = vpop.f32.mrf.mxu2  ;;  %v1302_v18 = vadd.f32 %v8114_v59, %v1301_v9  ;;  %9255 = vst [vmem:[#allocation50_spill] sm:$0xff] %v8257_v11  ;;  %v3234_v11 = vshrl.u32 %v5892_v7, 16 }
 0x26b   : > { %3508 = vmatmul.bf16.gmra.mxu0 %v7969_v3  ;;  %9254 = vst [vmem:[#allocation52_spill] sm:$0xff] %v8251_v53 }
 0x26c   : > { %v8236_v50 = vpop.permute.xlu1 %3023 }
 0x26d   : > { %3879 = vrot.lane.b32.xlu0 %v9253_v2, %s6031_s25 }
 0x26e   : > { %3303 = vrot.lane.b32.xlu2 %v3232_v23, %s6032_s26  ;;  %v1351_v23 = vmax.f32 %v1302_v18, 0.0  ;;  %v4104_v18 = vshrl.u32 %v6022_v32, 16 }
 0x26f   : > { %v8254_v3 = vpop.permute.xlu0 %2909 }
 0x270   : > { %v1303_v57 = vpop.f32.mrf.mxu0  ;;  %v8261_v2 = vpop.permute.xlu2 %4165 }
 0x271   : > { %v1304_v21 = vadd.f32 %v8114_v59, %v1303_v57  ;;  %v9256_v57 = vld [vmem:[#allocation55_spill] sm:$0xff] }
 0x272   : > { %4183 = vrot.lane.b32.xlu1 %v4101_v44, %s6032_s26  ;;  %v8270_v44 = vpack.c.b16 %v3070_v33, %v3070_v33  ;;  %v8277_v38 = vpop.f32.mrf.mxu2  ;;  %v3239_v33 = vor.u32 %v3238_v15, %v3234_v11  ;;  %v4218_v11 = vsel %vm1059_vm1, %v8297_v10, %v8089_v34 }
 0x273   : > { %v1352_v43 = vmax.f32 %v1304_v21, 0.0  ;;  %9257 = vst [vmem:[#allocation13_spill] sm:$0xff] %v8277_v38  ;;  %v4108_v21 = vrot.slane %v4106_v48, 1  ;;  %v9259_v48 = vld [vmem:[#allocation51_spill] sm:$0xff]  ;;  %v5916_v38 = vld [vmem:[%s6077_s23 + $0xc0] sm:$0xe] }
 0x274   : > { %v8263_v53 = vpop.permute.xlu1 %3293  ;;  %4637 = vmatmul.bf16.gmra.mxu2 %v8046_v5  ;;  %v3253_v7 = vshll.u32 %v8270_v44, 16  ;;  %v3244_v32 = vsel %vm450_vm0, %v3239_v33, %v8215_v4  ;;  %v4276_v4 = vsel %vm1092_vm2, %v4218_v11, %v8136_v8 }
 0x275   : > { %3917 = vrot.lane.b32.xlu0 %v8191_v17, %s6030_s24  ;;  %v1373_v9 = vpack.c.bf16 %v1352_v43, %v1351_v23  ;;  %v8286_v17 = vpop.f32.mrf.mxu3  ;;  %v4109_v15 = vor.u32 %v4108_v21, %v4104_v18 }
 0x276   : > { %3881 = vrot.lane.b32.xlu2 %v9256_v57, %s6031_s25  ;;  %9258 = vst [vmem:[#allocation57_spill] sm:$0xff] %v8286_v17  ;;  %v8304_v40 = vrot.slane %v3253_v7, 1  ;;  %v9260_v57 = vshrl.u32 %v9259_v48, 16 }
 0x277   : > { %2817 = vmatmul.bf16.gmra.mxu3 %v1373_v9  ;;  %v8272_v41 = vpop.permute.xlu0 %4161  ;;  %v5624_v9 = vld [vmem:[%s8973_s3 + $0x88] sm:$0xff] }
 0x278   : > { %v1306_v5 = vpop.f32.mrf.mxu0  ;;  %v8284_v43 = vpop.permute.xlu2 %4167  ;;  %3698 = vmatpush.bf16.msrb.mxu1 %v5624_v9  ;;  %v5915_v9 = vld [vmem:[%s6077_s23 + $0xc0] sm:$0xf0]  ;;  %v4110_v21 = vsel %vm450_vm0, %v4109_v15, %v8304_v40  ;;  %v3322_v15 = vsel %vm1059_vm1, %v9231_v22, %v8022_v28  ;;  %v4111_v28 = vshrl.u32 %v8270_v44, 16 }
 0x27a   : > { %3035 = vrot.lane.b32.xlu1 %v8247_v51, %s6030_s24  ;;  %v8319_v33 = vpop.f32.mrf.mxu2 }
 0x27b   : > { %3513 = vmatmul.bf16.gmra.mxu0 %v3387_v16  ;;  %v4220_v16 = vsel %vm1059_vm1, %v9204_v62, %v8127_v54  ;;  %9261 = vst [vmem:[#allocation17_spill] sm:$0xff] %v8319_v33  ;;  %v5370_v62 = vld [vmem:[%s6077_s23 + $0xc8] sm:$0x1]  ;;  %v5917_v33 = vor.u32 %v5916_v38, %v5915_v9  ;;  %v3354_v9 = vsel %vm1092_vm2, %v3322_v15, %v8029_v12 }
 0x27c   : > { %v8289_v23 = vpop.permute.xlu1 %3861  ;;  %v4278_v54 = vsel %vm1092_vm2, %v4220_v16, %v8147_v37 }
 0x27d   : > { %2921 = vrot.lane.b32.xlu0 %v7250_v30, %s6031_s25  ;;  %v1307_v30 = vadd.f32 %v8114_v59, %v1306_v5  ;;  %v8325_v5 = vpop.f32.mrf.mxu3  ;;  %v4332_v37 = vsel %vm1125_vm3, %v4278_v54, %v8081_v61  ;;  %v4114_v12 = vshrl.u32 %v5917_v33, 16 }
 0x27e   : > { %3883 = vrot.lane.b32.xlu2 %v9260_v57, %s6031_s25  ;;  %9262 = vst [vmem:[#allocation58_spill] sm:$0xff] %v8325_v5  ;;  %v3071_v5 = vunpack.c.l.b16 %v5370_v62  ;;  %v4429_v16 = vshll.u32 %v4332_v37, 16  ;;  %v3248_v37 = vshll.u32 %v8247_v51, 16 }
 0x27f   : > { %v8310_v35 = vpop.permute.xlu0 %4163  ;;  %v1353_v57 = vmax.f32 %v1307_v30, 0.0 }
 0x280   : > { %v1308_v34 = vpop.f32.mrf.mxu0  ;;  %v8323_v18 = vpop.permute.xlu2 %3027  ;;  %v8354_v61 = vpack.c.b16 %v3071_v5, %v3071_v5 }
 0x281   : > { %v1309_v7 = vadd.f32 %v8114_v59, %v1308_v34  ;;  %v4330_v34 = vsel %vm1125_vm3, %v4276_v4, %v8054_v45  ;;  %v4116_v45 = vshll.u32 %v5917_v33, 16  ;;  %v3390_v4 = vsel %vm1125_vm3, %v3354_v9, %v8155_v58  ;;  %v9266_v58 = vld [vmem:[#allocation16_spill] sm:$0xff] }
 0x282   : > { %3305 = vrot.lane.b32.xlu1 %v3244_v32, %s6032_s26  ;;  %v4425_v38 = vshll.u32 %v4330_v34, 16  ;;  %v3265_v54 = vshll.u32 %v8354_v61, 16  ;;  %v4423_v5 = vshrl.u32 %v4330_v34, 16  ;;  %v4222_v15 = vsel %vm1059_vm1, %v9266_v58, %v8181_v13  ;;  %v6023_v9 = vld [vmem:[%s6077_s23 + $0xcc] sm:$0xf0] }
 0x283   : > { %v1354_v17 = vmax.f32 %v1309_v7, 0.0  ;;  %v4224_v13 = vsel %vm1059_vm1, %v9215_v47, %v8207_v1  ;;  %v8398_v47 = vld [vmem:[%s6077_s23 + $0xc0] sm:$0xff]   ;;  %v3246_v1 = vshrl.u32 %v8247_v51, 16 }
 0x284   : > { %v8332_v11 = vpop.permute.xlu1 %3863  ;;  %4642 = vmatmul.bf16.gmra.mxu2 %v8132_v52  ;;  %v4427_v7 = vrot.slane %v4425_v38, 1 }
 0x285   : > { %4185 = vrot.lane.b32.xlu0 %v4110_v21, %s6032_s26  ;;  %v1374_v32 = vpack.c.bf16 %v1354_v17, %v1353_v57  ;;  %v9263_v17 = vld [vmem:[#allocation59_spill] sm:$0xff]  ;;  %v8358_v21 = vpop.f32.mrf.mxu2  ;;  %v8363_v57 = vpop.f32.mrf.mxu3 }
 0x286   : > { %3919 = vrot.lane.b32.xlu2 %v8270_v44, %s6030_s24  ;;  %9264 = vst [vmem:[#allocation15_spill] sm:$0xff] %v8358_v21  ;;  %v4118_v44 = vrot.slane %v4116_v45, 1  ;;  %v4428_v45 = vor.u32 %v4427_v7, %v4423_v5  ;;  %v3250_v21 = vrot.slane %v3248_v37, 1 }
 0x287   : > { %2822 = vmatmul.bf16.gmra.mxu3 %v1374_v32  ;;  %v8345_v30 = vpop.permute.xlu0 %3025  ;;  %9265 = vst [vmem:[#allocation60_spill] sm:$0xff] %v8363_v57  ;;  %v4431_v32 = vrot.slane %v4429_v16, 1  ;;  %v8378_v16 = vld [vmem:[%s6077_s23 + $0xcc] sm:$0xff]  }
 0x288   : > { %v1311_v52 = vpop.f32.mrf.mxu0  ;;  %v8352_v22 = vpop.permute.xlu2 %3297  ;;  %v4119_v34 = vor.u32 %v4118_v44, %v4114_v12 }
 0x289   : > { %v1312_v38 = vadd.f32 %v8114_v59, %v1311_v52  ;;  %v3324_v52 = vsel %vm1059_vm1, %v8297_v10, %v8167_v55  ;;  %v4432_v44 = vsel %vm450_vm0, %v4428_v45, %v4431_v32  ;;  %v4281_v55 = vsel %vm1092_vm2, %v4224_v13, %v8231_v6  ;;  %v5371_v32 = vld [vmem:[%s6077_s23 + $0xd4] sm:$0x1] }
 0x28a   : > { %3885 = vrot.lane.b32.xlu1 %v9263_v17, %s6031_s25  ;;  %v8375_v17 = vrot.slane %v3265_v54, 1  ;;  %v9267_v54 = vld [vmem:[#allocation56_spill] sm:$0xff]  ;;  %v3356_v37 = vsel %vm1092_vm2, %v3324_v52, %v8136_v8  ;;  %v3251_v13 = vor.u32 %v3250_v21, %v3246_v1  ;;  %v4121_v52 = vshrl.u32 %v8354_v61, 16 }
 0x28b   : > { %3518 = vmatmul.bf16.gmra.mxu0 %v3390_v4  ;;  %v4279_v4 = vsel %vm1092_vm2, %v4222_v15, %v8118_v26  ;;  %v9268_v12 = vshrl.u32 %v9267_v54, 16  ;;  %v1355_v10 = vmax.f32 %v1312_v38, 0.0  ;;  %v4336_v38 = vsel %vm1125_vm3, %v4281_v55, %v8217_v49 }
 0x28c   : > { %v8360_v62 = vpop.permute.xlu1 %3909  ;;  %v4334_v51 = vsel %vm1125_vm3, %v4279_v4, %v8193_v36  ;;  %v5639_v36 = vld [vmem:[%s8973_s3 + $0xc0] sm:$0xff]  ;;  %v3393_v49 = vsel %vm1125_vm3, %v3356_v37, %v8138_v42  ;;  %v3256_v8 = vsel %vm450_vm0, %v3251_v13, %v8304_v40 }
 0x28d   : > { %4187 = vrot.lane.b32.xlu0 %v4111_v28, %s6032_s26  ;;  %v6024_v28 = vld [vmem:[%s6077_s23 + $0xcc] sm:$0xe]  ;;  %v4435_v4 = vshll.u32 %v4334_v51, 16  ;;  %4823 = vmatpush.bf16.msrb.mxu3 %v5639_v36  ;;  %v4433_v55 = vshrl.u32 %v4334_v51, 16 }
 0x28e   : > { %2923 = vrot.lane.b32.xlu2 %v7291_v19, %s6031_s25 }
 0x28f   : > { %v8373_v33 = vpop.permute.xlu0 %3295  ;;  %v8403_v15 = vpop.f32.mrf.mxu2 }
 0x290   : > { %v1313_v19 = vpop.f32.mrf.mxu0  ;;  %v8395_v5 = vpop.permute.xlu2 %3869  ;;  %9269 = vst [vmem:[#allocation2_spill] sm:$0xff] %v8403_v15 }
 0x291   : > { %v1314_v7 = vadd.f32 %v8114_v59, %v1313_v19  ;;  %v8410_v45 = vpop.f32.mrf.mxu3 }
 0x292   : > { %3887 = vrot.lane.b32.xlu1 %v9268_v12, %s6031_s25  ;;  %v4120_v12 = vsel %vm450_vm0, %v4119_v34, %v8375_v17  ;;  %v3072_v34 = vunpack.c.l.b16 %v5371_v32  ;;  %v8440_v32 = vld [vmem:[%s6077_s23 + $0x60] sm:$0xff]  }
 0x293   : > { %v1356_v19 = vmax.f32 %v1314_v7, 0.0  ;;  %v6025_v7 = vor.u32 %v6024_v28, %v6023_v9  ;;  %v4226_v42 = vsel %vm1059_vm1, %v8440_v32, %v8163_v60 }
 0x294   : > { %v8405_v57 = vpop.permute.xlu1 %2913  ;;  %4647 = vmatmul.bf16.gmra.mxu2 %v4432_v44  ;;  %v8434_v9 = vpack.c.b16 %v3072_v34, %v3072_v34  ;;  %v3260_v34 = vshll.u32 %v8398_v47, 16 }
 0x295   : > { %3037 = vrot.lane.b32.xlu0 %v8398_v47, %s6030_s24  ;;  %v1375_v6 = vpack.c.bf16 %v1356_v19, %v1355_v10  ;;  %v4439_v19 = vshll.u32 %v4336_v38, 16  ;;  %v4126_v28 = vshll.u32 %v6025_v7, 16  ;;  %v4124_v38 = vshrl.u32 %v6025_v7, 16 }
 0x296   : > { %4189 = vrot.lane.b32.xlu2 %v4120_v12, %s6032_s26  ;;  %v4437_v12 = vrot.slane %v4435_v4, 1  ;;  %v3277_v51 = vshll.u32 %v8434_v9, 16 }
 0x297   : > { %2827 = vmatmul.bf16.gmra.mxu3 %v1375_v6  ;;  %v8421_v44 = vpop.permute.xlu0 %3865  ;;  %v4441_v6 = vrot.slane %v4439_v19, 1  ;;  %v8445_v40 = vpop.f32.mrf.mxu2  ;;  %v4128_v13 = vrot.slane %v4126_v28, 1 }
 0x298   : > { %v1316_v10 = vpop.f32.mrf.mxu0  ;;  %v8432_v21 = vpop.permute.xlu2 %3871  ;;  %9270 = vst [vmem:[#allocation62_spill] sm:$0xff] %v8445_v40  ;;  %v4438_v4 = vor.u32 %v4437_v12, %v4433_v55  ;;  %v3258_v55 = vshrl.u32 %v8398_v47, 16  ;;  %v3262_v12 = vrot.slane %v3260_v34, 1  ;;  %v3326_v47 = vsel %vm1059_vm1, %v9266_v58, %v8254_v3 }
 0x299   : > { %v8451_v37 = vpop.f32.mrf.mxu3  ;;  %v1317_v60 = vadd.f32 %v8114_v59, %v1316_v10  ;;  %v8468_v10 = vrot.slane %v3277_v51, 1 }
 0x29a   : > { %3921 = vrot.lane.b32.xlu1 %v8354_v61, %s6030_s24  ;;  %v5623_v61 = vld [vmem:[%s8973_s3 + $0x80] sm:$0xff]  ;;  %v4442_v28 = vsel %vm450_vm0, %v4438_v4, %v4441_v6 }
 0x29b   : > { %3523 = vmatmul.bf16.gmra.mxu0 %v3393_v49  ;;  %3699 = vmatpush.bf16.msrb.mxu1 %v5623_v61  ;;  %v4228_v49 = vsel %vm1059_vm1, %v9220_v31, %v8187_v0  ;;  %v1357_v61 = vmax.f32 %v1317_v60, 0.0 }
 0x29c   : > { %v8437_v1 = vpop.permute.xlu1 %4169  ;;  %v4284_v0 = vsel %vm1092_vm2, %v4228_v49, %v8213_v63  ;;  %v3263_v63 = vor.u32 %v3262_v12, %v3258_v55 }
 0x29d   : > { %3307 = vrot.lane.b32.xlu0 %v3256_v8, %s6032_s26  ;;  %v4282_v8 = vsel %vm1092_vm2, %v4226_v42, %v8236_v50 }
 0x29e   : > { %4191 = vrot.lane.b32.xlu2 %v4121_v52, %s6032_s26  ;;  %v4129_v52 = vor.u32 %v4128_v13, %v4124_v38  ;;  %v4338_v51 = vsel %vm1125_vm3, %v4282_v8, %v8272_v41  ;;  %v3358_v41 = vsel %vm1092_vm2, %v3326_v47, %v8118_v26  ;;  %v3268_v49 = vsel %vm450_vm0, %v3263_v63, %v8375_v17  ;;  %v9272_v8 = vld [vmem:[#allocation63_spill] sm:$0xff] }
 0x29f   : > { %v8457_v36 = vpop.permute.xlu0 %3867  ;;  %v4445_v3 = vshll.u32 %v4338_v51, 16  ;;  %v3396_v58 = vsel %vm1125_vm3, %v3358_v41, %v8263_v53  ;;  %v3272_v26 = vshll.u32 %v8378_v16, 16  ;;  %v4443_v53 = vshrl.u32 %v4338_v51, 16 }
 0x2a0   : > { %v1318_v19 = vpop.f32.mrf.mxu0  ;;  %v8473_v31 = vpop.permute.xlu2 %3913  ;;  %v4130_v38 = vsel %vm450_vm0, %v4129_v52, %v8468_v10  ;;  %v4232_v51 = vsel %vm1059_vm1, %v9226_v24, %v8332_v11  ;;  %v3328_v11 = vsel %vm1059_vm1, %v8440_v32, %v8234_v27 }
 0x2a1   : > { %v1319_v7 = vadd.f32 %v8114_v59, %v1318_v19  ;;  %v8494_v34 = vpop.f32.mrf.mxu3 }
 0x2a2   : > { %2925 = vrot.lane.b32.xlu1 %v7295_v56, %s6031_s25  ;;  %v9271_v56 = vld [vmem:[#allocation27_spill] sm:$0xff] }
 0x2a3   : > { %v1358_v40 = vmax.f32 %v1319_v7, 0.0  ;;  %v9273_v7 = vshrl.u32 %v9272_v8, 16 }
 0x2a4   : > { %v8471_v15 = vpop.permute.xlu1 %4171  ;;  %4652 = vmatmul.bf16.gmra.mxu2 %v4442_v28  ;;  %v4131_v28 = vshrl.u32 %v8434_v9, 16 }
 0x2a5   : > { %v8477_v42 = vpop.f32.mrf.mxu2  ;;  %3889 = vrot.lane.b32.xlu0 %v9271_v56, %s6031_s25  ;;  %v1376_v6 = vpack.c.bf16 %v1358_v40, %v1357_v61  ;;  %v4340_v40 = vsel %vm1125_vm3, %v4284_v0, %v8310_v35  ;;  %v4447_v35 = vrot.slane %v4445_v3, 1  ;;  %v9274_v0 = vld [vmem:[#allocation25_spill] sm:$0xff] }
 0x2a6   : > { %3039 = vrot.lane.b32.xlu2 %v8378_v16, %s6030_s24  ;;  %v4449_v4 = vshll.u32 %v4340_v40, 16  ;;  %v4230_v56 = vsel %vm1059_vm1, %v9274_v0, %v8289_v23  ;;  %v3270_v40 = vshrl.u32 %v8378_v16, 16 }
 0x2a7   : > { %2832 = vmatmul.bf16.gmra.mxu3 %v1376_v6  ;;  %v8490_v13 = vpop.permute.xlu0 %3911  ;;  %v4448_v47 = vor.u32 %v4447_v35, %v4443_v53  ;;  %v4285_v3 = vsel %vm1092_vm2, %v4230_v56, %v8345_v30 }
 0x2a8   : > { %v1321_v60 = vpop.f32.mrf.mxu0  ;;  %v8509_v52 = vpop.permute.xlu2 %2917  ;;  %v4451_v55 = vrot.slane %v4449_v4, 1  ;;  %v4342_v16 = vsel %vm1125_vm3, %v4285_v3, %v8261_v2  ;;  %v3360_v2 = vsel %vm1092_vm2, %v3328_v11, %v8236_v50  ;;  %v4236_v3 = vsel %vm1059_vm1, %v9233_v39, %v8457_v36 }
 0x2a9   : > { %v1322_v12 = vadd.f32 %v8114_v59, %v1321_v60  ;;  %v8526_v63 = vpop.f32.mrf.mxu3  ;;  %v3274_v60 = vrot.slane %v3272_v26, 1  ;;  %v4455_v27 = vshll.u32 %v4342_v16, 16  ;;  %v4453_v56 = vshrl.u32 %v4342_v16, 16 }
 0x2aa   : > { %4193 = vrot.lane.b32.xlu1 %v4130_v38, %s6032_s26  ;;  %v4452_v4 = vsel %vm450_vm0, %v4448_v47, %v4451_v55  ;;  %v3330_v16 = vsel %vm1059_vm1, %v9274_v0, %v8405_v57  ;;  %v4290_v39 = vsel %vm1092_vm2, %v4236_v3, %v8490_v13 }
 0x2ab   : > { %3528 = vmatmul.bf16.gmra.mxu0 %v3396_v58  ;;  %v1359_v41 = vmax.f32 %v1322_v12, 0.0  ;;  %v3275_v35 = vor.u32 %v3274_v60, %v3270_v40 }
 0x2ac   : > { %v8501_v19 = vpop.permute.xlu1 %3029 }
 0x2ad   : > { %3891 = vrot.lane.b32.xlu0 %v9273_v7, %s6031_s25  ;;  %v8514_v61 = vpop.f32.mrf.mxu2  ;;  %v3280_v53 = vsel %vm450_vm0, %v3275_v35, %v8468_v10 }
 0x2ae   : > { %3309 = vrot.lane.b32.xlu2 %v3268_v49, %s6032_s26  ;;  %v4287_v49 = vsel %vm1092_vm2, %v4232_v51, %v8360_v62  ;;  %v5966_v51 = vld [vmem:[%s6077_s23 + $0x78] sm:$0xff]  }
 0x2af   : > { %v8516_v17 = vpop.permute.xlu0 %2915  ;;  %v4344_v62 = vsel %vm1125_vm3, %v4287_v49, %v8284_v43  ;;  %v4457_v43 = vrot.slane %v4455_v27, 1  ;;  %v3362_v27 = vsel %vm1092_vm2, %v3330_v16, %v8345_v30 }
 0x2b0   : > { %v1323_v6 = vpop.f32.mrf.mxu0  ;;  %v8551_v26 = vpop.permute.xlu2 %4177  ;;  %v4459_v55 = vshll.u32 %v4344_v62, 16  ;;  %v3402_v13 = vsel %vm1125_vm3, %v3362_v27, %v8352_v22  ;;  %v4238_v22 = vsel %vm1059_vm1, %v6542_v29, %v8395_v5 }
 0x2b1   : > { %v1324_v38 = vadd.f32 %v8114_v59, %v1323_v6  ;;  %v4458_v60 = vor.u32 %v4457_v43, %v4453_v56  ;;  %v4291_v16 = vsel %vm1092_vm2, %v4238_v22, %v8501_v19 }
 0x2b2   : > { %4195 = vrot.lane.b32.xlu1 %v4131_v28, %s6032_s26  ;;  %v4461_v6 = vrot.slane %v4459_v55, 1 }
 0x2b3   : > { %v1360_v23 = vmax.f32 %v1324_v38, 0.0 }
 0x2b4   : > { %v8531_v58 = vpop.permute.xlu1 %3299  ;;  %4657 = vmatmul.bf16.gmra.mxu2 %v4452_v4 }
 0x2b5   : > { %3923 = vrot.lane.b32.xlu0 %v8434_v9, %s6030_s24  ;;  %v1377_v24 = vpack.c.bf16 %v1360_v23, %v1359_v41 }
 0x2b6   : > { %2927 = vrot.lane.b32.xlu2 %v7308_v14, %s6031_s25  ;;  %v3399_v14 = vsel %vm1125_vm3, %v3360_v2, %v8373_v33  ;;  %v4234_v33 = vsel %vm1059_vm1, %v5966_v51, %v8421_v44  ;;  %v4462_v44 = vsel %vm450_vm0, %v4458_v60, %v4461_v6  ;;  %v4348_v2 = vsel %vm1125_vm3, %v4290_v39, %v8471_v15 }
 0x2b7   : > { %v8545_v7 = vpop.f32.mrf.mxu2  ;;  %2837 = vmatmul.bf16.gmra.mxu3 %v1377_v24  ;;  %v8547_v28 = vpop.permute.xlu0 %4173  ;;  %v4288_v4 = vsel %vm1092_vm2, %v4234_v33, %v8323_v18 }
 0x2b8   : > { %v1326_v9 = vpop.f32.mrf.mxu0  ;;  %v8578_v23 = vpop.permute.xlu2 %4179  ;;  %v4346_v35 = vsel %vm1125_vm3, %v4288_v4, %v8437_v1  ;;  %v4240_v4 = vsel %vm1059_vm1, %v9237_v25, %v8432_v21  ;;  %v3332_v25 = vsel %vm1059_vm1, %v5966_v51, %v8516_v17  ;;  %v4350_v21 = vsel %vm1125_vm3, %v4291_v16, %v8547_v28 }
 0x2b9   : > { %v1327_v47 = vadd.f32 %v8114_v59, %v1326_v9  ;;  %v4465_v57 = vshll.u32 %v4346_v35, 16  ;;  %v4463_v43 = vshrl.u32 %v4346_v35, 16  ;;  %v4293_v27 = vsel %vm1092_vm2, %v4240_v4, %v8473_v31 }
 0x2ba   : > { %v8555_v32 = vpop.f32.mrf.mxu3  ;;  %v3364_v31 = vsel %vm1092_vm2, %v3332_v25, %v8323_v18 }
 0x2bb   : > { %3533 = vmatmul.bf16.gmra.mxu0 %v3399_v14  ;;  %v1361_v49 = vmax.f32 %v1327_v47, 0.0  ;;  %v4467_v56 = vrot.slane %v4465_v57, 1  ;;  %v3405_v17 = vsel %vm1125_vm3, %v3364_v31, %v8531_v58 }
 0x2bc   : > { %v8561_v12 = vpop.permute.xlu1 %3873 }
 0x2bd   : > { %3311 = vrot.lane.b32.xlu0 %v3280_v53, %s6032_s26  ;;  %v4469_v53 = vshll.u32 %v4348_v2, 16  ;;  %v4468_v60 = vor.u32 %v4467_v56, %v4463_v43  ;;  %v4475_v56 = vshll.u32 %v4350_v21, 16 }
 0x2bf   : > { %v8565_v50 = vpop.f32.mrf.mxu2  ;;  %v8567_v38 = vpop.permute.xlu0 %4175  ;;  %v4471_v6 = vrot.slane %v4469_v53, 1 }
 0x2c0   : > { %v1328_v10 = vpop.f32.mrf.mxu0  ;;  %v8604_v1 = vpop.permute.xlu2 %3033  ;;  %v4352_v53 = vsel %vm1125_vm3, %v4293_v27, %v8567_v38 }
 0x2c1   : > { %v1329_v40 = vadd.f32 %v8114_v59, %v1328_v10  ;;  %v4472_v35 = vsel %vm450_vm0, %v4468_v60, %v4471_v6  ;;  %v4479_v28 = vshll.u32 %v4352_v53, 16  ;;  %v4477_v6 = vrot.slane %v4475_v56, 1  ;;  %v5967_v60 = vld [vmem:[%s6077_s23 + $0x90] sm:$0xff]  }
 0x2c2   : > { %v8576_v41 = vpop.f32.mrf.mxu3  ;;  %v4242_v18 = vsel %vm1059_vm1, %v5967_v60, %v8561_v12 }
 0x2c3   : > { %v1362_v24 = vmax.f32 %v1329_v40, 0.0  ;;  %v4481_v38 = vrot.slane %v4479_v28, 1 }
 0x2c4   : > { %v8582_v11 = vpop.permute.xlu1 %3875  ;;  %4662 = vmatmul.bf16.gmra.mxu2 %v4462_v44 }
 0x2c5   : > { %v1378_v36 = vpack.c.bf16 %v1362_v24, %v1361_v49  ;;  %v4244_v16 = vsel %vm1059_vm1, %v9243_v20, %v8582_v11  ;;  %v3334_v20 = vsel %vm1059_vm1, %v6542_v29, %v8509_v52 }
 0x2c7   : > { %2842 = vmatmul.bf16.gmra.mxu3 %v1378_v36  ;;  %v4623_v62 = vpop.f32.mrf.mxu2  ;;  %v8592_v9 = vpop.permute.xlu0 %3031 }
 0x2c8   : > { %v3499_v14 = vpop.f32.mrf.mxu0  ;;  %v4624_v30 = vadd.f32 %v8114_v59, %v4623_v62 }
 0x2c9   : > { %v3500_v15 = vadd.f32 %v8114_v59, %v3499_v14  ;;  %v8631_v14 = vpop.permute.xlu2 %3303 }
 0x2ca   : > { %v8598_v0 = vpop.f32.mrf.mxu3  ;;  %v4703_v49 = vmax.f32 %v4624_v30, 0.0 }
 0x2cb   : > { %3538 = vmatmul.bf16.gmra.mxu0 %v3402_v13  ;;  %v3579_v39 = vmax.f32 %v3500_v15, 0.0 }
 0x2cc   : > { %v8602_v55 = vpop.permute.xlu1 %3915 }
 0x2cf   : > { %v4625_v47 = vpop.f32.mrf.mxu2  ;;  %v8608_v33 = vpop.permute.xlu0 %3301 }
 0x2d0   : > { %v4626_v10 = vadd.f32 %v8114_v59, %v4625_v47  ;;  %v3501_v40 = vpop.f32.mrf.mxu0  ;;  %v4473_v47 = vshrl.u32 %v4350_v21, 16 }
 0x2d1   : > { %v3502_v3 = vadd.f32 %v8114_v59, %v3501_v40 }
 0x2d2   : > { %v4704_v24 = vmax.f32 %v4626_v10, 0.0  ;;  %v8618_v44 = vpop.f32.mrf.mxu3 }
 0x2d3   : > { %v3580_v36 = vmax.f32 %v3502_v3, 0.0  ;;  %v8648_v3 = vpop.permute.xlu2 %3881 }
 0x2d4   : > { %v8622_v5 = vpop.permute.xlu1 %2919  ;;  %v4735_v62 = vpack.c.bf16 %v4704_v24, %v4703_v49  ;;  %4667 = vmatmul.bf16.gmra.mxu2 %v4472_v35  ;;  %v4478_v49 = vor.u32 %v4477_v6, %v4473_v47 }
 0x2d5   : > { %v3611_v2 = vpack.c.bf16 %v3580_v36, %v3579_v39 }
 0x2d6   : > { %v4482_v25 = vsel %vm450_vm0, %v4478_v49, %v4481_v38 }
 0x2d7   : > { %3700 = vmatmul.bf16.vlgmr.msrb.gmra.mxu1 %v3611_v2  ;;  %v4628_v57 = vpop.f32.mrf.mxu2  ;;  %4824 = vmatmul.bf16.vlgmr.msrb.gmra.mxu3 %v4735_v62  ;;  %v3878_v13 = vpop.permute.xlu0 %3877  ;;  %v4294_v62 = vsel %vm1092_vm2, %v4242_v18, %v8592_v9 }
 0x2d8   : > { %v3504_v43 = vpop.f32.mrf.mxu0  ;;  %v4629_v15 = vadd.f32 %v8114_v59, %v4628_v57  ;;  %v4296_v57 = vsel %vm1092_vm2, %v4244_v16, %v8602_v55  ;;  %v4354_v11 = vsel %vm1125_vm3, %v4294_v62, %v8551_v26  ;;  %v3366_v55 = vsel %vm1092_vm2, %v3334_v20, %v8501_v19  ;;  %v8683_v19 = vld [vmem:[%s8972_s2] ss:$0 sm:$0xff]  ;;  %v9275_v16 = vld [vmem:[#allocation47_spill] sm:$0xff] }
 0x2d9   : > { %v3505_v22 = vadd.f32 %v8114_v59, %v3504_v43  ;;  %v4356_v31 = vsel %vm1125_vm3, %v4296_v57, %v8578_v23  ;;  %v4485_v28 = vshll.u32 %v4354_v11, 16  ;;  %v3408_v29 = vsel %vm1125_vm3, %v3366_v55, %v8608_v33 }
 0x2da   : > { %v8637_v30 = vpop.f32.mrf.mxu3  ;;  %v4705_v39 = vmax.f32 %v4629_v15, 0.0  ;;  %v4489_v52 = vshll.u32 %v4356_v31, 16  ;;  %v4483_v23 = vshrl.u32 %v4354_v11, 16  ;;  %v4246_v33 = vsel %vm1059_vm1, %v6724_v46, %v3878_v13 }
 0x2db   : > { %3543 = vmatmul.bf16.gmra.mxu0 %v3405_v17  ;;  %v3581_v12 = vmax.f32 %v3505_v22, 0.0  ;;  %v8671_v6 = vpop.permute.xlu2 %3883  ;;  %v4487_v47 = vrot.slane %v4485_v28, 1 }
 0x2dc   : > { %v8641_v51 = vpop.permute.xlu1 %4181  ;;  %v4491_v22 = vrot.slane %v4489_v52, 1 }
 0x2df   : > { %v4630_v10 = vpop.f32.mrf.mxu2  ;;  %v3880_v40 = vpop.permute.xlu0 %3879 }
 0x2e0   : > { %v4631_v58 = vadd.f32 %v8114_v59, %v4630_v10  ;;  %v3506_v4 = vpop.f32.mrf.mxu0 }
 0x2e1   : > { %v3507_v24 = vadd.f32 %v8114_v59, %v3506_v4 }
 0x2e2   : > { %v4706_v36 = vmax.f32 %v4631_v58, 0.0  ;;  %v8655_v35 = vpop.f32.mrf.mxu3 }
 0x2e3   : > { %v3582_v27 = vmax.f32 %v3507_v24, 0.0  ;;  %v4488_v24 = vor.u32 %v4487_v47, %v4483_v23  ;;  %v3920_v20 = vpop.permute.xlu2 %3919 }
 0x2e4   : > { %v4184_v2 = vpop.permute.xlu1 %4183  ;;  %4672 = vmatmul.bf16.gmra.mxu2 %v4482_v25  ;;  %v4736_v21 = vpack.c.bf16 %v4706_v36, %v4705_v39  ;;  %v4248_v39 = vsel %vm1059_vm1, %v9275_v16, %v3880_v40 }
 0x2e5   : > { %v3612_v53 = vpack.c.bf16 %v3582_v27, %v3581_v12  ;;  %v4297_v27 = vsel %vm1092_vm2, %v4246_v33, %v8604_v1  ;;  %v4492_v13 = vsel %vm450_vm0, %v4488_v24, %v4491_v22 }
 0x2e6   : > { %v4358_v31 = vsel %vm1125_vm3, %v4297_v27, %v8641_v51 }
 0x2e7   : > { %3705 = vmatmul.bf16.gmra.mxu1 %v3612_v53  ;;  %v4633_v43 = vpop.f32.mrf.mxu2  ;;  %4829 = vmatmul.bf16.gmra.mxu3 %v4736_v21  ;;  %v3918_v56 = vpop.permute.xlu0 %3917  ;;  %v3336_v53 = vsel %vm1059_vm1, %v5967_v60, %v8622_v5  ;;  %v4495_v60 = vshll.u32 %v4358_v31, 16  ;;  %v4493_v51 = vshrl.u32 %v4358_v31, 16 }
 0x2e8   : > { %v3509_v17 = vpop.f32.mrf.mxu0  ;;  %v4634_v38 = vadd.f32 %v8114_v59, %v4633_v43  ;;  %v4299_v40 = vsel %vm1092_vm2, %v4248_v39, %v3918_v56  ;;  %v3368_v55 = vsel %vm1092_vm2, %v3336_v53, %v8592_v9  ;;  %v4252_v39 = vsel %vm1059_vm1, %v9259_v48, %v8671_v6 }
 0x2e9   : > { %v3510_v10 = vadd.f32 %v8683_v19, %v3509_v17  ;;  %v3411_v56 = vsel %vm1125_vm3, %v3368_v55, %v8631_v14  ;;  %v4497_v23 = vrot.slane %v4495_v60, 1 }
 0x2ea   : > { %v8673_v15 = vpop.f32.mrf.mxu3  ;;  %v4707_v36 = vmax.f32 %v4634_v38, 0.0 }
 0x2eb   : > { %3548 = vmatmul.bf16.gmra.mxu0 %v3408_v29  ;;  %v3583_v25 = vmax.f32 %v3510_v10, 0.0  ;;  %v4360_v29 = vsel %vm1125_vm3, %v4299_v40, %v4184_v2  ;;  %v8711_v22 = vpop.permute.xlu2 %2923  ;;  %v4498_v24 = vor.u32 %v4497_v23, %v4493_v51  ;;  %v4302_v40 = vsel %vm1092_vm2, %v4252_v39, %v3920_v20 }
 0x2ec   : > { %v8677_v26 = vpop.permute.xlu1 %3035  ;;  %v4499_v47 = vshll.u32 %v4360_v29, 16 }
 0x2ee   : > { %v4501_v9 = vrot.slane %v4499_v47, 1 }
 0x2ef   : > { %v4635_v18 = vpop.f32.mrf.mxu2  ;;  %v8686_v58 = vpop.permute.xlu0 %2921 }
 0x2f0   : > { %v4636_v4 = vadd.f32 %v8683_v19, %v4635_v18  ;;  %v3511_v49 = vpop.f32.mrf.mxu0  ;;  %v4502_v53 = vsel %vm450_vm0, %v4498_v24, %v4501_v9  ;;  %v3338_v48 = vsel %vm1059_vm1, %v6724_v46, %v8686_v58 }
 0x2f1   : > { %v3512_v59 = vadd.f32 %v8683_v19, %v3511_v49  ;;  %v3370_v20 = vsel %vm1092_vm2, %v3338_v48, %v8604_v1 }
 0x2f2   : > { %v4708_v62 = vmax.f32 %v4636_v4, 0.0  ;;  %v8694_v12 = vpop.f32.mrf.mxu3  ;;  %v5969_v4 = vld [vmem:[%s6077_s23 + $0xa8] sm:$0xff]  }
 0x2f3   : > { %v3584_v21 = vmax.f32 %v3512_v59, 0.0  ;;  %v4250_v49 = vsel %vm1059_vm1, %v5969_v4, %v8648_v3  ;;  %v4190_v55 = vpop.permute.xlu2 %4189 }
 0x2f4   : > { %v3306_v57 = vpop.permute.xlu1 %3305  ;;  %4677 = vmatmul.bf16.gmra.mxu2 %v4492_v13  ;;  %v4737_v11 = vpack.c.bf16 %v4708_v62, %v4707_v36 }
 0x2f5   : > { %v3613_v43 = vpack.c.bf16 %v3584_v21, %v3583_v25  ;;  %v4300_v25 = vsel %vm1092_vm2, %v4250_v49, %v8677_v26  ;;  %v3414_v47 = vsel %vm1125_vm3, %v3370_v20, %v3306_v57 }
 0x2f7   : > { %3710 = vmatmul.bf16.gmra.mxu1 %v3613_v43  ;;  %v4638_v17 = vpop.f32.mrf.mxu2  ;;  %4834 = vmatmul.bf16.gmra.mxu3 %v4737_v11  ;;  %v4186_v28 = vpop.permute.xlu0 %4185 }
 0x2f8   : > { %v3514_v5 = vpop.f32.mrf.mxu0  ;;  %v4639_v10 = vadd.f32 %v8683_v19, %v4638_v17  ;;  %v4362_v6 = vsel %vm1125_vm3, %v4300_v25, %v4186_v28 }
 0x2f9   : > { %v3515_v2 = vadd.f32 %v8683_v19, %v3514_v5  ;;  %v4505_v60 = vshll.u32 %v4362_v6, 16  ;;  %v4503_v23 = vshrl.u32 %v4362_v6, 16 }
 0x2fa   : > { %v8707_v52 = vpop.f32.mrf.mxu3  ;;  %v4709_v36 = vmax.f32 %v4639_v10, 0.0 }
 0x2fb   : > { %3553 = vmatmul.bf16.gmra.mxu0 %v3411_v56  ;;  %v3585_v21 = vmax.f32 %v3515_v2, 0.0  ;;  %v4507_v28 = vrot.slane %v4505_v60, 1 }
 0x2fc   : > { %v3886_v38 = vpop.permute.xlu1 %3885 }
 0x2ff   : > { %v4640_v18 = vpop.f32.mrf.mxu2  ;;  %v4188_v33 = vpop.permute.xlu0 %4187 }
 0x300   : > { %v4641_v14 = vadd.f32 %v8683_v19, %v4640_v18  ;;  %v3516_v59 = vpop.f32.mrf.mxu0  ;;  %v4364_v29 = vsel %vm1125_vm3, %v4302_v40, %v4188_v33  ;;  %v9276_v33 = vld [vmem:[#allocation53_spill] sm:$0xff] }
 0x301   : > { %v3517_v16 = vadd.f32 %v8683_v19, %v3516_v59  ;;  %v4509_v46 = vshll.u32 %v4364_v29, 16  ;;  %v4254_v49 = vsel %vm1059_vm1, %v9276_v33, %v3886_v38  ;;  %v4508_v59 = vor.u32 %v4507_v28, %v4503_v23 }
 0x302   : > { %v4710_v62 = vmax.f32 %v4641_v14, 0.0  ;;  %v8723_v27 = vpop.f32.mrf.mxu3 }
 0x303   : > { %v3586_v13 = vmax.f32 %v3517_v16, 0.0  ;;  %v4511_v10 = vrot.slane %v4509_v46, 1  ;;  %v4192_v16 = vpop.permute.xlu2 %4191 }
 0x304   : > { %v3888_v3 = vpop.permute.xlu1 %3887  ;;  %4682 = vmatmul.bf16.gmra.mxu2 %v4502_v53  ;;  %v4738_v11 = vpack.c.bf16 %v4710_v62, %v4709_v36 }
 0x305   : > { %v3614_v43 = vpack.c.bf16 %v3586_v13, %v3585_v21  ;;  %v4256_v24 = vsel %vm1059_vm1, %v9267_v54, %v3888_v3  ;;  %v4512_v38 = vsel %vm450_vm0, %v4508_v59, %v4511_v10  ;;  %v3340_v54 = vsel %vm1059_vm1, %v5969_v4, %v8711_v22 }
 0x306   : > { %v3372_v60 = vsel %vm1092_vm2, %v3340_v54, %v8677_v26 }
 0x307   : > { %3715 = vmatmul.bf16.gmra.mxu1 %v3614_v43  ;;  %v4643_v31 = vpop.f32.mrf.mxu2  ;;  %4839 = vmatmul.bf16.gmra.mxu3 %v4738_v11  ;;  %v8733_v17 = vpop.permute.xlu0 %3037 }
 0x308   : > { %v3519_v5 = vpop.f32.mrf.mxu0  ;;  %v4644_v51 = vadd.f32 %v8683_v19, %v4643_v31  ;;  %v4303_v25 = vsel %vm1092_vm2, %v4254_v49, %v8733_v17 }
 0x309   : > { %v3520_v9 = vadd.f32 %v8683_v19, %v3519_v5  ;;  %v4366_v3 = vsel %vm1125_vm3, %v4303_v25, %v4190_v55 }
 0x30a   : > { %v8738_v56 = vpop.f32.mrf.mxu3  ;;  %v4711_v39 = vmax.f32 %v4644_v51, 0.0  ;;  %v4515_v5 = vshll.u32 %v4366_v3, 16  ;;  %v4513_v28 = vshrl.u32 %v4366_v3, 16 }
 0x30b   : > { %3558 = vmatmul.bf16.gmra.mxu0 %v3414_v47  ;;  %v3587_v21 = vmax.f32 %v3520_v9, 0.0  ;;  %v8764_v4 = vpop.permute.xlu2 %3039 }
 0x30c   : > { %v3922_v58 = vpop.permute.xlu1 %3921  ;;  %v4517_v55 = vrot.slane %v4515_v5, 1 }
 0x30d   : > { %v4305_v11 = vsel %vm1092_vm2, %v4256_v24, %v3922_v58 }
 0x30e   : > { %v4368_v31 = vsel %vm1125_vm3, %v4305_v11, %v4192_v16 }
 0x30f   : > { %v4645_v2 = vpop.f32.mrf.mxu2  ;;  %v3308_v18 = vpop.permute.xlu0 %3307  ;;  %v4519_v22 = vshll.u32 %v4368_v31, 16 }
 0x310   : > { %v4646_v1 = vadd.f32 %v8683_v19, %v4645_v2  ;;  %v3521_v14 = vpop.f32.mrf.mxu0  ;;  %v3417_v47 = vsel %vm1125_vm3, %v3372_v60, %v3308_v18  ;;  %v5970_v2 = vld [vmem:[%s6077_s23 + $0xc0] sm:$0xff]  }
 0x311   : > { %v3522_v57 = vadd.f32 %v8683_v19, %v3521_v14  ;;  %v4521_v51 = vrot.slane %v4519_v22, 1  ;;  %v4518_v14 = vor.u32 %v4517_v55, %v4513_v28 }
 0x312   : > { %v4712_v36 = vmax.f32 %v4646_v1, 0.0  ;;  %v8749_v62 = vpop.f32.mrf.mxu3 }
 0x313   : > { %v3588_v13 = vmax.f32 %v3522_v57, 0.0  ;;  %v4522_v25 = vsel %vm450_vm0, %v4518_v14, %v4521_v51  ;;  %v3310_v11 = vpop.permute.xlu2 %3309 }
 0x314   : > { %v4739_v53 = vpack.c.bf16 %v4712_v36, %v4711_v39  ;;  %4687 = vmatmul.bf16.gmra.mxu2 %v4512_v38  ;;  %v2926_v43 = vpop.permute.xlu1 %2925 }
 0x315   : > { %v3615_v40 = vpack.c.bf16 %v3588_v13, %v3587_v21  ;;  %v3342_v21 = vsel %vm1059_vm1, %v9276_v33, %v2926_v43 }
 0x317   : > { %3720 = vmatmul.bf16.gmra.mxu1 %v3615_v40  ;;  %v4648_v48 = vpop.f32.mrf.mxu2  ;;  %4844 = vmatmul.bf16.gmra.mxu3 %v4739_v53  ;;  %v3890_v6 = vpop.permute.xlu0 %3889 }
 0x318   : > { %v3524_v29 = vpop.f32.mrf.mxu0  ;;  %v4649_v46 = vadd.f32 %v8683_v19, %v4648_v48  ;;  %v4258_v26 = vsel %vm1059_vm1, %v5970_v2, %v3890_v6  ;;  %v3374_v6 = vsel %vm1092_vm2, %v3342_v21, %v8733_v17 }
 0x319   : > { %v3525_v23 = vadd.f32 %v8683_v19, %v3524_v29  ;;  %v4306_v39 = vsel %vm1092_vm2, %v4258_v26, %v8764_v4 }
 0x31a   : > { %v8761_v20 = vpop.f32.mrf.mxu3  ;;  %v4713_v59 = vmax.f32 %v4649_v46, 0.0 }
 0x31b   : > { %3563 = vmatmul.bf16.gmra.mxu0 %v3417_v47  ;;  %v3589_v16 = vmax.f32 %v3525_v23, 0.0 }
 0x31c   : > { %v4194_v58 = vpop.permute.xlu1 %4193 }
 0x31d   : > { %v4370_v40 = vsel %vm1125_vm3, %v4306_v39, %v4194_v58 }
 0x31e   : > { %v4525_v43 = vshll.u32 %v4370_v40, 16  ;;  %v4523_v47 = vshrl.u32 %v4370_v40, 16 }
 0x31f   : > { %v4650_v10 = vpop.f32.mrf.mxu2  ;;  %v3892_v9 = vpop.permute.xlu0 %3891 }
 0x320   : > { %v4651_v49 = vadd.f32 %v8683_v19, %v4650_v10  ;;  %v3526_v18 = vpop.f32.mrf.mxu0  ;;  %v4260_v38 = vsel %vm1059_vm1, %v9272_v8, %v3892_v9  ;;  %v3420_v8 = vsel %vm1125_vm3, %v3374_v6, %v3310_v11  ;;  %v4527_v22 = vrot.slane %v4525_v43, 1 }
 0x321   : > { %v3527_v1 = vadd.f32 %v8683_v19, %v3526_v18  ;;  %v2928_v18 = vpop.permute.xlu2 %2927 }
 0x322   : > { %v4714_v57 = vmax.f32 %v4651_v49, 0.0  ;;  %v8772_v24 = vpop.f32.mrf.mxu3  ;;  %v4528_v23 = vor.u32 %v4527_v22, %v4523_v47  ;;  %v3344_v39 = vsel %vm1059_vm1, %v5970_v2, %v2928_v18 }
 0x323   : > { %v3590_v36 = vmax.f32 %v3527_v1, 0.0 }
 0x324   : > { %v4740_v13 = vpack.c.bf16 %v4714_v57, %v4713_v59  ;;  %4692 = vmatmul.bf16.gmra.mxu2 %v4522_v25  ;;  %v4196_v54 = vpop.permute.xlu1 %4195 }
 0x325   : > { %v3616_v53 = vpack.c.bf16 %v3590_v36, %v3589_v16 }
 0x327   : > { %3725 = vmatmul.bf16.gmra.mxu1 %v3616_v53  ;;  %v4653_v3 = vpop.f32.mrf.mxu2  ;;  %4849 = vmatmul.bf16.gmra.mxu3 %v4740_v13  ;;  %v3924_v48 = vpop.permute.xlu0 %3923  ;;  %v3376_v13 = vsel %vm1092_vm2, %v3344_v39, %v8764_v4 }
 0x328   : > { %v4308_v31 = vsel %vm1092_vm2, %v4260_v38, %v3924_v48  ;;  %v3529_v33 = vpop.f32.mrf.mxu0  ;;  %v4654_v55 = vadd.f32 %v8683_v19, %v4653_v3 }
 0x329   : > { %v4372_v29 = vsel %vm1125_vm3, %v4308_v31, %v4196_v54  ;;  %v3530_v58 = vadd.f32 %v8683_v19, %v3529_v33 }
 0x32a   : > { %v8786_v5 = vpop.f32.mrf.mxu3  ;;  %v4529_v60 = vshll.u32 %v4372_v29, 16  ;;  %v4715_v9 = vmax.f32 %v4654_v55, 0.0 }
 0x32b   : > { %3568 = vmatmul.bf16.gmra.mxu0 %v3420_v8  ;;  %v3591_v1 = vmax.f32 %v3530_v58, 0.0 }
 0x32c   : > { %v4531_v46 = vrot.slane %v4529_v60, 1 }
 0x32e   : > { %v4532_v59 = vsel %vm450_vm0, %v4528_v23, %v4531_v46 }
 0x32f   : > { %v4655_v17 = vpop.f32.mrf.mxu2  ;;  %v3312_v36 = vpop.permute.xlu0 %3311 }
 0x330   : > { %v4656_v28 = vadd.f32 %v8683_v19, %v4655_v17  ;;  %v3531_v51 = vpop.f32.mrf.mxu0  ;;  %v3423_v53 = vsel %vm1125_vm3, %v3376_v13, %v3312_v36 }
 0x331   : > { %v3532_v10 = vadd.f32 %v8683_v19, %v3531_v51 }
 0x332   : > { %v4716_v26 = vmax.f32 %v4656_v28, 0.0  ;;  %v8793_v49 = vpop.f32.mrf.mxu3 }
 0x333   : > { %v3592_v14 = vmax.f32 %v3532_v10, 0.0 }
 0x334   : > { %v4741_v57 = vpack.c.bf16 %v4716_v26, %v4715_v9  ;;  %4697 = vmatmul.bf16.gmra.mxu2 %v4532_v59 }
 0x335   : > { %v3617_v16 = vpack.c.bf16 %v3592_v14, %v3591_v1 }
 0x337   : > { %3730 = vmatmul.bf16.gmra.mxu1 %v3617_v16  ;;  %v4658_v25 = vpop.f32.mrf.mxu2  ;;  %4854 = vmatmul.bf16.gmra.mxu3 %v4741_v57 }
 0x338   : > { %v3534_v21 = vpop.f32.mrf.mxu0  ;;  %v4659_v11 = vadd.f32 %v8683_v19, %v4658_v25  ;;  %v9277_v25 = vld [vmem:[#allocation18_spill] sm:$0xff] }
 0x339   : > { %v3535_v40 = vadd.f32 %v8683_v19, %v3534_v21  ;;  %v9278_v21 = vld [vmem:[#allocation8_spill] sm:$0xff] }
 0x33a   : > { %v8799_v38 = vpop.f32.mrf.mxu3  ;;  %v4717_v6 = vmax.f32 %v4659_v11, 0.0  ;;  %v2769_v13 = vadd.f32 %v9278_v21, %v9277_v25  ;;  %v9279_v11 = vld [vmem:[#allocation22_spill] sm:$0xff]  ;;  %v9283_v21 = vld [vmem:[#allocation31_spill] sm:$0xff] }
 0x33b   : > { %3573 = vmatmul.bf16.gmra.mxu0 %v3423_v53  ;;  %v3593_v4 = vmax.f32 %v3535_v40, 0.0  ;;  %v9280_v40 = vld [vmem:[#allocation46_spill] sm:$0xff] }
 0x33f   : > { %v4660_v54 = vpop.f32.mrf.mxu2 }
 0x340   : > { %v4661_v2 = vadd.f32 %v8683_v19, %v4660_v54  ;;  %v3536_v3 = vpop.f32.mrf.mxu0  ;;  %v2771_v54 = vadd.f32 %v9280_v40, %v9279_v11 }
 0x341   : > { %v3537_v48 = vadd.f32 %v8683_v19, %v3536_v3 }
 0x342   : > { %v4718_v31 = vmax.f32 %v4661_v2, 0.0  ;;  %v8806_v33 = vpop.f32.mrf.mxu3 }
 0x343   : > { %v3594_v43 = vmax.f32 %v3537_v48, 0.0 }
 0x344   : > { %v4742_v29 = vpack.c.bf16 %v4718_v31, %v4717_v6 }
 0x345   : > { %v3618_v8 = vpack.c.bf16 %v3594_v43, %v3593_v4  ;;  %v8826_v43 = vld [vmem:[%s8974_s4] ss:$0 sm:$0xff] }
 0x347   : > { %3735 = vmatmul.bf16.gmra.mxu1 %v3618_v8  ;;  %v4663_v60 = vpop.f32.mrf.mxu2  ;;  %4859 = vmatmul.bf16.gmra.mxu3 %v4742_v29 }
 0x348   : > { %v3539_v47 = vpop.f32.mrf.mxu0  ;;  %v4664_v55 = vadd.f32 %v8683_v19, %v4663_v60 }
 0x349   : > { %v3540_v46 = vadd.f32 %v8683_v19, %v3539_v47 }
 0x34a   : > { %v8808_v22 = vpop.f32.mrf.mxu3  ;;  %v4719_v23 = vmax.f32 %v4664_v55, 0.0 }
 0x34b   : > { %v3595_v26 = vmax.f32 %v3540_v46, 0.0 }
 0x34f   : > { %v4665_v58 = vpop.f32.mrf.mxu2 }
 0x350   : > { %v4666_v17 = vadd.f32 %v8683_v19, %v4665_v58  ;;  %v3541_v28 = vpop.f32.mrf.mxu0 }
 0x351   : > { %v3542_v51 = vadd.f32 %v8683_v19, %v3541_v28 }
 0x352   : > { %v4720_v10 = vmax.f32 %v4666_v17, 0.0  ;;  %v8814_v9 = vpop.f32.mrf.mxu3 }
 0x353   : > { %v3596_v18 = vmax.f32 %v3542_v51, 0.0 }
 0x354   : > { %v4743_v1 = vpack.c.bf16 %v4720_v10, %v4719_v23  ;;  %v3701_v14 = vpop.f32.mrf.mxu1 }
 0x355   : > { %v3619_v59 = vpack.c.bf16 %v3596_v18, %v3595_v26  ;;  %v3781_v2 = vadd.f32 %v3701_v14, %v2769_v13  ;;  %v9284_v13 = vld [vmem:[#allocation14_spill] sm:$0xff] }
 0x357   : > { %3740 = vmatmul.bf16.gmra.mxu1 %v3619_v59  ;;  %v4668_v57 = vpop.f32.mrf.mxu2  ;;  %4864 = vmatmul.bf16.gmra.mxu3 %v4743_v1 }
 0x358   : > { %v3544_v16 = vpop.f32.mrf.mxu0  ;;  %v4669_v53 = vadd.f32 %v8683_v19, %v4668_v57 }
 0x359   : > { %v3545_v3 = vadd.f32 %v8683_v19, %v3544_v16  ;;  %v9281_v16 = vld [vmem:[#allocation29_spill] sm:$0xff] }
 0x35a   : > { %v4825_v39 = vpop.f32.mrf.mxu3  ;;  %v4721_v60 = vmax.f32 %v4669_v53, 0.0  ;;  %v2776_v53 = vadd.f32 %v9284_v13, %v9283_v21 }
 0x35b   : > { %v4905_v4 = vadd.f32 %v4825_v39, %v3781_v2  ;;  %v3597_v46 = vmax.f32 %v3545_v3, 0.0  ;;  %v9282_v39 = vld [vmem:[#allocation48_spill] sm:$0xff] }
 0x35c   : > { %v3703_v36 = vpop.f32.mrf.mxu1 }
 0x35d   : > { %v3782_v29 = vadd.f32 %v3703_v36, %v2771_v54  ;;  %v4941_v23 = vadd.f32 %v8826_v43, %v4905_v4  ;;  %v2774_v36 = vadd.f32 %v9282_v39, %v9281_v16  ;;  %v9287_v39 = vld [vmem:[#allocation24_spill] sm:$0xff] }
 0x35f   : > { %v4670_v48 = vpop.f32.mrf.mxu2 }
 0x360   : > { %v4671_v6 = vadd.f32 %v8683_v19, %v4670_v48  ;;  %v3546_v31 = vpop.f32.mrf.mxu0 }
 0x361   : > { %v3547_v8 = vadd.f32 %v8683_v19, %v3546_v31 }
 0x362   : > { %v4722_v47 = vmax.f32 %v4671_v6, 0.0  ;;  %v4827_v55 = vpop.f32.mrf.mxu3 }
 0x363   : > { %v3598_v58 = vmax.f32 %v3547_v8, 0.0  ;;  %v4906_v17 = vadd.f32 %v4827_v55, %v3782_v29 }
 0x364   : > { %v4744_v28 = vpack.c.bf16 %v4722_v47, %v4721_v60  ;;  %v3706_v51 = vpop.f32.mrf.mxu1 }
 0x365   : > { %v3620_v10 = vpack.c.bf16 %v3598_v58, %v3597_v46  ;;  %v4942_v26 = vadd.f32 %v8826_v43, %v4906_v17  ;;  %v3783_v11 = vadd.f32 %v3706_v51, %v2774_v36  ;;  %v9288_v36 = vld [vmem:[#allocation57_spill] sm:$0xff] }
 0x367   : > { %v5746_v18 = vpack.c.bf16 %v4942_v26, %v4941_v23  ;;  %3745 = vmatmul.bf16.gmra.mxu1 %v3620_v10  ;;  %v4673_v1 = vpop.f32.mrf.mxu2  ;;  %4869 = vmatmul.bf16.gmra.mxu3 %v4744_v28 }
 0x368   : > { %v3549_v14 = vpop.f32.mrf.mxu0  ;;  %v4674_v25 = vadd.f32 %v8683_v19, %v4673_v1 }
 0x369   : > { %5747 = vst [vmem:[%s8835_s6] sm:$0xff] %v5746_v18   ;;  %v3550_v40 = vadd.f32 %v8683_v19, %v3549_v14  ;;  %v9285_v14 = vld [vmem:[#allocation26_spill] sm:$0xff] }
 0x36a   : > { %v4830_v59 = vpop.f32.mrf.mxu3  ;;  %v4723_v4 = vmax.f32 %v4674_v25, 0.0  ;;  %v2781_v25 = vadd.f32 %v9288_v36, %v9287_v39 }
 0x36b   : > { %v4907_v48 = vadd.f32 %v4830_v59, %v3783_v11  ;;  %v3599_v60 = vmax.f32 %v3550_v40, 0.0  ;;  %v9286_v59 = vld [vmem:[#allocation50_spill] sm:$0xff] }
 0x36c   : > { %v3708_v57 = vpop.f32.mrf.mxu1 }
 0x36d   : > { %v3784_v6 = vadd.f32 %v3708_v57, %v2776_v53  ;;  %v4943_v17 = vadd.f32 %v8826_v43, %v4907_v48  ;;  %v2779_v57 = vadd.f32 %v9286_v59, %v9285_v14  ;;  %v9291_v59 = vld [vmem:[#allocation4_spill] sm:$0xff] }
 0x36f   : > { %v4675_v54 = vpop.f32.mrf.mxu2 }
 0x370   : > { %v4676_v2 = vadd.f32 %v8683_v19, %v4675_v54  ;;  %v3551_v3 = vpop.f32.mrf.mxu0 }
 0x371   : > { %v3552_v31 = vadd.f32 %v8683_v19, %v3551_v3 }
 0x372   : > { %v4724_v29 = vmax.f32 %v4676_v2, 0.0  ;;  %v4832_v8 = vpop.f32.mrf.mxu3 }
 0x373   : > { %v3600_v47 = vmax.f32 %v3552_v31, 0.0  ;;  %v4908_v55 = vadd.f32 %v4832_v8, %v3784_v6 }
 0x374   : > { %v4745_v46 = vpack.c.bf16 %v4724_v29, %v4723_v4  ;;  %v3711_v58 = vpop.f32.mrf.mxu1 }
 0x375   : > { %v3621_v28 = vpack.c.bf16 %v3600_v47, %v3599_v60  ;;  %v4944_v51 = vadd.f32 %v8826_v43, %v4908_v55  ;;  %v3785_v21 = vadd.f32 %v3711_v58, %v2779_v57  ;;  %v9292_v57 = vld [vmem:[#allocation60_spill] sm:$0xff] }
 0x377   : > { %v5751_v23 = vpack.c.bf16 %v4944_v51, %v4943_v17  ;;  %3750 = vmatmul.bf16.gmra.mxu1 %v3621_v28  ;;  %v4678_v10 = vpop.f32.mrf.mxu2  ;;  %4874 = vmatmul.bf16.gmra.mxu3 %v4745_v46 }
 0x378   : > { %v3554_v26 = vpop.f32.mrf.mxu0  ;;  %v4679_v16 = vadd.f32 %v8683_v19, %v4678_v10 }
 0x379   : > { %5918 = vst [vmem:[%s8835_s6 + $0x8] sm:$0xff] %v5751_v23   ;;  %v3555_v13 = vadd.f32 %v8683_v19, %v3554_v26  ;;  %v9289_v26 = vld [vmem:[#allocation34_spill] sm:$0xff] }
 0x37a   : > { %v4835_v18 = vpop.f32.mrf.mxu3  ;;  %v4725_v48 = vmax.f32 %v4679_v16, 0.0  ;;  %v2786_v16 = vadd.f32 %v9292_v57, %v9291_v59 }
 0x37b   : > { %v4909_v54 = vadd.f32 %v4835_v18, %v3785_v21  ;;  %v3601_v4 = vmax.f32 %v3555_v13, 0.0  ;;  %v9290_v18 = vld [vmem:[#allocation58_spill] sm:$0xff] }
 0x37c   : > { %v3713_v1 = vpop.f32.mrf.mxu1 }
 0x37d   : > { %v3786_v2 = vadd.f32 %v3713_v1, %v2781_v25  ;;  %v4945_v55 = vadd.f32 %v8826_v43, %v4909_v54  ;;  %v2784_v1 = vadd.f32 %v9290_v18, %v9289_v26  ;;  %v9294_v26 = vld [vmem:[#allocation38_spill] sm:$0xff] }
 0x37e   : > { %v2791_v18 = vadd.f32 %v8451_v37, %v9294_v26 }
 0x37f   : > { %v4680_v53 = vpop.f32.mrf.mxu2 }
 0x380   : > { %v4681_v11 = vadd.f32 %v8683_v19, %v4680_v53  ;;  %v3556_v40 = vpop.f32.mrf.mxu0 }
 0x381   : > { %v3557_v3 = vadd.f32 %v8683_v19, %v3556_v40 }
 0x382   : > { %v4726_v6 = vmax.f32 %v4681_v11, 0.0  ;;  %v4837_v31 = vpop.f32.mrf.mxu3 }
 0x383   : > { %v3602_v29 = vmax.f32 %v3557_v3, 0.0  ;;  %v4910_v8 = vadd.f32 %v4837_v31, %v3786_v2 }
 0x384   : > { %v4746_v60 = vpack.c.bf16 %v4726_v6, %v4725_v48  ;;  %v3716_v47 = vpop.f32.mrf.mxu1 }
 0x385   : > { %v3622_v46 = vpack.c.bf16 %v3602_v29, %v3601_v4  ;;  %v4946_v58 = vadd.f32 %v8826_v43, %v4910_v8  ;;  %v3787_v39 = vadd.f32 %v3716_v47, %v2784_v1 }
 0x387   : > { %v5756_v17 = vpack.c.bf16 %v4946_v58, %v4945_v55  ;;  %3755 = vmatmul.bf16.gmra.mxu1 %v3622_v46  ;;  %v4683_v28 = vpop.f32.mrf.mxu2  ;;  %4879 = vmatmul.bf16.gmra.mxu3 %v4746_v60 }
 0x388   : > { %v3559_v51 = vpop.f32.mrf.mxu0  ;;  %v4684_v14 = vadd.f32 %v8683_v19, %v4683_v28 }
 0x389   : > { %5919 = vst [vmem:[%s8835_s6 + $0x10] sm:$0xff] %v5756_v17   ;;  %v3560_v36 = vadd.f32 %v8683_v19, %v3559_v51  ;;  %v9293_v51 = vld [vmem:[#allocation3_spill] sm:$0xff] }
 0x38a   : > { %v4840_v23 = vpop.f32.mrf.mxu3  ;;  %v4727_v54 = vmax.f32 %v4684_v14, 0.0 }
 0x38b   : > { %v4911_v53 = vadd.f32 %v4840_v23, %v3787_v39  ;;  %v3603_v48 = vmax.f32 %v3560_v36, 0.0  ;;  %v2789_v23 = vadd.f32 %v8410_v45, %v9293_v51 }
 0x38c   : > { %v3718_v10 = vpop.f32.mrf.mxu1 }
 0x38d   : > { %v3788_v11 = vadd.f32 %v3718_v10, %v2786_v16  ;;  %v4947_v8 = vadd.f32 %v8826_v43, %v4911_v53 }
 0x38f   : > { %v4685_v25 = vpop.f32.mrf.mxu2 }
 0x390   : > { %v4686_v21 = vadd.f32 %v8683_v19, %v4685_v25  ;;  %v3561_v13 = vpop.f32.mrf.mxu0 }
 0x391   : > { %v3562_v40 = vadd.f32 %v8683_v19, %v3561_v13 }
 0x392   : > { %v4728_v2 = vmax.f32 %v4686_v21, 0.0  ;;  %v4842_v3 = vpop.f32.mrf.mxu3 }
 0x393   : > { %v3604_v6 = vmax.f32 %v3562_v40, 0.0  ;;  %v4912_v31 = vadd.f32 %v4842_v3, %v3788_v11 }
 0x394   : > { %v4747_v4 = vpack.c.bf16 %v4728_v2, %v4727_v54  ;;  %v3721_v29 = vpop.f32.mrf.mxu1 }
 0x395   : > { %v3623_v60 = vpack.c.bf16 %v3604_v6, %v3603_v48  ;;  %v4948_v47 = vadd.f32 %v8826_v43, %v4912_v31  ;;  %v3789_v1 = vadd.f32 %v3721_v29, %v2789_v23 }
 0x397   : > { %v5761_v55 = vpack.c.bf16 %v4948_v47, %v4947_v8  ;;  %3760 = vmatmul.bf16.gmra.mxu1 %v3623_v60  ;;  %v4688_v46 = vpop.f32.mrf.mxu2  ;;  %4884 = vmatmul.bf16.gmra.mxu3 %v4747_v4  ;;  %v9295_v60 = vld [vmem:[#allocation7_spill] sm:$0xff] }
 0x398   : > { %v3564_v58 = vpop.f32.mrf.mxu0  ;;  %v4689_v10 = vadd.f32 %v8683_v19, %v4688_v46  ;;  %v2794_v47 = vadd.f32 %v8494_v34, %v9295_v60  ;;  %v9296_v46 = vld [vmem:[#allocation36_spill] sm:$0xff] }
 0x399   : > { %5920 = vst [vmem:[%s8835_s6 + $0x18] sm:$0xff] %v5761_v55   ;;  %v3565_v14 = vadd.f32 %v8683_v19, %v3564_v58  ;;  %v2796_v58 = vadd.f32 %v8526_v63, %v9296_v46 }
 0x39a   : > { %v4845_v17 = vpop.f32.mrf.mxu3  ;;  %v4729_v21 = vmax.f32 %v4689_v10, 0.0 }
 0x39b   : > { %v4913_v39 = vadd.f32 %v4845_v17, %v3789_v1  ;;  %v3605_v53 = vmax.f32 %v3565_v14, 0.0 }
 0x39c   : > { %v3723_v28 = vpop.f32.mrf.mxu1 }
 0x39d   : > { %v3790_v36 = vadd.f32 %v3723_v28, %v2791_v18  ;;  %v4949_v2 = vadd.f32 %v8826_v43, %v4913_v39 }
 0x39f   : > { %v4690_v59 = vpop.f32.mrf.mxu2 }
 0x3a0   : > { %v4691_v57 = vadd.f32 %v8683_v19, %v4690_v59  ;;  %v3566_v16 = vpop.f32.mrf.mxu0 }
 0x3a1   : > { %v3567_v25 = vadd.f32 %v8683_v19, %v3566_v16 }
 0x3a2   : > { %v4730_v13 = vmax.f32 %v4691_v57, 0.0  ;;  %v4847_v45 = vpop.f32.mrf.mxu3 }
 0x3a3   : > { %v3606_v11 = vmax.f32 %v3567_v25, 0.0  ;;  %v4914_v40 = vadd.f32 %v4847_v45, %v3790_v36 }
 0x3a4   : > { %v4748_v54 = vpack.c.bf16 %v4730_v13, %v4729_v21  ;;  %v3726_v37 = vpop.f32.mrf.mxu1 }
 0x3a5   : > { %v3624_v3 = vpack.c.bf16 %v3606_v11, %v3605_v53  ;;  %v4950_v48 = vadd.f32 %v8826_v43, %v4914_v40  ;;  %v3791_v17 = vadd.f32 %v3726_v37, %v2794_v47  ;;  %v9297_v37 = vld [vmem:[#allocation5_spill] sm:$0xff] }
 0x3a7   : > { %v5766_v6 = vpack.c.bf16 %v4950_v48, %v4949_v2  ;;  %3765 = vmatmul.bf16.gmra.mxu1 %v3624_v3  ;;  %v4693_v31 = vpop.f32.mrf.mxu2  ;;  %4889 = vmatmul.bf16.gmra.mxu3 %v4748_v54  ;;  %v2799_v2 = vadd.f32 %v8555_v32, %v9297_v37  ;;  %v9298_v48 = vld [vmem:[#allocation41_spill] sm:$0xff] }
 0x3a8   : > { %v3569_v4 = vpop.f32.mrf.mxu0  ;;  %v4694_v55 = vadd.f32 %v8683_v19, %v4693_v31 }
 0x3a9   : > { %5921 = vst [vmem:[%s8835_s6 + $0x20] sm:$0xff] %v5766_v6   ;;  %v3570_v28 = vadd.f32 %v8683_v19, %v3569_v4  ;;  %v2801_v6 = vadd.f32 %v8576_v41, %v9298_v48 }
 0x3aa   : > { %v4850_v29 = vpop.f32.mrf.mxu3  ;;  %v4731_v14 = vmax.f32 %v4694_v55, 0.0 }
 0x3ab   : > { %v4915_v26 = vadd.f32 %v4850_v29, %v3791_v17  ;;  %v3607_v57 = vmax.f32 %v3570_v28, 0.0 }
 0x3ac   : > { %v3728_v8 = vpop.f32.mrf.mxu1 }
 0x3ad   : > { %v3792_v18 = vadd.f32 %v3728_v8, %v2796_v58  ;;  %v4951_v25 = vadd.f32 %v8826_v43, %v4915_v26 }
 0x3af   : > { %v4695_v51 = vpop.f32.mrf.mxu2 }
 0x3b0   : > { %v4696_v23 = vadd.f32 %v8683_v19, %v4695_v51  ;;  %v3571_v10 = vpop.f32.mrf.mxu0 }
 0x3b1   : > { %v3572_v1 = vadd.f32 %v8683_v19, %v3571_v10 }
 0x3b2   : > { %v4732_v59 = vmax.f32 %v4696_v23, 0.0  ;;  %v4852_v34 = vpop.f32.mrf.mxu3 }
 0x3b3   : > { %v3608_v16 = vmax.f32 %v3572_v1, 0.0  ;;  %v4916_v39 = vadd.f32 %v4852_v34, %v3792_v18  ;;  %v9299_v34 = vld [vmem:[#allocation9_spill] sm:$0xff] }
 0x3b4   : > { %v4749_v36 = vpack.c.bf16 %v4732_v59, %v4731_v14  ;;  %v3731_v63 = vpop.f32.mrf.mxu1 }
 0x3b5   : > { %v3625_v21 = vpack.c.bf16 %v3608_v16, %v3607_v57  ;;  %v4952_v13 = vadd.f32 %v8826_v43, %v4916_v39  ;;  %v3793_v31 = vadd.f32 %v3731_v63, %v2799_v2  ;;  %v2804_v57 = vadd.f32 %v8598_v0, %v9299_v34  ;;  %v9300_v16 = vld [vmem:[#allocation45_spill] sm:$0xff]  ;;  %v9301_v2 = vld [vmem:[#allocation44_spill] sm:$0xff]  ;;  %v9305_v34 = vld [vmem:[#allocation10_spill] sm:$0xff] }
 0x3b6   : > { %v2806_v39 = vadd.f32 %v8618_v44, %v9300_v16  ;;  %v2809_v0 = vadd.f32 %v8637_v30, %v9301_v2 }
 0x3b7   : > { %v5771_v45 = vpack.c.bf16 %v4952_v13, %v4951_v25  ;;  %3770 = vmatmul.bf16.gmra.mxu1 %v3625_v21  ;;  %v4698_v53 = vpop.f32.mrf.mxu2  ;;  %4894 = vmatmul.bf16.gmra.mxu3 %v4749_v36 }
 0x3b8   : > { %v3574_v11 = vpop.f32.mrf.mxu0  ;;  %v4699_v3 = vadd.f32 %v8683_v19, %v4698_v53 }
 0x3b9   : > { %5922 = vst [vmem:[%s8835_s6 + $0x28] sm:$0xff] %v5771_v45   ;;  %v3575_v4 = vadd.f32 %v8683_v19, %v3574_v11 }
 0x3ba   : > { %v4855_v40 = vpop.f32.mrf.mxu3  ;;  %v4733_v58 = vmax.f32 %v4699_v3, 0.0  ;;  %v9302_v3 = vld [vmem:[#allocation42_spill] sm:$0xff] }
 0x3bb   : > { %v4917_v47 = vadd.f32 %v4855_v40, %v3793_v31  ;;  %v3609_v28 = vmax.f32 %v3575_v4, 0.0  ;;  %v2811_v44 = vadd.f32 %v8655_v35, %v9302_v3 }
 0x3bc   : > { %v3733_v54 = vpop.f32.mrf.mxu1 }
 0x3bd   : > { %v3794_v55 = vadd.f32 %v3733_v54, %v2801_v6  ;;  %v4953_v26 = vadd.f32 %v8826_v43, %v4917_v47 }
 0x3bf   : > { %v4700_v29 = vpop.f32.mrf.mxu2 }
 0x3c0   : > { %v4701_v8 = vadd.f32 %v8683_v19, %v4700_v29  ;;  %v3576_v60 = vpop.f32.mrf.mxu0 }
 0x3c1   : > { %v3577_v46 = vadd.f32 %v8683_v19, %v3576_v60 }
 0x3c2   : > { %v4734_v17 = vmax.f32 %v4701_v8, 0.0  ;;  %v4857_v32 = vpop.f32.mrf.mxu3 }
 0x3c3   : > { %v3610_v51 = vmax.f32 %v3577_v46, 0.0  ;;  %v4918_v23 = vadd.f32 %v4857_v32, %v3794_v55  ;;  %v9304_v32 = vld [vmem:[#allocation12_spill] sm:$0xff] }
 0x3c4   : > { %v4750_v10 = vpack.c.bf16 %v4734_v17, %v4733_v58  ;;  %v3736_v41 = vpop.f32.mrf.mxu1  ;;  %v9303_v17 = vld [vmem:[#allocation61_spill] sm:$0xff]  ;;  %v2816_v35 = vadd.f32 %v8694_v12, %v9304_v32 }
 0x3c5   : > { %v3626_v18 = vpack.c.bf16 %v3610_v51, %v3609_v28  ;;  %v4954_v1 = vadd.f32 %v8826_v43, %v4918_v23  ;;  %v3795_v36 = vadd.f32 %v3736_v41, %v2804_v57  ;;  %v2814_v30 = vadd.f32 %v8673_v15, %v9303_v17  ;;  %v9306_v57 = vld [vmem:[#allocation54_spill] sm:$0xff] }
 0x3c6   : > { %v2819_v15 = vadd.f32 %v8707_v52, %v9305_v34  ;;  %v2821_v12 = vadd.f32 %v8723_v27, %v9306_v57 }
 0x3c7   : > { %v5776_v14 = vpack.c.bf16 %v4954_v1, %v4953_v26  ;;  %3775 = vmatmul.bf16.gmra.mxu1 %v3626_v18  ;;  %4899 = vmatmul.bf16.gmra.mxu3 %v4750_v10 }
 0x3c9   : > { %5923 = vst [vmem:[%s8835_s6 + $0x30] sm:$0xff] %v5776_v14  }
 0x3ca   : > { %v4860_v59 = vpop.f32.mrf.mxu3 }
 0x3cb   : > { %v4919_v63 = vadd.f32 %v4860_v59, %v3795_v36 }
 0x3cc   : > { %v3738_v19 = vpop.f32.mrf.mxu1 }
 0x3cd   : > { %v3796_v25 = vadd.f32 %v3738_v19, %v2806_v39  ;;  %v4955_v53 = vadd.f32 %v8826_v43, %v4919_v63 }
 0x3d2   : > { %v4862_v21 = vpop.f32.mrf.mxu3 }
 0x3d3   : > { %v4920_v13 = vadd.f32 %v4862_v21, %v3796_v25 }
 0x3d4   : > { %v3741_v45 = vpop.f32.mrf.mxu1 }
 0x3d5   : > { %v4956_v11 = vadd.f32 %v8826_v43, %v4920_v13  ;;  %v3797_v48 = vadd.f32 %v3741_v45, %v2809_v0 }
 0x3d7   : > { %v5781_v40 = vpack.c.bf16 %v4956_v11, %v4955_v53 }
 0x3d9   : > { %5924 = vst [vmem:[%s8835_s6 + $0x38] sm:$0xff] %v5781_v40  }
 0x3da   : > { %v4865_v54 = vpop.f32.mrf.mxu3 }
 0x3db   : > { %v4921_v6 = vadd.f32 %v4865_v54, %v3797_v48  ;;  %v9307_v54 = vld [vmem:[#allocation52_spill] sm:$0xff] }
 0x3dc   : > { %v3743_v37 = vpop.f32.mrf.mxu1  ;;  %v2824_v52 = vadd.f32 %v8738_v56, %v9307_v54 }
 0x3dd   : > { %v3798_v31 = vadd.f32 %v3743_v37, %v2811_v44  ;;  %v4957_v60 = vadd.f32 %v8826_v43, %v4921_v6  ;;  %v9308_v37 = vld [vmem:[#allocation13_spill] sm:$0xff] }
 0x3de   : > { %v2826_v27 = vadd.f32 %v8749_v62, %v9308_v37 }
 0x3e2   : > { %v4867_v4 = vpop.f32.mrf.mxu3 }
 0x3e3   : > { %v4922_v29 = vadd.f32 %v4867_v4, %v3798_v31 }
 0x3e4   : > { %v3746_v8 = vpop.f32.mrf.mxu1 }
 0x3e5   : > { %v4958_v47 = vadd.f32 %v8826_v43, %v4922_v29  ;;  %v3799_v28 = vadd.f32 %v3746_v8, %v2814_v30 }
 0x3e7   : > { %v5786_v55 = vpack.c.bf16 %v4958_v47, %v4957_v60  ;;  %v9309_v47 = vld [vmem:[#allocation17_spill] sm:$0xff] }
 0x3e8   : > { %v2829_v56 = vadd.f32 %v8761_v20, %v9309_v47 }
 0x3e9   : > { %5925 = vst [vmem:[%s8835_s6 + $0x40] sm:$0xff] %v5786_v55   ;;  %v9310_v55 = vld [vmem:[#allocation15_spill] sm:$0xff] }
 0x3ea   : > { %v4870_v46 = vpop.f32.mrf.mxu3  ;;  %v2831_v62 = vadd.f32 %v8772_v24, %v9310_v55 }
 0x3eb   : > { %v4923_v51 = vadd.f32 %v4870_v46, %v3799_v28 }
 0x3ec   : > { %v3748_v58 = vpop.f32.mrf.mxu1 }
 0x3ed   : > { %v3800_v23 = vadd.f32 %v3748_v58, %v2816_v35  ;;  %v4959_v18 = vadd.f32 %v8826_v43, %v4923_v51 }
 0x3f2   : > { %v4872_v10 = vpop.f32.mrf.mxu3 }
 0x3f3   : > { %v4924_v41 = vadd.f32 %v4872_v10, %v3800_v23 }
 0x3f4   : > { %v3751_v26 = vpop.f32.mrf.mxu1 }
 0x3f5   : > { %v4960_v1 = vadd.f32 %v8826_v43, %v4924_v41  ;;  %v3801_v16 = vadd.f32 %v3751_v26, %v2819_v15  ;;  %v9311_v26 = vld [vmem:[#allocation2_spill] sm:$0xff] }
 0x3f6   : > { %v2834_v20 = vadd.f32 %v8786_v5, %v9311_v26  ;;  %v2839_v5 = vadd.f32 %v8799_v38, %v8477_v42  ;;  %v2844_v42 = vadd.f32 %v8808_v22, %v8545_v7 }
 0x3f7   : > { %v5791_v14 = vpack.c.bf16 %v4960_v1, %v4959_v18  ;;  %v9312_v18 = vld [vmem:[#allocation62_spill] sm:$0xff] }
 0x3f8   : > { %v2836_v24 = vadd.f32 %v8793_v49, %v9312_v18  ;;  %v2841_v49 = vadd.f32 %v8806_v33, %v8514_v61  ;;  %v2846_v61 = vadd.f32 %v8814_v9, %v8565_v50 }
 0x3f9   : > { %5926 = vst [vmem:[%s8835_s6 + $0x48] sm:$0xff] %v5791_v14  }
 0x3fa   : > { %v4875_v59 = vpop.f32.mrf.mxu3 }
 0x3fb   : > { %v4925_v39 = vadd.f32 %v4875_v59, %v3801_v16 }
 0x3fc   : > { %v3753_v19 = vpop.f32.mrf.mxu1 }
 0x3fd   : > { %v3802_v36 = vadd.f32 %v3753_v19, %v2821_v12  ;;  %v4961_v13 = vadd.f32 %v8826_v43, %v4925_v39 }
 0x402   : > { %v4877_v63 = vpop.f32.mrf.mxu3 }
 0x403   : > { %v4926_v25 = vadd.f32 %v4877_v63, %v3802_v36 }
 0x404   : > { %v3756_v21 = vpop.f32.mrf.mxu1 }
 0x405   : > { %v4962_v45 = vadd.f32 %v8826_v43, %v4926_v25  ;;  %v3803_v2 = vadd.f32 %v3756_v21, %v2824_v52 }
 0x407   : > { %v5796_v53 = vpack.c.bf16 %v4962_v45, %v4961_v13 }
 0x409   : > { %5927 = vst [vmem:[%s8835_s6 + $0x50] sm:$0xff] %v5796_v53  }
 0x40a   : > { %v4880_v11 = vpop.f32.mrf.mxu3 }
 0x40b   : > { %v4927_v0 = vadd.f32 %v4880_v11, %v3803_v2 }
 0x40c   : > { %v3758_v40 = vpop.f32.mrf.mxu1 }
 0x40d   : > { %v3804_v3 = vadd.f32 %v3758_v40, %v2826_v27  ;;  %v4963_v31 = vadd.f32 %v8826_v43, %v4927_v0 }
 0x412   : > { %v4882_v44 = vpop.f32.mrf.mxu3 }
 0x413   : > { %v4928_v48 = vadd.f32 %v4882_v44, %v3804_v3 }
 0x414   : > { %v3761_v6 = vpop.f32.mrf.mxu1 }
 0x415   : > { %v4964_v4 = vadd.f32 %v8826_v43, %v4928_v48  ;;  %v3805_v46 = vadd.f32 %v3761_v6, %v2829_v56 }
 0x417   : > { %v5801_v29 = vpack.c.bf16 %v4964_v4, %v4963_v31 }
 0x419   : > { %5928 = vst [vmem:[%s8835_s6 + $0x58] sm:$0xff] %v5801_v29  }
 0x41a   : > { %v4885_v8 = vpop.f32.mrf.mxu3 }
 0x41b   : > { %v4929_v58 = vadd.f32 %v4885_v8, %v3805_v46 }
 0x41c   : > { %v3763_v60 = vpop.f32.mrf.mxu1 }
 0x41d   : > { %v3806_v17 = vadd.f32 %v3763_v60, %v2831_v62  ;;  %v4965_v28 = vadd.f32 %v8826_v43, %v4929_v58 }
 0x422   : > { %v4887_v30 = vpop.f32.mrf.mxu3 }
 0x423   : > { %v4930_v32 = vadd.f32 %v4887_v30, %v3806_v17 }
 0x424   : > { %v3766_v35 = vpop.f32.mrf.mxu1 }
 0x425   : > { %v4966_v51 = vadd.f32 %v8826_v43, %v4930_v32  ;;  %v3807_v1 = vadd.f32 %v3766_v35, %v2834_v20 }
 0x427   : > { %v5806_v23 = vpack.c.bf16 %v4966_v51, %v4965_v28 }
 0x429   : > { %5929 = vst [vmem:[%s8835_s6 + $0x60] sm:$0xff] %v5806_v23  }
 0x42a   : > { %v4890_v10 = vpop.f32.mrf.mxu3 }
 0x42b   : > { %v4931_v14 = vadd.f32 %v4890_v10, %v3807_v1 }
 0x42c   : > { %v3768_v41 = vpop.f32.mrf.mxu1 }
 0x42d   : > { %v3808_v59 = vadd.f32 %v3768_v41, %v2836_v24  ;;  %v4967_v57 = vadd.f32 %v8826_v43, %v4931_v14 }
 0x432   : > { %v4892_v19 = vpop.f32.mrf.mxu3 }
 0x433   : > { %v4932_v34 = vadd.f32 %v4892_v19, %v3808_v59 }
 0x434   : > { %v3771_v15 = vpop.f32.mrf.mxu1 }
 0x435   : > { %v4968_v12 = vadd.f32 %v8826_v43, %v4932_v34  ;;  %v3809_v63 = vadd.f32 %v3771_v15, %v2839_v5 }
 0x437   : > { %v5811_v16 = vpack.c.bf16 %v4968_v12, %v4967_v57 }
 0x439   : > { %5930 = vst [vmem:[%s8835_s6 + $0x68] sm:$0xff] %v5811_v16  }
 0x43a   : > { %v4895_v39 = vpop.f32.mrf.mxu3 }
 0x43b   : > { %v4933_v25 = vadd.f32 %v4895_v39, %v3809_v63 }
 0x43c   : > { %v3773_v36 = vpop.f32.mrf.mxu1 }
 0x43d   : > { %v3810_v21 = vadd.f32 %v3773_v36, %v2841_v49  ;;  %v4969_v11 = vadd.f32 %v8826_v43, %v4933_v25 }
 0x442   : > { %v4897_v13 = vpop.f32.mrf.mxu3 }
 0x443   : > { %v4934_v45 = vadd.f32 %v4897_v13, %v3810_v21 }
 0x444   : > { %v3776_v53 = vpop.f32.mrf.mxu1 }
 0x445   : > { %v4970_v40 = vadd.f32 %v8826_v43, %v4934_v45  ;;  %v3811_v33 = vadd.f32 %v3776_v53, %v2844_v42 }
 0x447   : > { %v5816_v54 = vpack.c.bf16 %v4970_v40, %v4969_v11 }
 0x449   : > { %5931 = vst [vmem:[%s8835_s6 + $0x70] sm:$0xff] %v5816_v54  }
 0x44a   : > { %v4900_v52 = vpop.f32.mrf.mxu3 }
 0x44b   : > { %v4935_v37 = vadd.f32 %v4900_v52, %v3811_v33 }
 0x44c   : > { %v3778_v38 = vpop.f32.mrf.mxu1 }
 0x44d   : > { %v3812_v27 = vadd.f32 %v3778_v38, %v2846_v61  ;;  %v4971_v3 = vadd.f32 %v8826_v43, %v4935_v37 }
 0x452   : > { %v4902_v2 = vpop.f32.mrf.mxu3 }
 0x453   : > { %v4936_v0 = vadd.f32 %v4902_v2, %v3812_v27 }
 0x455   : > { %v4972_v44 = vadd.f32 %v8826_v43, %v4936_v0 }
 0x457   : > { %v5821_v48 = vpack.c.bf16 %v4972_v44, %v4971_v3 }
 0x459   : > { %5932 = vst [vmem:[%s8835_s6 + $0x78] sm:$0xff] %v5821_v48  }
 0x45a PF: > { %s15_s18 = sadd.s32 1, %s6028_s18  }
 0x45b   : > { %p12_p4 = scmp.ge.s32.totalorder %s15_s18, 4  }
 0x45d   :  { %14 = sbr.rel (!%p12_p4) target bundleno = 1 (0x1), region = 78 }

</bundles_post_ra>
